<compile_context>
chip_gen: v7x
topology: tpu7x:2x2x1
jax: 0.10.0
libtpu: 0.0.40
codegen_flags: <defaults>
</compile_context>

<pallas_src>
import functools
import math

import jax
import jax.numpy as jnp
from jax.experimental import pallas as pl
from jax.experimental.pallas import tpu as pltpu

LN_EPS = 1e-5  # PyTorch nn.LayerNorm default


# ----------------------------- in-kernel helpers ------------------------------

def _layernorm(x, gamma, beta):
    """LayerNorm over last axis. x: (N, D) f32, gamma/beta: (1, D)."""
    mean = jnp.mean(x, axis=-1, keepdims=True)
    var = jnp.mean(jnp.square(x - mean), axis=-1, keepdims=True)
    return (x - mean) * jax.lax.rsqrt(var + LN_EPS) * gamma + beta


def _gelu(x):
    # TODO(synk): torch F.gelu is exact-erf; tanh-approx GELU used here (delta ~1e-3).
    return jax.nn.gelu(x, approximate=True)


# ----------------------------- Pallas kernels ------------------------------

def _fused_attention_kernel(q_ref, kv_ref, wq_ref, bq_ref, wkv_ref, bkv_ref,
                            wo_ref, bo_ref, g_ref, b_ref, o_ref,
                            *, head_num, atten_dim, scale):
    """out = LayerNorm(MHA(q_in; kv_in) + q_in) for one batch element, fully in VMEM."""
    x = q_ref[0].astype(jnp.float32)        # (Tq, Din)
    kv_in = kv_ref[0].astype(jnp.float32)   # (Tk, Din)
    wq = wq_ref[...].astype(jnp.float32)    # (Din, H)
    wkv = wkv_ref[...].astype(jnp.float32)  # (Din, 2H)
    wo = wo_ref[...].astype(jnp.float32)    # (H, Din)

    h = head_num * atten_dim
    # fused projections; 1/sqrt(dh) folded into Q (scales scores identically)
    q = (jnp.dot(x, wq, preferred_element_type=jnp.float32) + bq_ref[...]) * scale
    kvp = jnp.dot(kv_in, wkv, preferred_element_type=jnp.float32) + bkv_ref[...]
    k = kvp[:, :h]
    v = kvp[:, h:]

    # residual + output-projection bias; head contributions accumulated directly
    # through wo's row blocks (no head concat, no layout reshuffle).
    y = x + bo_ref[...]
    for hd in range(head_num):
        lo = hd * atten_dim
        hi = lo + atten_dim
        qh = q[:, lo:hi]
        kh = k[:, lo:hi]
        vh = v[:, lo:hi]
        s = jax.lax.dot_general(qh, kh, (((1,), (1,)), ((), ())),
                                preferred_element_type=jnp.float32)   # (Tq, Tk)
        s = s - jnp.max(s, axis=-1, keepdims=True)
        p = jnp.exp(s)
        p = p * pl.reciprocal(jnp.sum(p, axis=-1, keepdims=True), approx=True)
        ph = jnp.dot(p, vh, preferred_element_type=jnp.float32)       # (Tq, dh)
        y = y + jnp.dot(ph, wo[lo:hi, :], preferred_element_type=jnp.float32)

    o_ref[0] = _layernorm(y, g_ref[...], b_ref[...]).astype(o_ref.dtype)


def _fused_ffn_kernel(x_ref, w1_ref, b1_ref, w2_ref, b2_ref, g_ref, b_ref, o_ref):
    """out = LayerNorm(conv2(GELU(conv1(x))) + x); 1x1 convs are feature-axis matmuls."""
    x = x_ref[0].astype(jnp.float32)                                   # (L, D)
    hmid = jnp.dot(x, w1_ref[...], preferred_element_type=jnp.float32) + b1_ref[...]
    hmid = _gelu(hmid)
    y = jnp.dot(hmid, w2_ref[...], preferred_element_type=jnp.float32) + b2_ref[...]
    o_ref[0] = _layernorm(y + x, g_ref[...], b_ref[...]).astype(o_ref.dtype)


def _fused_head_kernel(t_ref, s_ref, g1t_ref, g1s_ref, be1t_ref, be1s_ref,
                       w1t_ref, w1s_ref, b1_ref, w2_ref, b2_ref,
                       g2_ref, be2_ref, o_ref):
    """norm2(conv2(GELU(conv1(norm1(cat[t, s]))))) with the concat never materialized."""
    t = t_ref[0].astype(jnp.float32)   # (L, D) temporal branch
    s = s_ref[0].astype(jnp.float32)   # (L, D) spatial branch
    d = t.shape[-1]

    # LayerNorm over the virtual concat([t, s], -1) from partial sums.
    mean = (jnp.sum(t, axis=-1, keepdims=True)
            + jnp.sum(s, axis=-1, keepdims=True)) / (2.0 * d)
    var = (jnp.sum(jnp.square(t - mean), axis=-1, keepdims=True)
           + jnp.sum(jnp.square(s - mean), axis=-1, keepdims=True)) / (2.0 * d)
    inv = jax.lax.rsqrt(var + LN_EPS)
    tn = (t - mean) * inv * g1t_ref[...] + be1t_ref[...]
    sn = (s - mean) * inv * g1s_ref[...] + be1s_ref[...]

    # conv1 over the concat == tn @ W1[:D] + sn @ W1[D:]
    hmid = (jnp.dot(tn, w1t_ref[...], preferred_element_type=jnp.float32)
            + jnp.dot(sn, w1s_ref[...], preferred_element_type=jnp.float32)
            + b1_ref[...])
    hmid = _gelu(hmid)
    y = jnp.dot(hmid, w2_ref[...], preferred_element_type=jnp.float32) + b2_ref[...]
    o_ref[0] = _layernorm(y, g2_ref[...], be2_ref[...]).astype(o_ref.dtype)


# ----------------------------- kernel wrappers ------------------------------

def fused_attention_block(q_in, kv_in, p, head_num, atten_dim):
    """q_in: (B, Lq, Din), kv_in: (B, Lk, Din) -> (B, Lq, Din). One grid step per batch."""
    b, lq, din = q_in.shape
    lk = kv_in.shape[1]
    h = head_num * atten_dim
    kern = functools.partial(_fused_attention_kernel, head_num=head_num,
                             atten_dim=atten_dim, scale=1.0 / math.sqrt(atten_dim))
    return pl.pallas_call(
        kern,
        out_shape=jax.ShapeDtypeStruct((b, lq, din), q_in.dtype),
        grid=(b,),
        in_specs=[
            pl.BlockSpec((1, lq, din), lambda i: (i, 0, 0)),
            pl.BlockSpec((1, lk, din), lambda i: (i, 0, 0)),
            pl.BlockSpec((din, h), lambda i: (0, 0)),
            pl.BlockSpec((1, h), lambda i: (0, 0)),
            pl.BlockSpec((din, 2 * h), lambda i: (0, 0)),
            pl.BlockSpec((1, 2 * h), lambda i: (0, 0)),
            pl.BlockSpec((h, din), lambda i: (0, 0)),
            pl.BlockSpec((1, din), lambda i: (0, 0)),
            pl.BlockSpec((1, din), lambda i: (0, 0)),
            pl.BlockSpec((1, din), lambda i: (0, 0)),
        ],
        out_specs=pl.BlockSpec((1, lq, din), lambda i: (i, 0, 0)),
        compiler_params=pltpu.CompilerParams(dimension_semantics=("parallel",)),
    )(q_in, kv_in,
      p["wq"], p["bq"].reshape(1, h),
      p["wkv"], p["bkv"].reshape(1, 2 * h),
      p["wo"], p["bo"].reshape(1, din),
      p["ln_g"].reshape(1, din), p["ln_b"].reshape(1, din))


def fused_ffn_block(x, p):
    """x: (B, L, D) -> LayerNorm(FFN(x) + x), one pallas_call."""
    b, l, d = x.shape
    f = p["w1"].shape[1]
    return pl.pallas_call(
        _fused_ffn_kernel,
        out_shape=jax.ShapeDtypeStruct((b, l, d), x.dtype),
        grid=(b,),
        in_specs=[
            pl.BlockSpec((1, l, d), lambda i: (i, 0, 0)),
            pl.BlockSpec((d, f), lambda i: (0, 0)),
            pl.BlockSpec((1, f), lambda i: (0, 0)),
            pl.BlockSpec((f, d), lambda i: (0, 0)),
            pl.BlockSpec((1, d), lambda i: (0, 0)),
            pl.BlockSpec((1, d), lambda i: (0, 0)),
            pl.BlockSpec((1, d), lambda i: (0, 0)),
        ],
        out_specs=pl.BlockSpec((1, l, d), lambda i: (i, 0, 0)),
        compiler_params=pltpu.CompilerParams(dimension_semantics=("parallel",)),
    )(x, p["w1"], p["b1"].reshape(1, f), p["w2"], p["b2"].reshape(1, d),
      p["ln_g"].reshape(1, d), p["ln_b"].reshape(1, d))


def fused_head(t, s, p):
    """Final spatio-temporal head: concat-LN + MLP + LN2 in one pallas_call."""
    b, l, d = t.shape
    f = p["w1_t"].shape[1]
    return pl.pallas_call(
        _fused_head_kernel,
        out_shape=jax.ShapeDtypeStruct((b, l, d), t.dtype),
        grid=(b,),
        in_specs=[
            pl.BlockSpec((1, l, d), lambda i: (i, 0, 0)),
            pl.BlockSpec((1, l, d), lambda i: (i, 0, 0)),
            pl.BlockSpec((1, d), lambda i: (0, 0)),   # ln1 gamma (temporal half)
            pl.BlockSpec((1, d), lambda i: (0, 0)),   # ln1 gamma (spatial half)
            pl.BlockSpec((1, d), lambda i: (0, 0)),   # ln1 beta  (temporal half)
            pl.BlockSpec((1, d), lambda i: (0, 0)),   # ln1 beta  (spatial half)
            pl.BlockSpec((d, f), lambda i: (0, 0)),   # w1 (temporal half)
            pl.BlockSpec((d, f), lambda i: (0, 0)),   # w1 (spatial half)
            pl.BlockSpec((1, f), lambda i: (0, 0)),
            pl.BlockSpec((f, d), lambda i: (0, 0)),
            pl.BlockSpec((1, d), lambda i: (0, 0)),
            pl.BlockSpec((1, d), lambda i: (0, 0)),
            pl.BlockSpec((1, d), lambda i: (0, 0)),
        ],
        out_specs=pl.BlockSpec((1, l, d), lambda i: (i, 0, 0)),
        compiler_params=pltpu.CompilerParams(dimension_semantics=("parallel",)),
    )(t, s,
      p["ln1_g_t"].reshape(1, d), p["ln1_g_s"].reshape(1, d),
      p["ln1_b_t"].reshape(1, d), p["ln1_b_s"].reshape(1, d),
      p["w1_t"], p["w1_s"], p["b1"].reshape(1, f),
      p["w2"], p["b2"].reshape(1, d),
      p["ln2_g"].reshape(1, d), p["ln2_b"].reshape(1, d))


# ----------------------------- model (glue in plain JAX) ------------------------------

def component_attention(x, high_freq, low_freq, p, head_num, atten_dim):
    # TODO(synk): ComponentAttention source not provided; cross-attention with Q=x and
    # K/V=concat(high_freq, low_freq) along seq, + residual + LayerNorm assumed.
    kv = jnp.concatenate([high_freq, low_freq], axis=1)
    return fused_attention_block(x, kv, p, head_num, atten_dim)


def temporal_block(x, p, head_num, atten_dim):
    # TODO(synk): OrdinaryAttention source not provided; post-norm residual self-MHA assumed.
    a = fused_attention_block(x, x, p["attn"], head_num, atten_dim)
    return fused_ffn_block(a, p["ffn"])


def spatial_block(x, p, head_num, atten_dim):
    # Attention over the transposed layout (tokens = features, feature dim = window).
    # TODO(synk): the (0,2,1) transposes stay at XLA level (BlockSpec cannot permute dims).
    xp = jnp.transpose(x, (0, 2, 1))                      # (B, D, L)
    a = fused_attention_block(xp, xp, p["attn"], head_num, atten_dim)
    a = jnp.transpose(a, (0, 2, 1))                       # (B, L, D)
    return fused_ffn_block(a, p["ffn"])


def spatio_temporal_block(x, p, head_num, atten_dim):
    t = temporal_block(x, p["temporal"], head_num, atten_dim)
    s = spatial_block(x, p["spatial"], head_num, atten_dim)
    return fused_head(t, s, p)


def component_aware_block(x, high_freq, low_freq, params, head_num, atten_dim):
    x = component_attention(x, high_freq, low_freq, params["comp_attn"], head_num, atten_dim)
    return spatio_temporal_block(x, params["transformer"], head_num, atten_dim)


# ----------------------------- deterministic parameter init ------------------------------

def _kaiming(key, shape):
    fan_in = shape[0]
    gain = math.sqrt(2.0 / (1.0 + 0.01 ** 2))   # kaiming_normal_, leaky_relu default slope
    std = gain / math.sqrt(fan_in)
    return std * jax.random.normal(key, shape, dtype=jnp.float32)


def make_attention_params(key, in_dim, atten_dim, head_num):
    h = atten_dim * head_num
    ks = jax.random.split(key, 4)
    wk = _kaiming(ks[1], (in_dim, h))
    wv = _kaiming(ks[2], (in_dim, h))
    return {
        "wq": _kaiming(ks[0], (in_dim, h)), "bq": jnp.zeros((h,), jnp.float32),
        "wkv": jnp.concatenate([wk, wv], axis=1), "bkv": jnp.zeros((2 * h,), jnp.float32),
        "wo": _kaiming(ks[3], (h, in_dim)), "bo": jnp.zeros((in_dim,), jnp.float32),
        "ln_g": jnp.ones((in_dim,), jnp.float32), "ln_b": jnp.zeros((in_dim,), jnp.float32),
    }


def make_ffn_params(key, in_dim, ff_dim, out_dim):
    ks = jax.random.split(key, 2)
    return {
        "w1": _kaiming(ks[0], (in_dim, ff_dim)), "b1": jnp.zeros((ff_dim,), jnp.float32),
        "w2": _kaiming(ks[1], (ff_dim, out_dim)), "b2": jnp.zeros((out_dim,), jnp.float32),
        "ln_g": jnp.ones((out_dim,), jnp.float32), "ln_b": jnp.zeros((out_dim,), jnp.float32),
    }


def make_params(key, window_size, model_dim, ff_dim, atten_dim, head_num):
    ks = jax.random.split(key, 7)
    w1_full = _kaiming(ks[5], (2 * model_dim, ff_dim))   # conv1 over the concat (fan_in = 2*D)
    return {
        "comp_attn": make_attention_params(ks[0], model_dim, atten_dim, head_num),
        "transformer": {
            "temporal": {
                "attn": make_attention_params(ks[1], model_dim, atten_dim, head_num),
                "ffn": make_ffn_params(ks[2], model_dim, ff_dim, model_dim),
            },
            "spatial": {
                "attn": make_attention_params(ks[3], window_size, atten_dim, head_num),
                "ffn": make_ffn_params(ks[4], model_dim, ff_dim, model_dim),
            },
            "w1_t": w1_full[:model_dim], "w1_s": w1_full[model_dim:],
            "b1": jnp.zeros((ff_dim,), jnp.float32),
            "w2": _kaiming(ks[6], (ff_dim, model_dim)), "b2": jnp.zeros((model_dim,), jnp.float32),
            "ln1_g_t": jnp.ones((model_dim,), jnp.float32), "ln1_g_s": jnp.ones((model_dim,), jnp.float32),
            "ln1_b_t": jnp.zeros((model_dim,), jnp.float32), "ln1_b_s": jnp.zeros((model_dim,), jnp.float32),
            "ln2_g": jnp.ones((model_dim,), jnp.float32), "ln2_b": jnp.zeros((model_dim,), jnp.float32),
        },
    }


# ----------------------------- main ------------------------------

if __name__ == "__main__":
    window_size, model_dim, ff_dim, atten_dim, head_num, dropout = 8, 32, 64, 16, 2, 0.1
    batch, seq_len = 2, window_size  # spatial block requires seq_len == window_size

    key = jax.random.PRNGKey(0)
    kx, kh, kl, kp = jax.random.split(key, 4)
    x = jax.random.normal(kx, (batch, seq_len, model_dim), jnp.float32)
    high_freq = jax.random.normal(kh, (batch, seq_len, model_dim), jnp.float32)
    low_freq = jax.random.normal(kl, (batch, seq_len, model_dim), jnp.float32)
    params = make_params(kp, window_size, model_dim, ff_dim, atten_dim, head_num)

    fn = jax.jit(functools.partial(component_aware_block, head_num=head_num, atten_dim=atten_dim))
    out = fn(x, high_freq, low_freq, params)
    jax.block_until_ready(out)
    assert out.shape == (batch, seq_len, model_dim)
    assert bool(jnp.all(jnp.isfinite(out)))
    print("KERNEL_OK")
</pallas_src>

<mosaic_0001>
module attributes {stable_mosaic.version = 11 : i64} {
  func.func @_fused_attention_kernel(%arg0: i32, %arg1: memref<1x8x32xf32, #tpu.memory_space<vmem>>, %arg2: memref<1x16x32xf32, #tpu.memory_space<vmem>>, %arg3: memref<32x32xf32, #tpu.memory_space<vmem>>, %arg4: memref<1x32xf32, #tpu.memory_space<vmem>>, %arg5: memref<32x64xf32, #tpu.memory_space<vmem>>, %arg6: memref<1x64xf32, #tpu.memory_space<vmem>>, %arg7: memref<32x32xf32, #tpu.memory_space<vmem>>, %arg8: memref<1x32xf32, #tpu.memory_space<vmem>>, %arg9: memref<1x32xf32, #tpu.memory_space<vmem>>, %arg10: memref<1x32xf32, #tpu.memory_space<vmem>>, %arg11: memref<1x8x32xf32, #tpu.memory_space<vmem>>) attributes {dimension_semantics = [#tpu.dimension_semantics<parallel>], iteration_bounds = array<i64: 2>, scalar_prefetch = 0 : i64, scratch_operands = 0 : i64, tpu.core_type = #tpu.core_type<tc>, window_params = [{transform_indices = @transform_0, window_bounds = array<i64: 1, 8, 32>}, {transform_indices = @transform_1, window_bounds = array<i64: 1, 16, 32>}, {pipeline_mode = #tpu.pipeline_mode<synchronous>, transform_indices = @transform_2, window_bounds = array<i64: 32, 32>}, {pipeline_mode = #tpu.pipeline_mode<synchronous>, transform_indices = @transform_3, window_bounds = array<i64: 1, 32>}, {pipeline_mode = #tpu.pipeline_mode<synchronous>, transform_indices = @transform_4, window_bounds = array<i64: 32, 64>}, {pipeline_mode = #tpu.pipeline_mode<synchronous>, transform_indices = @transform_5, window_bounds = array<i64: 1, 64>}, {pipeline_mode = #tpu.pipeline_mode<synchronous>, transform_indices = @transform_6, window_bounds = array<i64: 32, 32>}, {pipeline_mode = #tpu.pipeline_mode<synchronous>, transform_indices = @transform_7, window_bounds = array<i64: 1, 32>}, {pipeline_mode = #tpu.pipeline_mode<synchronous>, transform_indices = @transform_8, window_bounds = array<i64: 1, 32>}, {pipeline_mode = #tpu.pipeline_mode<synchronous>, transform_indices = @transform_9, window_bounds = array<i64: 1, 32>}, {transform_indices = @transform_10, window_bounds = array<i64: 1, 8, 32>}]} {
    %c0 = arith.constant 0 : index
    %c0_0 = arith.constant 0 : index
    %c0_1 = arith.constant 0 : index
    %0 = vector.load %arg1[%c0, %c0_0, %c0_1] : memref<1x8x32xf32, #tpu.memory_space<vmem>>, vector<1x8x32xf32>
    %1 = vector.shape_cast %0 : vector<1x8x32xf32> to vector<8x32xf32>
    %c0_2 = arith.constant 0 : index
    %c0_3 = arith.constant 0 : index
    %c0_4 = arith.constant 0 : index
    %2 = vector.load %arg2[%c0_2, %c0_3, %c0_4] : memref<1x16x32xf32, #tpu.memory_space<vmem>>, vector<1x16x32xf32>
    %3 = vector.shape_cast %2 : vector<1x16x32xf32> to vector<16x32xf32>
    %c0_5 = arith.constant 0 : index
    %c0_6 = arith.constant 0 : index
    %4 = vector.load %arg3[%c0_5, %c0_6] : memref<32x32xf32, #tpu.memory_space<vmem>>, vector<32x32xf32>
    %c0_7 = arith.constant 0 : index
    %c0_8 = arith.constant 0 : index
    %5 = vector.load %arg5[%c0_7, %c0_8] : memref<32x64xf32, #tpu.memory_space<vmem>>, vector<32x64xf32>
    %c0_9 = arith.constant 0 : index
    %c0_10 = arith.constant 0 : index
    %6 = vector.load %arg7[%c0_9, %c0_10] : memref<32x32xf32, #tpu.memory_space<vmem>>, vector<32x32xf32>
    %cst = arith.constant dense<0.000000e+00> : vector<8x32xf32>
    %7 = tpu.matmul %1, %4, %cst {dimension_numbers = #tpu.dot_dimension_numbers<[1], [0], [0], [1], [0, 0, 1, 1], [], []>} : vector<8x32xf32>, vector<32x32xf32>, vector<8x32xf32> -> vector<8x32xf32>
    %c0_11 = arith.constant 0 : index
    %c0_12 = arith.constant 0 : index
    %8 = vector.load %arg4[%c0_11, %c0_12] : memref<1x32xf32, #tpu.memory_space<vmem>>, vector<1x32xf32>
    %9 = vector.broadcast %8 : vector<1x32xf32> to vector<8x32xf32>
    %10 = arith.addf %7, %9 : vector<8x32xf32>
    %cst_13 = arith.constant 2.500000e-01 : f32
    %11 = vector.broadcast %cst_13 : f32 to vector<8x32xf32>
    %12 = arith.mulf %10, %11 : vector<8x32xf32>
    %cst_14 = arith.constant dense<0.000000e+00> : vector<16x64xf32>
    %13 = tpu.matmul %3, %5, %cst_14 {dimension_numbers = #tpu.dot_dimension_numbers<[1], [0], [0], [1], [0, 0, 1, 1], [], []>} : vector<16x32xf32>, vector<32x64xf32>, vector<16x64xf32> -> vector<16x64xf32>
    %c0_15 = arith.constant 0 : index
    %c0_16 = arith.constant 0 : index
    %14 = vector.load %arg6[%c0_15, %c0_16] : memref<1x64xf32, #tpu.memory_space<vmem>>, vector<1x64xf32>
    %15 = vector.broadcast %14 : vector<1x64xf32> to vector<16x64xf32>
    %16 = arith.addf %13, %15 : vector<16x64xf32>
    %17 = vector.extract_strided_slice %16 {offsets = [0, 0], sizes = [16, 32], strides = [1, 1]} : vector<16x64xf32> to vector<16x32xf32>
    %18 = vector.extract_strided_slice %16 {offsets = [0, 32], sizes = [16, 32], strides = [1, 1]} : vector<16x64xf32> to vector<16x32xf32>
    %c0_17 = arith.constant 0 : index
    %c0_18 = arith.constant 0 : index
    %19 = vector.load %arg8[%c0_17, %c0_18] : memref<1x32xf32, #tpu.memory_space<vmem>>, vector<1x32xf32>
    %20 = vector.broadcast %19 : vector<1x32xf32> to vector<8x32xf32>
    %21 = arith.addf %1, %20 : vector<8x32xf32>
    %22 = vector.extract_strided_slice %12 {offsets = [0, 0], sizes = [8, 16], strides = [1, 1]} : vector<8x32xf32> to vector<8x16xf32>
    %23 = vector.extract_strided_slice %17 {offsets = [0, 0], sizes = [16, 16], strides = [1, 1]} : vector<16x32xf32> to vector<16x16xf32>
    %24 = vector.extract_strided_slice %18 {offsets = [0, 0], sizes = [16, 16], strides = [1, 1]} : vector<16x32xf32> to vector<16x16xf32>
    %cst_19 = arith.constant dense<0.000000e+00> : vector<8x16xf32>
    %25 = tpu.matmul %22, %23, %cst_19 {dimension_numbers = #tpu.dot_dimension_numbers<[1], [1], [0], [0], [0, 0, 1, 0], [], []>} : vector<8x16xf32>, vector<16x16xf32>, vector<8x16xf32> -> vector<8x16xf32>
    %cst_20 = arith.constant dense<0xFF800000> : vector<8xf32>
    %26 = vector.multi_reduction <maximumf>, %25, %cst_20 [1] : vector<8x16xf32> to vector<8xf32>
    %27 = vector.shape_cast %26 : vector<8xf32> to vector<8x1xf32>
    %28 = vector.broadcast %27 : vector<8x1xf32> to vector<8x16xf32>
    %29 = arith.subf %25, %28 : vector<8x16xf32>
    %30 = math.exp %29 : vector<8x16xf32>
    %cst_21 = arith.constant dense<0.000000e+00> : vector<8xf32>
    %31 = vector.multi_reduction <add>, %30, %cst_21 [1] : vector<8x16xf32> to vector<8xf32>
    %32 = vector.shape_cast %31 : vector<8xf32> to vector<8x1xf32>
    %33 = tpu.reciprocal %32 {approx = true} : vector<8x1xf32> -> vector<8x1xf32>
    %34 = vector.broadcast %33 : vector<8x1xf32> to vector<8x16xf32>
    %35 = arith.mulf %30, %34 : vector<8x16xf32>
    %cst_22 = arith.constant dense<0.000000e+00> : vector<8x16xf32>
    %36 = tpu.matmul %35, %24, %cst_22 {dimension_numbers = #tpu.dot_dimension_numbers<[1], [0], [0], [1], [0, 0, 1, 1], [], []>} : vector<8x16xf32>, vector<16x16xf32>, vector<8x16xf32> -> vector<8x16xf32>
    %37 = vector.extract_strided_slice %6 {offsets = [0, 0], sizes = [16, 32], strides = [1, 1]} : vector<32x32xf32> to vector<16x32xf32>
    %cst_23 = arith.constant dense<0.000000e+00> : vector<8x32xf32>
    %38 = tpu.matmul %36, %37, %cst_23 {dimension_numbers = #tpu.dot_dimension_numbers<[1], [0], [0], [1], [0, 0, 1, 1], [], []>} : vector<8x16xf32>, vector<16x32xf32>, vector<8x32xf32> -> vector<8x32xf32>
    %39 = arith.addf %21, %38 : vector<8x32xf32>
    %40 = vector.extract_strided_slice %12 {offsets = [0, 16], sizes = [8, 16], strides = [1, 1]} : vector<8x32xf32> to vector<8x16xf32>
    %41 = vector.extract_strided_slice %17 {offsets = [0, 16], sizes = [16, 16], strides = [1, 1]} : vector<16x32xf32> to vector<16x16xf32>
    %42 = vector.extract_strided_slice %18 {offsets = [0, 16], sizes = [16, 16], strides = [1, 1]} : vector<16x32xf32> to vector<16x16xf32>
    %cst_24 = arith.constant dense<0.000000e+00> : vector<8x16xf32>
    %43 = tpu.matmul %40, %41, %cst_24 {dimension_numbers = #tpu.dot_dimension_numbers<[1], [1], [0], [0], [0, 0, 1, 0], [], []>} : vector<8x16xf32>, vector<16x16xf32>, vector<8x16xf32> -> vector<8x16xf32>
    %cst_25 = arith.constant dense<0xFF800000> : vector<8xf32>
    %44 = vector.multi_reduction <maximumf>, %43, %cst_25 [1] : vector<8x16xf32> to vector<8xf32>
    %45 = vector.shape_cast %44 : vector<8xf32> to vector<8x1xf32>
    %46 = vector.broadcast %45 : vector<8x1xf32> to vector<8x16xf32>
    %47 = arith.subf %43, %46 : vector<8x16xf32>
    %48 = math.exp %47 : vector<8x16xf32>
    %cst_26 = arith.constant dense<0.000000e+00> : vector<8xf32>
    %49 = vector.multi_reduction <add>, %48, %cst_26 [1] : vector<8x16xf32> to vector<8xf32>
    %50 = vector.shape_cast %49 : vector<8xf32> to vector<8x1xf32>
    %51 = tpu.reciprocal %50 {approx = true} : vector<8x1xf32> -> vector<8x1xf32>
    %52 = vector.broadcast %51 : vector<8x1xf32> to vector<8x16xf32>
    %53 = arith.mulf %48, %52 : vector<8x16xf32>
    %cst_27 = arith.constant dense<0.000000e+00> : vector<8x16xf32>
    %54 = tpu.matmul %53, %42, %cst_27 {dimension_numbers = #tpu.dot_dimension_numbers<[1], [0], [0], [1], [0, 0, 1, 1], [], []>} : vector<8x16xf32>, vector<16x16xf32>, vector<8x16xf32> -> vector<8x16xf32>
    %55 = vector.extract_strided_slice %6 {offsets = [16, 0], sizes = [16, 32], strides = [1, 1]} : vector<32x32xf32> to vector<16x32xf32>
    %cst_28 = arith.constant dense<0.000000e+00> : vector<8x32xf32>
    %56 = tpu.matmul %54, %55, %cst_28 {dimension_numbers = #tpu.dot_dimension_numbers<[1], [0], [0], [1], [0, 0, 1, 1], [], []>} : vector<8x16xf32>, vector<16x32xf32>, vector<8x32xf32> -> vector<8x32xf32>
    %57 = arith.addf %39, %56 : vector<8x32xf32>
    %c0_29 = arith.constant 0 : index
    %c0_30 = arith.constant 0 : index
    %58 = vector.load %arg9[%c0_29, %c0_30] : memref<1x32xf32, #tpu.memory_space<vmem>>, vector<1x32xf32>
    %c0_31 = arith.constant 0 : index
    %c0_32 = arith.constant 0 : index
    %59 = vector.load %arg10[%c0_31, %c0_32] : memref<1x32xf32, #tpu.memory_space<vmem>>, vector<1x32xf32>
    %cst_33 = arith.constant dense<0.000000e+00> : vector<8xf32>
    %60 = vector.multi_reduction <add>, %57, %cst_33 [1] : vector<8x32xf32> to vector<8xf32>
    %61 = vector.shape_cast %60 : vector<8xf32> to vector<8x1xf32>
    %cst_34 = arith.constant 3.200000e+01 : f32
    %62 = vector.broadcast %cst_34 : f32 to vector<8x1xf32>
    %63 = arith.divf %61, %62 : vector<8x1xf32>
    %64 = vector.broadcast %63 : vector<8x1xf32> to vector<8x32xf32>
    %65 = arith.subf %57, %64 : vector<8x32xf32>
    %66 = arith.mulf %65, %65 : vector<8x32xf32>
    %cst_35 = arith.constant dense<0.000000e+00> : vector<8xf32>
    %67 = vector.multi_reduction <add>, %66, %cst_35 [1] : vector<8x32xf32> to vector<8xf32>
    %68 = vector.shape_cast %67 : vector<8xf32> to vector<8x1xf32>
    %cst_36 = arith.constant 3.200000e+01 : f32
    %69 = vector.broadcast %cst_36 : f32 to vector<8x1xf32>
    %70 = arith.divf %68, %69 : vector<8x1xf32>
    %71 = vector.broadcast %63 : vector<8x1xf32> to vector<8x32xf32>
    %72 = arith.subf %57, %71 : vector<8x32xf32>
    %cst_37 = arith.constant 9.99999974E-6 : f32
    %73 = vector.broadcast %cst_37 : f32 to vector<8x1xf32>
    %74 = arith.addf %70, %73 : vector<8x1xf32>
    %75 = math.rsqrt %74 : vector<8x1xf32>
    %76 = vector.broadcast %75 : vector<8x1xf32> to vector<8x32xf32>
    %77 = arith.mulf %72, %76 : vector<8x32xf32>
    %78 = vector.broadcast %58 : vector<1x32xf32> to vector<8x32xf32>
    %79 = arith.mulf %77, %78 : vector<8x32xf32>
    %80 = vector.broadcast %59 : vector<1x32xf32> to vector<8x32xf32>
    %81 = arith.addf %79, %80 : vector<8x32xf32>
    %c0_38 = arith.constant 0 : index
    %c0_39 = arith.constant 0 : index
    %c0_40 = arith.constant 0 : index
    %82 = vector.load %arg11[%c0_38, %c0_39, %c0_40] : memref<1x8x32xf32, #tpu.memory_space<vmem>>, vector<1x8x32xf32>
    %83 = vector.shape_cast %82 : vector<1x8x32xf32> to vector<8x32xf32>
    %84 = vector.shape_cast %81 : vector<8x32xf32> to vector<1x8x32xf32>
    tpu.vector_store %arg11[%c0_38, %c0_39, %c0_40], %84 {strides = array<i32>} : memref<1x8x32xf32, #tpu.memory_space<vmem>>, vector<1x8x32xf32>,
    return
  }
  func.func @transform_0(%arg0: i32) -> (i32, i32, i32) {
    %c0_i32 = arith.constant 0 : i32
    %c0_i32_0 = arith.constant 0 : i32
    %c0_i32_1 = arith.constant 0 : i32
    return %arg0, %c0_i32, %c0_i32_0 : i32, i32, i32
  }
  func.func @transform_1(%arg0: i32) -> (i32, i32, i32) {
    %c0_i32 = arith.constant 0 : i32
    %c0_i32_0 = arith.constant 0 : i32
    %c0_i32_1 = arith.constant 0 : i32
    return %arg0, %c0_i32, %c0_i32_0 : i32, i32, i32
  }
  func.func @transform_2(%arg0: i32) -> (i32, i32) {
    %c0_i32 = arith.constant 0 : i32
    %c0_i32_0 = arith.constant 0 : i32
    %c0_i32_1 = arith.constant 0 : i32
    return %c0_i32, %c0_i32_0 : i32, i32
  }
  func.func @transform_3(%arg0: i32) -> (i32, i32) {
    %c0_i32 = arith.constant 0 : i32
    %c0_i32_0 = arith.constant 0 : i32
    %c0_i32_1 = arith.constant 0 : i32
    return %c0_i32, %c0_i32_0 : i32, i32
  }
  func.func @transform_4(%arg0: i32) -> (i32, i32) {
    %c0_i32 = arith.constant 0 : i32
    %c0_i32_0 = arith.constant 0 : i32
    %c0_i32_1 = arith.constant 0 : i32
    return %c0_i32, %c0_i32_0 : i32, i32
  }
  func.func @transform_5(%arg0: i32) -> (i32, i32) {
    %c0_i32 = arith.constant 0 : i32
    %c0_i32_0 = arith.constant 0 : i32
    %c0_i32_1 = arith.constant 0 : i32
    return %c0_i32, %c0_i32_0 : i32, i32
  }
  func.func @transform_6(%arg0: i32) -> (i32, i32) {
    %c0_i32 = arith.constant 0 : i32
    %c0_i32_0 = arith.constant 0 : i32
    %c0_i32_1 = arith.constant 0 : i32
    return %c0_i32, %c0_i32_0 : i32, i32
  }
  func.func @transform_7(%arg0: i32) -> (i32, i32) {
    %c0_i32 = arith.constant 0 : i32
    %c0_i32_0 = arith.constant 0 : i32
    %c0_i32_1 = arith.constant 0 : i32
    return %c0_i32, %c0_i32_0 : i32, i32
  }
  func.func @transform_8(%arg0: i32) -> (i32, i32) {
    %c0_i32 = arith.constant 0 : i32
    %c0_i32_0 = arith.constant 0 : i32
    %c0_i32_1 = arith.constant 0 : i32
    return %c0_i32, %c0_i32_0 : i32, i32
  }
  func.func @transform_9(%arg0: i32) -> (i32, i32) {
    %c0_i32 = arith.constant 0 : i32
    %c0_i32_0 = arith.constant 0 : i32
    %c0_i32_1 = arith.constant 0 : i32
    return %c0_i32, %c0_i32_0 : i32, i32
  }
  func.func @transform_10(%arg0: i32) -> (i32, i32, i32) {
    %c0_i32 = arith.constant 0 : i32
    %c0_i32_0 = arith.constant 0 : i32
    %c0_i32_1 = arith.constant 0 : i32
    return %arg0, %c0_i32, %c0_i32_0 : i32, i32, i32
  }
}

module attributes {stable_mosaic.version = 11 : i64} {
  func.func @_fused_attention_kernel(%arg0: i32, %arg1: memref<1x8x32xf32, #tpu.memory_space<vmem>>, %arg2: memref<1x8x32xf32, #tpu.memory_space<vmem>>, %arg3: memref<32x32xf32, #tpu.memory_space<vmem>>, %arg4: memref<1x32xf32, #tpu.memory_space<vmem>>, %arg5: memref<32x64xf32, #tpu.memory_space<vmem>>, %arg6: memref<1x64xf32, #tpu.memory_space<vmem>>, %arg7: memref<32x32xf32, #tpu.memory_space<vmem>>, %arg8: memref<1x32xf32, #tpu.memory_space<vmem>>, %arg9: memref<1x32xf32, #tpu.memory_space<vmem>>, %arg10: memref<1x32xf32, #tpu.memory_space<vmem>>, %arg11: memref<1x8x32xf32, #tpu.memory_space<vmem>>) attributes {dimension_semantics = [#tpu.dimension_semantics<parallel>], iteration_bounds = array<i64: 2>, scalar_prefetch = 0 : i64, scratch_operands = 0 : i64, tpu.core_type = #tpu.core_type<tc>, window_params = [{transform_indices = @transform_0, window_bounds = array<i64: 1, 8, 32>}, {transform_indices = @transform_1, window_bounds = array<i64: 1, 8, 32>}, {pipeline_mode = #tpu.pipeline_mode<synchronous>, transform_indices = @transform_2, window_bounds = array<i64: 32, 32>}, {pipeline_mode = #tpu.pipeline_mode<synchronous>, transform_indices = @transform_3, window_bounds = array<i64: 1, 32>}, {pipeline_mode = #tpu.pipeline_mode<synchronous>, transform_indices = @transform_4, window_bounds = array<i64: 32, 64>}, {pipeline_mode = #tpu.pipeline_mode<synchronous>, transform_indices = @transform_5, window_bounds = array<i64: 1, 64>}, {pipeline_mode = #tpu.pipeline_mode<synchronous>, transform_indices = @transform_6, window_bounds = array<i64: 32, 32>}, {pipeline_mode = #tpu.pipeline_mode<synchronous>, transform_indices = @transform_7, window_bounds = array<i64: 1, 32>}, {pipeline_mode = #tpu.pipeline_mode<synchronous>, transform_indices = @transform_8, window_bounds = array<i64: 1, 32>}, {pipeline_mode = #tpu.pipeline_mode<synchronous>, transform_indices = @transform_9, window_bounds = array<i64: 1, 32>}, {transform_indices = @transform_10, window_bounds = array<i64: 1, 8, 32>}]} {
    %c0 = arith.constant 0 : index
    %c0_0 = arith.constant 0 : index
    %c0_1 = arith.constant 0 : index
    %0 = vector.load %arg1[%c0, %c0_0, %c0_1] : memref<1x8x32xf32, #tpu.memory_space<vmem>>, vector<1x8x32xf32>
    %1 = vector.shape_cast %0 : vector<1x8x32xf32> to vector<8x32xf32>
    %c0_2 = arith.constant 0 : index
    %c0_3 = arith.constant 0 : index
    %c0_4 = arith.constant 0 : index
    %2 = vector.load %arg2[%c0_2, %c0_3, %c0_4] : memref<1x8x32xf32, #tpu.memory_space<vmem>>, vector<1x8x32xf32>
    %3 = vector.shape_cast %2 : vector<1x8x32xf32> to vector<8x32xf32>
    %c0_5 = arith.constant 0 : index
    %c0_6 = arith.constant 0 : index
    %4 = vector.load %arg3[%c0_5, %c0_6] : memref<32x32xf32, #tpu.memory_space<vmem>>, vector<32x32xf32>
    %c0_7 = arith.constant 0 : index
    %c0_8 = arith.constant 0 : index
    %5 = vector.load %arg5[%c0_7, %c0_8] : memref<32x64xf32, #tpu.memory_space<vmem>>, vector<32x64xf32>
    %c0_9 = arith.constant 0 : index
    %c0_10 = arith.constant 0 : index
    %6 = vector.load %arg7[%c0_9, %c0_10] : memref<32x32xf32, #tpu.memory_space<vmem>>, vector<32x32xf32>
    %cst = arith.constant dense<0.000000e+00> : vector<8x32xf32>
    %7 = tpu.matmul %1, %4, %cst {dimension_numbers = #tpu.dot_dimension_numbers<[1], [0], [0], [1], [0, 0, 1, 1], [], []>} : vector<8x32xf32>, vector<32x32xf32>, vector<8x32xf32> -> vector<8x32xf32>
    %c0_11 = arith.constant 0 : index
    %c0_12 = arith.constant 0 : index
    %8 = vector.load %arg4[%c0_11, %c0_12] : memref<1x32xf32, #tpu.memory_space<vmem>>, vector<1x32xf32>
    %9 = vector.broadcast %8 : vector<1x32xf32> to vector<8x32xf32>
    %10 = arith.addf %7, %9 : vector<8x32xf32>
    %cst_13 = arith.constant 2.500000e-01 : f32
    %11 = vector.broadcast %cst_13 : f32 to vector<8x32xf32>
    %12 = arith.mulf %10, %11 : vector<8x32xf32>
    %cst_14 = arith.constant dense<0.000000e+00> : vector<8x64xf32>
    %13 = tpu.matmul %3, %5, %cst_14 {dimension_numbers = #tpu.dot_dimension_numbers<[1], [0], [0], [1], [0, 0, 1, 1], [], []>} : vector<8x32xf32>, vector<32x64xf32>, vector<8x64xf32> -> vector<8x64xf32>
    %c0_15 = arith.constant 0 : index
    %c0_16 = arith.constant 0 : index
    %14 = vector.load %arg6[%c0_15, %c0_16] : memref<1x64xf32, #tpu.memory_space<vmem>>, vector<1x64xf32>
    %15 = vector.broadcast %14 : vector<1x64xf32> to vector<8x64xf32>
    %16 = arith.addf %13, %15 : vector<8x64xf32>
    %17 = vector.extract_strided_slice %16 {offsets = [0, 0], sizes = [8, 32], strides = [1, 1]} : vector<8x64xf32> to vector<8x32xf32>
    %18 = vector.extract_strided_slice %16 {offsets = [0, 32], sizes = [8, 32], strides = [1, 1]} : vector<8x64xf32> to vector<8x32xf32>
    %c0_17 = arith.constant 0 : index
    %c0_18 = arith.constant 0 : index
    %19 = vector.load %arg8[%c0_17, %c0_18] : memref<1x32xf32, #tpu.memory_space<vmem>>, vector<1x32xf32>
    %20 = vector.broadcast %19 : vector<1x32xf32> to vector<8x32xf32>
    %21 = arith.addf %1, %20 : vector<8x32xf32>
    %22 = vector.extract_strided_slice %12 {offsets = [0, 0], sizes = [8, 16], strides = [1, 1]} : vector<8x32xf32> to vector<8x16xf32>
    %23 = vector.extract_strided_slice %17 {offsets = [0, 0], sizes = [8, 16], strides = [1, 1]} : vector<8x32xf32> to vector<8x16xf32>
    %24 = vector.extract_strided_slice %18 {offsets = [0, 0], sizes = [8, 16], strides = [1, 1]} : vector<8x32xf32> to vector<8x16xf32>
    %cst_19 = arith.constant dense<0.000000e+00> : vector<8x8xf32>
    %25 = tpu.matmul %22, %23, %cst_19 {dimension_numbers = #tpu.dot_dimension_numbers<[1], [1], [0], [0], [0, 0, 1, 0], [], []>} : vector<8x16xf32>, vector<8x16xf32>, vector<8x8xf32> -> vector<8x8xf32>
    %cst_20 = arith.constant dense<0xFF800000> : vector<8xf32>
    %26 = vector.multi_reduction <maximumf>, %25, %cst_20 [1] : vector<8x8xf32> to vector<8xf32>
    %27 = vector.shape_cast %26 : vector<8xf32> to vector<8x1xf32>
    %28 = vector.broadcast %27 : vector<8x1xf32> to vector<8x8xf32>
    %29 = arith.subf %25, %28 : vector<8x8xf32>
    %30 = math.exp %29 : vector<8x8xf32>
    %cst_21 = arith.constant dense<0.000000e+00> : vector<8xf32>
    %31 = vector.multi_reduction <add>, %30, %cst_21 [1] : vector<8x8xf32> to vector<8xf32>
    %32 = vector.shape_cast %31 : vector<8xf32> to vector<8x1xf32>
    %33 = tpu.reciprocal %32 {approx = true} : vector<8x1xf32> -> vector<8x1xf32>
    %34 = vector.broadcast %33 : vector<8x1xf32> to vector<8x8xf32>
    %35 = arith.mulf %30, %34 : vector<8x8xf32>
    %cst_22 = arith.constant dense<0.000000e+00> : vector<8x16xf32>
    %36 = tpu.matmul %35, %24, %cst_22 {dimension_numbers = #tpu.dot_dimension_numbers<[1], [0], [0], [1], [0, 0, 1, 1], [], []>} : vector<8x8xf32>, vector<8x16xf32>, vector<8x16xf32> -> vector<8x16xf32>
    %37 = vector.extract_strided_slice %6 {offsets = [0, 0], sizes = [16, 32], strides = [1, 1]} : vector<32x32xf32> to vector<16x32xf32>
    %cst_23 = arith.constant dense<0.000000e+00> : vector<8x32xf32>
    %38 = tpu.matmul %36, %37, %cst_23 {dimension_numbers = #tpu.dot_dimension_numbers<[1], [0], [0], [1], [0, 0, 1, 1], [], []>} : vector<8x16xf32>, vector<16x32xf32>, vector<8x32xf32> -> vector<8x32xf32>
    %39 = arith.addf %21, %38 : vector<8x32xf32>
    %40 = vector.extract_strided_slice %12 {offsets = [0, 16], sizes = [8, 16], strides = [1, 1]} : vector<8x32xf32> to vector<8x16xf32>
    %41 = vector.extract_strided_slice %17 {offsets = [0, 16], sizes = [8, 16], strides = [1, 1]} : vector<8x32xf32> to vector<8x16xf32>
    %42 = vector.extract_strided_slice %18 {offsets = [0, 16], sizes = [8, 16], strides = [1, 1]} : vector<8x32xf32> to vector<8x16xf32>
    %cst_24 = arith.constant dense<0.000000e+00> : vector<8x8xf32>
    %43 = tpu.matmul %40, %41, %cst_24 {dimension_numbers = #tpu.dot_dimension_numbers<[1], [1], [0], [0], [0, 0, 1, 0], [], []>} : vector<8x16xf32>, vector<8x16xf32>, vector<8x8xf32> -> vector<8x8xf32>
    %cst_25 = arith.constant dense<0xFF800000> : vector<8xf32>
    %44 = vector.multi_reduction <maximumf>, %43, %cst_25 [1] : vector<8x8xf32> to vector<8xf32>
    %45 = vector.shape_cast %44 : vector<8xf32> to vector<8x1xf32>
    %46 = vector.broadcast %45 : vector<8x1xf32> to vector<8x8xf32>
    %47 = arith.subf %43, %46 : vector<8x8xf32>
    %48 = math.exp %47 : vector<8x8xf32>
    %cst_26 = arith.constant dense<0.000000e+00> : vector<8xf32>
    %49 = vector.multi_reduction <add>, %48, %cst_26 [1] : vector<8x8xf32> to vector<8xf32>
    %50 = vector.shape_cast %49 : vector<8xf32> to vector<8x1xf32>
    %51 = tpu.reciprocal %50 {approx = true} : vector<8x1xf32> -> vector<8x1xf32>
    %52 = vector.broadcast %51 : vector<8x1xf32> to vector<8x8xf32>
    %53 = arith.mulf %48, %52 : vector<8x8xf32>
    %cst_27 = arith.constant dense<0.000000e+00> : vector<8x16xf32>
    %54 = tpu.matmul %53, %42, %cst_27 {dimension_numbers = #tpu.dot_dimension_numbers<[1], [0], [0], [1], [0, 0, 1, 1], [], []>} : vector<8x8xf32>, vector<8x16xf32>, vector<8x16xf32> -> vector<8x16xf32>
    %55 = vector.extract_strided_slice %6 {offsets = [16, 0], sizes = [16, 32], strides = [1, 1]} : vector<32x32xf32> to vector<16x32xf32>
    %cst_28 = arith.constant dense<0.000000e+00> : vector<8x32xf32>
    %56 = tpu.matmul %54, %55, %cst_28 {dimension_numbers = #tpu.dot_dimension_numbers<[1], [0], [0], [1], [0, 0, 1, 1], [], []>} : vector<8x16xf32>, vector<16x32xf32>, vector<8x32xf32> -> vector<8x32xf32>
    %57 = arith.addf %39, %56 : vector<8x32xf32>
    %c0_29 = arith.constant 0 : index
    %c0_30 = arith.constant 0 : index
    %58 = vector.load %arg9[%c0_29, %c0_30] : memref<1x32xf32, #tpu.memory_space<vmem>>, vector<1x32xf32>
    %c0_31 = arith.constant 0 : index
    %c0_32 = arith.constant 0 : index
    %59 = vector.load %arg10[%c0_31, %c0_32] : memref<1x32xf32, #tpu.memory_space<vmem>>, vector<1x32xf32>
    %cst_33 = arith.constant dense<0.000000e+00> : vector<8xf32>
    %60 = vector.multi_reduction <add>, %57, %cst_33 [1] : vector<8x32xf32> to vector<8xf32>
    %61 = vector.shape_cast %60 : vector<8xf32> to vector<8x1xf32>
    %cst_34 = arith.constant 3.200000e+01 : f32
    %62 = vector.broadcast %cst_34 : f32 to vector<8x1xf32>
    %63 = arith.divf %61, %62 : vector<8x1xf32>
    %64 = vector.broadcast %63 : vector<8x1xf32> to vector<8x32xf32>
    %65 = arith.subf %57, %64 : vector<8x32xf32>
    %66 = arith.mulf %65, %65 : vector<8x32xf32>
    %cst_35 = arith.constant dense<0.000000e+00> : vector<8xf32>
    %67 = vector.multi_reduction <add>, %66, %cst_35 [1] : vector<8x32xf32> to vector<8xf32>
    %68 = vector.shape_cast %67 : vector<8xf32> to vector<8x1xf32>
    %cst_36 = arith.constant 3.200000e+01 : f32
    %69 = vector.broadcast %cst_36 : f32 to vector<8x1xf32>
    %70 = arith.divf %68, %69 : vector<8x1xf32>
    %71 = vector.broadcast %63 : vector<8x1xf32> to vector<8x32xf32>
    %72 = arith.subf %57, %71 : vector<8x32xf32>
    %cst_37 = arith.constant 9.99999974E-6 : f32
    %73 = vector.broadcast %cst_37 : f32 to vector<8x1xf32>
    %74 = arith.addf %70, %73 : vector<8x1xf32>
    %75 = math.rsqrt %74 : vector<8x1xf32>
    %76 = vector.broadcast %75 : vector<8x1xf32> to vector<8x32xf32>
    %77 = arith.mulf %72, %76 : vector<8x32xf32>
    %78 = vector.broadcast %58 : vector<1x32xf32> to vector<8x32xf32>
    %79 = arith.mulf %77, %78 : vector<8x32xf32>
    %80 = vector.broadcast %59 : vector<1x32xf32> to vector<8x32xf32>
    %81 = arith.addf %79, %80 : vector<8x32xf32>
    %c0_38 = arith.constant 0 : index
    %c0_39 = arith.constant 0 : index
    %c0_40 = arith.constant 0 : index
    %82 = vector.load %arg11[%c0_38, %c0_39, %c0_40] : memref<1x8x32xf32, #tpu.memory_space<vmem>>, vector<1x8x32xf32>
    %83 = vector.shape_cast %82 : vector<1x8x32xf32> to vector<8x32xf32>
    %84 = vector.shape_cast %81 : vector<8x32xf32> to vector<1x8x32xf32>
    tpu.vector_store %arg11[%c0_38, %c0_39, %c0_40], %84 {strides = array<i32>} : memref<1x8x32xf32, #tpu.memory_space<vmem>>, vector<1x8x32xf32>,
    return
  }
  func.func @transform_0(%arg0: i32) -> (i32, i32, i32) {
    %c0_i32 = arith.constant 0 : i32
    %c0_i32_0 = arith.constant 0 : i32
    %c0_i32_1 = arith.constant 0 : i32
    return %arg0, %c0_i32, %c0_i32_0 : i32, i32, i32
  }
  func.func @transform_1(%arg0: i32) -> (i32, i32, i32) {
    %c0_i32 = arith.constant 0 : i32
    %c0_i32_0 = arith.constant 0 : i32
    %c0_i32_1 = arith.constant 0 : i32
    return %arg0, %c0_i32, %c0_i32_0 : i32, i32, i32
  }
  func.func @transform_2(%arg0: i32) -> (i32, i32) {
    %c0_i32 = arith.constant 0 : i32
    %c0_i32_0 = arith.constant 0 : i32
    %c0_i32_1 = arith.constant 0 : i32
    return %c0_i32, %c0_i32_0 : i32, i32
  }
  func.func @transform_3(%arg0: i32) -> (i32, i32) {
    %c0_i32 = arith.constant 0 : i32
    %c0_i32_0 = arith.constant 0 : i32
    %c0_i32_1 = arith.constant 0 : i32
    return %c0_i32, %c0_i32_0 : i32, i32
  }
  func.func @transform_4(%arg0: i32) -> (i32, i32) {
    %c0_i32 = arith.constant 0 : i32
    %c0_i32_0 = arith.constant 0 : i32
    %c0_i32_1 = arith.constant 0 : i32
    return %c0_i32, %c0_i32_0 : i32, i32
  }
  func.func @transform_5(%arg0: i32) -> (i32, i32) {
    %c0_i32 = arith.constant 0 : i32
    %c0_i32_0 = arith.constant 0 : i32
    %c0_i32_1 = arith.constant 0 : i32
    return %c0_i32, %c0_i32_0 : i32, i32
  }
  func.func @transform_6(%arg0: i32) -> (i32, i32) {
    %c0_i32 = arith.constant 0 : i32
    %c0_i32_0 = arith.constant 0 : i32
    %c0_i32_1 = arith.constant 0 : i32
    return %c0_i32, %c0_i32_0 : i32, i32
  }
  func.func @transform_7(%arg0: i32) -> (i32, i32) {
    %c0_i32 = arith.constant 0 : i32
    %c0_i32_0 = arith.constant 0 : i32
    %c0_i32_1 = arith.constant 0 : i32
    return %c0_i32, %c0_i32_0 : i32, i32
  }
  func.func @transform_8(%arg0: i32) -> (i32, i32) {
    %c0_i32 = arith.constant 0 : i32
    %c0_i32_0 = arith.constant 0 : i32
    %c0_i32_1 = arith.constant 0 : i32
    return %c0_i32, %c0_i32_0 : i32, i32
  }
  func.func @transform_9(%arg0: i32) -> (i32, i32) {
    %c0_i32 = arith.constant 0 : i32
    %c0_i32_0 = arith.constant 0 : i32
    %c0_i32_1 = arith.constant 0 : i32
    return %c0_i32, %c0_i32_0 : i32, i32
  }
  func.func @transform_10(%arg0: i32) -> (i32, i32, i32) {
    %c0_i32 = arith.constant 0 : i32
    %c0_i32_0 = arith.constant 0 : i32
    %c0_i32_1 = arith.constant 0 : i32
    return %arg0, %c0_i32, %c0_i32_0 : i32, i32, i32
  }
}

module attributes {stable_mosaic.version = 11 : i64} {
  func.func @_fused_attention_kernel(%arg0: i32, %arg1: memref<1x32x8xf32, #tpu.memory_space<vmem>>, %arg2: memref<1x32x8xf32, #tpu.memory_space<vmem>>, %arg3: memref<8x32xf32, #tpu.memory_space<vmem>>, %arg4: memref<1x32xf32, #tpu.memory_space<vmem>>, %arg5: memref<8x64xf32, #tpu.memory_space<vmem>>, %arg6: memref<1x64xf32, #tpu.memory_space<vmem>>, %arg7: memref<32x8xf32, #tpu.memory_space<vmem>>, %arg8: memref<1x8xf32, #tpu.memory_space<vmem>>, %arg9: memref<1x8xf32, #tpu.memory_space<vmem>>, %arg10: memref<1x8xf32, #tpu.memory_space<vmem>>, %arg11: memref<1x32x8xf32, #tpu.memory_space<vmem>>) attributes {dimension_semantics = [#tpu.dimension_semantics<parallel>], iteration_bounds = array<i64: 2>, scalar_prefetch = 0 : i64, scratch_operands = 0 : i64, tpu.core_type = #tpu.core_type<tc>, window_params = [{transform_indices = @transform_0, window_bounds = array<i64: 1, 32, 8>}, {transform_indices = @transform_1, window_bounds = array<i64: 1, 32, 8>}, {pipeline_mode = #tpu.pipeline_mode<synchronous>, transform_indices = @transform_2, window_bounds = array<i64: 8, 32>}, {pipeline_mode = #tpu.pipeline_mode<synchronous>, transform_indices = @transform_3, window_bounds = array<i64: 1, 32>}, {pipeline_mode = #tpu.pipeline_mode<synchronous>, transform_indices = @transform_4, window_bounds = array<i64: 8, 64>}, {pipeline_mode = #tpu.pipeline_mode<synchronous>, transform_indices = @transform_5, window_bounds = array<i64: 1, 64>}, {pipeline_mode = #tpu.pipeline_mode<synchronous>, transform_indices = @transform_6, window_bounds = array<i64: 32, 8>}, {pipeline_mode = #tpu.pipeline_mode<synchronous>, transform_indices = @transform_7, window_bounds = array<i64: 1, 8>}, {pipeline_mode = #tpu.pipeline_mode<synchronous>, transform_indices = @transform_8, window_bounds = array<i64: 1, 8>}, {pipeline_mode = #tpu.pipeline_mode<synchronous>, transform_indices = @transform_9, window_bounds = array<i64: 1, 8>}, {transform_indices = @transform_10, window_bounds = array<i64: 1, 32, 8>}]} {
    %c0 = arith.constant 0 : index
    %c0_0 = arith.constant 0 : index
    %c0_1 = arith.constant 0 : index
    %0 = vector.load %arg1[%c0, %c0_0, %c0_1] : memref<1x32x8xf32, #tpu.memory_space<vmem>>, vector<1x32x8xf32>
    %1 = vector.shape_cast %0 : vector<1x32x8xf32> to vector<32x8xf32>
    %c0_2 = arith.constant 0 : index
    %c0_3 = arith.constant 0 : index
    %c0_4 = arith.constant 0 : index
    %2 = vector.load %arg2[%c0_2, %c0_3, %c0_4] : memref<1x32x8xf32, #tpu.memory_space<vmem>>, vector<1x32x8xf32>
    %3 = vector.shape_cast %2 : vector<1x32x8xf32> to vector<32x8xf32>
    %c0_5 = arith.constant 0 : index
    %c0_6 = arith.constant 0 : index
    %4 = vector.load %arg3[%c0_5, %c0_6] : memref<8x32xf32, #tpu.memory_space<vmem>>, vector<8x32xf32>
    %c0_7 = arith.constant 0 : index
    %c0_8 = arith.constant 0 : index
    %5 = vector.load %arg5[%c0_7, %c0_8] : memref<8x64xf32, #tpu.memory_space<vmem>>, vector<8x64xf32>
    %c0_9 = arith.constant 0 : index
    %c0_10 = arith.constant 0 : index
    %6 = vector.load %arg7[%c0_9, %c0_10] : memref<32x8xf32, #tpu.memory_space<vmem>>, vector<32x8xf32>
    %cst = arith.constant dense<0.000000e+00> : vector<32x32xf32>
    %7 = tpu.matmul %1, %4, %cst {dimension_numbers = #tpu.dot_dimension_numbers<[1], [0], [0], [1], [0, 0, 1, 1], [], []>} : vector<32x8xf32>, vector<8x32xf32>, vector<32x32xf32> -> vector<32x32xf32>
    %c0_11 = arith.constant 0 : index
    %c0_12 = arith.constant 0 : index
    %8 = vector.load %arg4[%c0_11, %c0_12] : memref<1x32xf32, #tpu.memory_space<vmem>>, vector<1x32xf32>
    %9 = vector.broadcast %8 : vector<1x32xf32> to vector<32x32xf32>
    %10 = arith.addf %7, %9 : vector<32x32xf32>
    %cst_13 = arith.constant 2.500000e-01 : f32
    %11 = vector.broadcast %cst_13 : f32 to vector<32x32xf32>
    %12 = arith.mulf %10, %11 : vector<32x32xf32>
    %cst_14 = arith.constant dense<0.000000e+00> : vector<32x64xf32>
    %13 = tpu.matmul %3, %5, %cst_14 {dimension_numbers = #tpu.dot_dimension_numbers<[1], [0], [0], [1], [0, 0, 1, 1], [], []>} : vector<32x8xf32>, vector<8x64xf32>, vector<32x64xf32> -> vector<32x64xf32>
    %c0_15 = arith.constant 0 : index
    %c0_16 = arith.constant 0 : index
    %14 = vector.load %arg6[%c0_15, %c0_16] : memref<1x64xf32, #tpu.memory_space<vmem>>, vector<1x64xf32>
    %15 = vector.broadcast %14 : vector<1x64xf32> to vector<32x64xf32>
    %16 = arith.addf %13, %15 : vector<32x64xf32>
    %17 = vector.extract_strided_slice %16 {offsets = [0, 0], sizes = [32, 32], strides = [1, 1]} : vector<32x64xf32> to vector<32x32xf32>
    %18 = vector.extract_strided_slice %16 {offsets = [0, 32], sizes = [32, 32], strides = [1, 1]} : vector<32x64xf32> to vector<32x32xf32>
    %c0_17 = arith.constant 0 : index
    %c0_18 = arith.constant 0 : index
    %19 = vector.load %arg8[%c0_17, %c0_18] : memref<1x8xf32, #tpu.memory_space<vmem>>, vector<1x8xf32>
    %20 = vector.broadcast %19 : vector<1x8xf32> to vector<32x8xf32>
    %21 = arith.addf %1, %20 : vector<32x8xf32>
    %22 = vector.extract_strided_slice %12 {offsets = [0, 0], sizes = [32, 16], strides = [1, 1]} : vector<32x32xf32> to vector<32x16xf32>
    %23 = vector.extract_strided_slice %17 {offsets = [0, 0], sizes = [32, 16], strides = [1, 1]} : vector<32x32xf32> to vector<32x16xf32>
    %24 = vector.extract_strided_slice %18 {offsets = [0, 0], sizes = [32, 16], strides = [1, 1]} : vector<32x32xf32> to vector<32x16xf32>
    %cst_19 = arith.constant dense<0.000000e+00> : vector<32x32xf32>
    %25 = tpu.matmul %22, %23, %cst_19 {dimension_numbers = #tpu.dot_dimension_numbers<[1], [1], [0], [0], [0, 0, 1, 0], [], []>} : vector<32x16xf32>, vector<32x16xf32>, vector<32x32xf32> -> vector<32x32xf32>
    %cst_20 = arith.constant dense<0xFF800000> : vector<32xf32>
    %26 = vector.multi_reduction <maximumf>, %25, %cst_20 [1] : vector<32x32xf32> to vector<32xf32>
    %27 = vector.shape_cast %26 : vector<32xf32> to vector<32x1xf32>
    %28 = vector.broadcast %27 : vector<32x1xf32> to vector<32x32xf32>
    %29 = arith.subf %25, %28 : vector<32x32xf32>
    %30 = math.exp %29 : vector<32x32xf32>
    %cst_21 = arith.constant dense<0.000000e+00> : vector<32xf32>
    %31 = vector.multi_reduction <add>, %30, %cst_21 [1] : vector<32x32xf32> to vector<32xf32>
    %32 = vector.shape_cast %31 : vector<32xf32> to vector<32x1xf32>
    %33 = tpu.reciprocal %32 {approx = true} : vector<32x1xf32> -> vector<32x1xf32>
    %34 = vector.broadcast %33 : vector<32x1xf32> to vector<32x32xf32>
    %35 = arith.mulf %30, %34 : vector<32x32xf32>
    %cst_22 = arith.constant dense<0.000000e+00> : vector<32x16xf32>
    %36 = tpu.matmul %35, %24, %cst_22 {dimension_numbers = #tpu.dot_dimension_numbers<[1], [0], [0], [1], [0, 0, 1, 1], [], []>} : vector<32x32xf32>, vector<32x16xf32>, vector<32x16xf32> -> vector<32x16xf32>
    %37 = vector.extract_strided_slice %6 {offsets = [0, 0], sizes = [16, 8], strides = [1, 1]} : vector<32x8xf32> to vector<16x8xf32>
    %cst_23 = arith.constant dense<0.000000e+00> : vector<32x8xf32>
    %38 = tpu.matmul %36, %37, %cst_23 {dimension_numbers = #tpu.dot_dimension_numbers<[1], [0], [0], [1], [0, 0, 1, 1], [], []>} : vector<32x16xf32>, vector<16x8xf32>, vector<32x8xf32> -> vector<32x8xf32>
    %39 = arith.addf %21, %38 : vector<32x8xf32>
    %40 = vector.extract_strided_slice %12 {offsets = [0, 16], sizes = [32, 16], strides = [1, 1]} : vector<32x32xf32> to vector<32x16xf32>
    %41 = vector.extract_strided_slice %17 {offsets = [0, 16], sizes = [32, 16], strides = [1, 1]} : vector<32x32xf32> to vector<32x16xf32>
    %42 = vector.extract_strided_slice %18 {offsets = [0, 16], sizes = [32, 16], strides = [1, 1]} : vector<32x32xf32> to vector<32x16xf32>
    %cst_24 = arith.constant dense<0.000000e+00> : vector<32x32xf32>
    %43 = tpu.matmul %40, %41, %cst_24 {dimension_numbers = #tpu.dot_dimension_numbers<[1], [1], [0], [0], [0, 0, 1, 0], [], []>} : vector<32x16xf32>, vector<32x16xf32>, vector<32x32xf32> -> vector<32x32xf32>
    %cst_25 = arith.constant dense<0xFF800000> : vector<32xf32>
    %44 = vector.multi_reduction <maximumf>, %43, %cst_25 [1] : vector<32x32xf32> to vector<32xf32>
    %45 = vector.shape_cast %44 : vector<32xf32> to vector<32x1xf32>
    %46 = vector.broadcast %45 : vector<32x1xf32> to vector<32x32xf32>
    %47 = arith.subf %43, %46 : vector<32x32xf32>
    %48 = math.exp %47 : vector<32x32xf32>
    %cst_26 = arith.constant dense<0.000000e+00> : vector<32xf32>
    %49 = vector.multi_reduction <add>, %48, %cst_26 [1] : vector<32x32xf32> to vector<32xf32>
    %50 = vector.shape_cast %49 : vector<32xf32> to vector<32x1xf32>
    %51 = tpu.reciprocal %50 {approx = true} : vector<32x1xf32> -> vector<32x1xf32>
    %52 = vector.broadcast %51 : vector<32x1xf32> to vector<32x32xf32>
    %53 = arith.mulf %48, %52 : vector<32x32xf32>
    %cst_27 = arith.constant dense<0.000000e+00> : vector<32x16xf32>
    %54 = tpu.matmul %53, %42, %cst_27 {dimension_numbers = #tpu.dot_dimension_numbers<[1], [0], [0], [1], [0, 0, 1, 1], [], []>} : vector<32x32xf32>, vector<32x16xf32>, vector<32x16xf32> -> vector<32x16xf32>
    %55 = vector.extract_strided_slice %6 {offsets = [16, 0], sizes = [16, 8], strides = [1, 1]} : vector<32x8xf32> to vector<16x8xf32>
    %cst_28 = arith.constant dense<0.000000e+00> : vector<32x8xf32>
    %56 = tpu.matmul %54, %55, %cst_28 {dimension_numbers = #tpu.dot_dimension_numbers<[1], [0], [0], [1], [0, 0, 1, 1], [], []>} : vector<32x16xf32>, vector<16x8xf32>, vector<32x8xf32> -> vector<32x8xf32>
    %57 = arith.addf %39, %56 : vector<32x8xf32>
    %c0_29 = arith.constant 0 : index
    %c0_30 = arith.constant 0 : index
    %58 = vector.load %arg9[%c0_29, %c0_30] : memref<1x8xf32, #tpu.memory_space<vmem>>, vector<1x8xf32>
    %c0_31 = arith.constant 0 : index
    %c0_32 = arith.constant 0 : index
    %59 = vector.load %arg10[%c0_31, %c0_32] : memref<1x8xf32, #tpu.memory_space<vmem>>, vector<1x8xf32>
    %cst_33 = arith.constant dense<0.000000e+00> : vector<32xf32>
    %60 = vector.multi_reduction <add>, %57, %cst_33 [1] : vector<32x8xf32> to vector<32xf32>
    %61 = vector.shape_cast %60 : vector<32xf32> to vector<32x1xf32>
    %cst_34 = arith.constant 8.000000e+00 : f32
    %62 = vector.broadcast %cst_34 : f32 to vector<32x1xf32>
    %63 = arith.divf %61, %62 : vector<32x1xf32>
    %64 = vector.broadcast %63 : vector<32x1xf32> to vector<32x8xf32>
    %65 = arith.subf %57, %64 : vector<32x8xf32>
    %66 = arith.mulf %65, %65 : vector<32x8xf32>
    %cst_35 = arith.constant dense<0.000000e+00> : vector<32xf32>
    %67 = vector.multi_reduction <add>, %66, %cst_35 [1] : vector<32x8xf32> to vector<32xf32>
    %68 = vector.shape_cast %67 : vector<32xf32> to vector<32x1xf32>
    %cst_36 = arith.constant 8.000000e+00 : f32
    %69 = vector.broadcast %cst_36 : f32 to vector<32x1xf32>
    %70 = arith.divf %68, %69 : vector<32x1xf32>
    %71 = vector.broadcast %63 : vector<32x1xf32> to vector<32x8xf32>
    %72 = arith.subf %57, %71 : vector<32x8xf32>
    %cst_37 = arith.constant 9.99999974E-6 : f32
    %73 = vector.broadcast %cst_37 : f32 to vector<32x1xf32>
    %74 = arith.addf %70, %73 : vector<32x1xf32>
    %75 = math.rsqrt %74 : vector<32x1xf32>
    %76 = vector.broadcast %75 : vector<32x1xf32> to vector<32x8xf32>
    %77 = arith.mulf %72, %76 : vector<32x8xf32>
    %78 = vector.broadcast %58 : vector<1x8xf32> to vector<32x8xf32>
    %79 = arith.mulf %77, %78 : vector<32x8xf32>
    %80 = vector.broadcast %59 : vector<1x8xf32> to vector<32x8xf32>
    %81 = arith.addf %79, %80 : vector<32x8xf32>
    %c0_38 = arith.constant 0 : index
    %c0_39 = arith.constant 0 : index
    %c0_40 = arith.constant 0 : index
    %82 = vector.load %arg11[%c0_38, %c0_39, %c0_40] : memref<1x32x8xf32, #tpu.memory_space<vmem>>, vector<1x32x8xf32>
    %83 = vector.shape_cast %82 : vector<1x32x8xf32> to vector<32x8xf32>
    %84 = vector.shape_cast %81 : vector<32x8xf32> to vector<1x32x8xf32>
    tpu.vector_store %arg11[%c0_38, %c0_39, %c0_40], %84 {strides = array<i32>} : memref<1x32x8xf32, #tpu.memory_space<vmem>>, vector<1x32x8xf32>,
    return
  }
  func.func @transform_0(%arg0: i32) -> (i32, i32, i32) {
    %c0_i32 = arith.constant 0 : i32
    %c0_i32_0 = arith.constant 0 : i32
    %c0_i32_1 = arith.constant 0 : i32
    return %arg0, %c0_i32, %c0_i32_0 : i32, i32, i32
  }
  func.func @transform_1(%arg0: i32) -> (i32, i32, i32) {
    %c0_i32 = arith.constant 0 : i32
    %c0_i32_0 = arith.constant 0 : i32
    %c0_i32_1 = arith.constant 0 : i32
    return %arg0, %c0_i32, %c0_i32_0 : i32, i32, i32
  }
  func.func @transform_2(%arg0: i32) -> (i32, i32) {
    %c0_i32 = arith.constant 0 : i32
    %c0_i32_0 = arith.constant 0 : i32
    %c0_i32_1 = arith.constant 0 : i32
    return %c0_i32, %c0_i32_0 : i32, i32
  }
  func.func @transform_3(%arg0: i32) -> (i32, i32) {
    %c0_i32 = arith.constant 0 : i32
    %c0_i32_0 = arith.constant 0 : i32
    %c0_i32_1 = arith.constant 0 : i32
    return %c0_i32, %c0_i32_0 : i32, i32
  }
  func.func @transform_4(%arg0: i32) -> (i32, i32) {
    %c0_i32 = arith.constant 0 : i32
    %c0_i32_0 = arith.constant 0 : i32
    %c0_i32_1 = arith.constant 0 : i32
    return %c0_i32, %c0_i32_0 : i32, i32
  }
  func.func @transform_5(%arg0: i32) -> (i32, i32) {
    %c0_i32 = arith.constant 0 : i32
    %c0_i32_0 = arith.constant 0 : i32
    %c0_i32_1 = arith.constant 0 : i32
    return %c0_i32, %c0_i32_0 : i32, i32
  }
  func.func @transform_6(%arg0: i32) -> (i32, i32) {
    %c0_i32 = arith.constant 0 : i32
    %c0_i32_0 = arith.constant 0 : i32
    %c0_i32_1 = arith.constant 0 : i32
    return %c0_i32, %c0_i32_0 : i32, i32
  }
  func.func @transform_7(%arg0: i32) -> (i32, i32) {
    %c0_i32 = arith.constant 0 : i32
    %c0_i32_0 = arith.constant 0 : i32
    %c0_i32_1 = arith.constant 0 : i32
    return %c0_i32, %c0_i32_0 : i32, i32
  }
  func.func @transform_8(%arg0: i32) -> (i32, i32) {
    %c0_i32 = arith.constant 0 : i32
    %c0_i32_0 = arith.constant 0 : i32
    %c0_i32_1 = arith.constant 0 : i32
    return %c0_i32, %c0_i32_0 : i32, i32
  }
  func.func @transform_9(%arg0: i32) -> (i32, i32) {
    %c0_i32 = arith.constant 0 : i32
    %c0_i32_0 = arith.constant 0 : i32
    %c0_i32_1 = arith.constant 0 : i32
    return %c0_i32, %c0_i32_0 : i32, i32
  }
  func.func @transform_10(%arg0: i32) -> (i32, i32, i32) {
    %c0_i32 = arith.constant 0 : i32
    %c0_i32_0 = arith.constant 0 : i32
    %c0_i32_1 = arith.constant 0 : i32
    return %arg0, %c0_i32, %c0_i32_0 : i32, i32, i32
  }
}

module attributes {stable_mosaic.version = 11 : i64} {
  func.func @_fused_ffn_kernel(%arg0: i32, %arg1: memref<1x8x32xf32, #tpu.memory_space<vmem>>, %arg2: memref<32x64xf32, #tpu.memory_space<vmem>>, %arg3: memref<1x64xf32, #tpu.memory_space<vmem>>, %arg4: memref<64x32xf32, #tpu.memory_space<vmem>>, %arg5: memref<1x32xf32, #tpu.memory_space<vmem>>, %arg6: memref<1x32xf32, #tpu.memory_space<vmem>>, %arg7: memref<1x32xf32, #tpu.memory_space<vmem>>, %arg8: memref<1x8x32xf32, #tpu.memory_space<vmem>>) attributes {dimension_semantics = [#tpu.dimension_semantics<parallel>], iteration_bounds = array<i64: 2>, scalar_prefetch = 0 : i64, scratch_operands = 0 : i64, tpu.core_type = #tpu.core_type<tc>, window_params = [{transform_indices = @transform_0, window_bounds = array<i64: 1, 8, 32>}, {pipeline_mode = #tpu.pipeline_mode<synchronous>, transform_indices = @transform_1, window_bounds = array<i64: 32, 64>}, {pipeline_mode = #tpu.pipeline_mode<synchronous>, transform_indices = @transform_2, window_bounds = array<i64: 1, 64>}, {pipeline_mode = #tpu.pipeline_mode<synchronous>, transform_indices = @transform_3, window_bounds = array<i64: 64, 32>}, {pipeline_mode = #tpu.pipeline_mode<synchronous>, transform_indices = @transform_4, window_bounds = array<i64: 1, 32>}, {pipeline_mode = #tpu.pipeline_mode<synchronous>, transform_indices = @transform_5, window_bounds = array<i64: 1, 32>}, {pipeline_mode = #tpu.pipeline_mode<synchronous>, transform_indices = @transform_6, window_bounds = array<i64: 1, 32>}, {transform_indices = @transform_7, window_bounds = array<i64: 1, 8, 32>}]} {
    %c0 = arith.constant 0 : index
    %c0_0 = arith.constant 0 : index
    %c0_1 = arith.constant 0 : index
    %0 = vector.load %arg1[%c0, %c0_0, %c0_1] : memref<1x8x32xf32, #tpu.memory_space<vmem>>, vector<1x8x32xf32>
    %1 = vector.shape_cast %0 : vector<1x8x32xf32> to vector<8x32xf32>
    %c0_2 = arith.constant 0 : index
    %c0_3 = arith.constant 0 : index
    %2 = vector.load %arg2[%c0_2, %c0_3] : memref<32x64xf32, #tpu.memory_space<vmem>>, vector<32x64xf32>
    %cst = arith.constant dense<0.000000e+00> : vector<8x64xf32>
    %3 = tpu.matmul %1, %2, %cst {dimension_numbers = #tpu.dot_dimension_numbers<[1], [0], [0], [1], [0, 0, 1, 1], [], []>} : vector<8x32xf32>, vector<32x64xf32>, vector<8x64xf32> -> vector<8x64xf32>
    %c0_4 = arith.constant 0 : index
    %c0_5 = arith.constant 0 : index
    %4 = vector.load %arg3[%c0_4, %c0_5] : memref<1x64xf32, #tpu.memory_space<vmem>>, vector<1x64xf32>
    %5 = vector.broadcast %4 : vector<1x64xf32> to vector<8x64xf32>
    %6 = arith.addf %3, %5 : vector<8x64xf32>
    %7 = arith.mulf %6, %6 : vector<8x64xf32>
    %8 = arith.mulf %6, %7 : vector<8x64xf32>
    %cst_6 = arith.constant 4.471500e-02 : f32
    %9 = vector.broadcast %cst_6 : f32 to vector<8x64xf32>
    %10 = arith.mulf %9, %8 : vector<8x64xf32>
    %11 = arith.addf %6, %10 : vector<8x64xf32>
    %cst_7 = arith.constant 0.797884583 : f32
    %12 = vector.broadcast %cst_7 : f32 to vector<8x64xf32>
    %13 = arith.mulf %12, %11 : vector<8x64xf32>
    %14 = math.tanh %13 : vector<8x64xf32>
    %cst_8 = arith.constant 1.000000e+00 : f32
    %15 = vector.broadcast %cst_8 : f32 to vector<8x64xf32>
    %16 = arith.addf %15, %14 : vector<8x64xf32>
    %cst_9 = arith.constant 5.000000e-01 : f32
    %17 = vector.broadcast %cst_9 : f32 to vector<8x64xf32>
    %18 = arith.mulf %17, %16 : vector<8x64xf32>
    %19 = arith.mulf %6, %18 : vector<8x64xf32>
    %c0_10 = arith.constant 0 : index
    %c0_11 = arith.constant 0 : index
    %20 = vector.load %arg4[%c0_10, %c0_11] : memref<64x32xf32, #tpu.memory_space<vmem>>, vector<64x32xf32>
    %cst_12 = arith.constant dense<0.000000e+00> : vector<8x32xf32>
    %21 = tpu.matmul %19, %20, %cst_12 {dimension_numbers = #tpu.dot_dimension_numbers<[1], [0], [0], [1], [0, 0, 1, 1], [], []>} : vector<8x64xf32>, vector<64x32xf32>, vector<8x32xf32> -> vector<8x32xf32>
    %c0_13 = arith.constant 0 : index
    %c0_14 = arith.constant 0 : index
    %22 = vector.load %arg5[%c0_13, %c0_14] : memref<1x32xf32, #tpu.memory_space<vmem>>, vector<1x32xf32>
    %23 = vector.broadcast %22 : vector<1x32xf32> to vector<8x32xf32>
    %24 = arith.addf %21, %23 : vector<8x32xf32>
    %25 = arith.addf %24, %1 : vector<8x32xf32>
    %c0_15 = arith.constant 0 : index
    %c0_16 = arith.constant 0 : index
    %26 = vector.load %arg6[%c0_15, %c0_16] : memref<1x32xf32, #tpu.memory_space<vmem>>, vector<1x32xf32>
    %c0_17 = arith.constant 0 : index
    %c0_18 = arith.constant 0 : index
    %27 = vector.load %arg7[%c0_17, %c0_18] : memref<1x32xf32, #tpu.memory_space<vmem>>, vector<1x32xf32>
    %cst_19 = arith.constant dense<0.000000e+00> : vector<8xf32>
    %28 = vector.multi_reduction <add>, %25, %cst_19 [1] : vector<8x32xf32> to vector<8xf32>
    %29 = vector.shape_cast %28 : vector<8xf32> to vector<8x1xf32>
    %cst_20 = arith.constant 3.200000e+01 : f32
    %30 = vector.broadcast %cst_20 : f32 to vector<8x1xf32>
    %31 = arith.divf %29, %30 : vector<8x1xf32>
    %32 = vector.broadcast %31 : vector<8x1xf32> to vector<8x32xf32>
    %33 = arith.subf %25, %32 : vector<8x32xf32>
    %34 = arith.mulf %33, %33 : vector<8x32xf32>
    %cst_21 = arith.constant dense<0.000000e+00> : vector<8xf32>
    %35 = vector.multi_reduction <add>, %34, %cst_21 [1] : vector<8x32xf32> to vector<8xf32>
    %36 = vector.shape_cast %35 : vector<8xf32> to vector<8x1xf32>
    %cst_22 = arith.constant 3.200000e+01 : f32
    %37 = vector.broadcast %cst_22 : f32 to vector<8x1xf32>
    %38 = arith.divf %36, %37 : vector<8x1xf32>
    %39 = vector.broadcast %31 : vector<8x1xf32> to vector<8x32xf32>
    %40 = arith.subf %25, %39 : vector<8x32xf32>
    %cst_23 = arith.constant 9.99999974E-6 : f32
    %41 = vector.broadcast %cst_23 : f32 to vector<8x1xf32>
    %42 = arith.addf %38, %41 : vector<8x1xf32>
    %43 = math.rsqrt %42 : vector<8x1xf32>
    %44 = vector.broadcast %43 : vector<8x1xf32> to vector<8x32xf32>
    %45 = arith.mulf %40, %44 : vector<8x32xf32>
    %46 = vector.broadcast %26 : vector<1x32xf32> to vector<8x32xf32>
    %47 = arith.mulf %45, %46 : vector<8x32xf32>
    %48 = vector.broadcast %27 : vector<1x32xf32> to vector<8x32xf32>
    %49 = arith.addf %47, %48 : vector<8x32xf32>
    %c0_24 = arith.constant 0 : index
    %c0_25 = arith.constant 0 : index
    %c0_26 = arith.constant 0 : index
    %50 = vector.load %arg8[%c0_24, %c0_25, %c0_26] : memref<1x8x32xf32, #tpu.memory_space<vmem>>, vector<1x8x32xf32>
    %51 = vector.shape_cast %50 : vector<1x8x32xf32> to vector<8x32xf32>
    %52 = vector.shape_cast %49 : vector<8x32xf32> to vector<1x8x32xf32>
    tpu.vector_store %arg8[%c0_24, %c0_25, %c0_26], %52 {strides = array<i32>} : memref<1x8x32xf32, #tpu.memory_space<vmem>>, vector<1x8x32xf32>,
    return
  }
  func.func @transform_0(%arg0: i32) -> (i32, i32, i32) {
    %c0_i32 = arith.constant 0 : i32
    %c0_i32_0 = arith.constant 0 : i32
    %c0_i32_1 = arith.constant 0 : i32
    return %arg0, %c0_i32, %c0_i32_0 : i32, i32, i32
  }
  func.func @transform_1(%arg0: i32) -> (i32, i32) {
    %c0_i32 = arith.constant 0 : i32
    %c0_i32_0 = arith.constant 0 : i32
    %c0_i32_1 = arith.constant 0 : i32
    return %c0_i32, %c0_i32_0 : i32, i32
  }
  func.func @transform_2(%arg0: i32) -> (i32, i32) {
    %c0_i32 = arith.constant 0 : i32
    %c0_i32_0 = arith.constant 0 : i32
    %c0_i32_1 = arith.constant 0 : i32
    return %c0_i32, %c0_i32_0 : i32, i32
  }
  func.func @transform_3(%arg0: i32) -> (i32, i32) {
    %c0_i32 = arith.constant 0 : i32
    %c0_i32_0 = arith.constant 0 : i32
    %c0_i32_1 = arith.constant 0 : i32
    return %c0_i32, %c0_i32_0 : i32, i32
  }
  func.func @transform_4(%arg0: i32) -> (i32, i32) {
    %c0_i32 = arith.constant 0 : i32
    %c0_i32_0 = arith.constant 0 : i32
    %c0_i32_1 = arith.constant 0 : i32
    return %c0_i32, %c0_i32_0 : i32, i32
  }
  func.func @transform_5(%arg0: i32) -> (i32, i32) {
    %c0_i32 = arith.constant 0 : i32
    %c0_i32_0 = arith.constant 0 : i32
    %c0_i32_1 = arith.constant 0 : i32
    return %c0_i32, %c0_i32_0 : i32, i32
  }
  func.func @transform_6(%arg0: i32) -> (i32, i32) {
    %c0_i32 = arith.constant 0 : i32
    %c0_i32_0 = arith.constant 0 : i32
    %c0_i32_1 = arith.constant 0 : i32
    return %c0_i32, %c0_i32_0 : i32, i32
  }
  func.func @transform_7(%arg0: i32) -> (i32, i32, i32) {
    %c0_i32 = arith.constant 0 : i32
    %c0_i32_0 = arith.constant 0 : i32
    %c0_i32_1 = arith.constant 0 : i32
    return %arg0, %c0_i32, %c0_i32_0 : i32, i32, i32
  }
}

module attributes {stable_mosaic.version = 11 : i64} {
  func.func @_fused_head_kernel(%arg0: i32, %arg1: memref<1x8x32xf32, #tpu.memory_space<vmem>>, %arg2: memref<1x8x32xf32, #tpu.memory_space<vmem>>, %arg3: memref<1x32xf32, #tpu.memory_space<vmem>>, %arg4: memref<1x32xf32, #tpu.memory_space<vmem>>, %arg5: memref<1x32xf32, #tpu.memory_space<vmem>>, %arg6: memref<1x32xf32, #tpu.memory_space<vmem>>, %arg7: memref<32x64xf32, #tpu.memory_space<vmem>>, %arg8: memref<32x64xf32, #tpu.memory_space<vmem>>, %arg9: memref<1x64xf32, #tpu.memory_space<vmem>>, %arg10: memref<64x32xf32, #tpu.memory_space<vmem>>, %arg11: memref<1x32xf32, #tpu.memory_space<vmem>>, %arg12: memref<1x32xf32, #tpu.memory_space<vmem>>, %arg13: memref<1x32xf32, #tpu.memory_space<vmem>>, %arg14: memref<1x8x32xf32, #tpu.memory_space<vmem>>) attributes {dimension_semantics = [#tpu.dimension_semantics<parallel>], iteration_bounds = array<i64: 2>, scalar_prefetch = 0 : i64, scratch_operands = 0 : i64, tpu.core_type = #tpu.core_type<tc>, window_params = [{transform_indices = @transform_0, window_bounds = array<i64: 1, 8, 32>}, {transform_indices = @transform_1, window_bounds = array<i64: 1, 8, 32>}, {pipeline_mode = #tpu.pipeline_mode<synchronous>, transform_indices = @transform_2, window_bounds = array<i64: 1, 32>}, {pipeline_mode = #tpu.pipeline_mode<synchronous>, transform_indices = @transform_3, window_bounds = array<i64: 1, 32>}, {pipeline_mode = #tpu.pipeline_mode<synchronous>, transform_indices = @transform_4, window_bounds = array<i64: 1, 32>}, {pipeline_mode = #tpu.pipeline_mode<synchronous>, transform_indices = @transform_5, window_bounds = array<i64: 1, 32>}, {pipeline_mode = #tpu.pipeline_mode<synchronous>, transform_indices = @transform_6, window_bounds = array<i64: 32, 64>}, {pipeline_mode = #tpu.pipeline_mode<synchronous>, transform_indices = @transform_7, window_bounds = array<i64: 32, 64>}, {pipeline_mode = #tpu.pipeline_mode<synchronous>, transform_indices = @transform_8, window_bounds = array<i64: 1, 64>}, {pipeline_mode = #tpu.pipeline_mode<synchronous>, transform_indices = @transform_9, window_bounds = array<i64: 64, 32>}, {pipeline_mode = #tpu.pipeline_mode<synchronous>, transform_indices = @transform_10, window_bounds = array<i64: 1, 32>}, {pipeline_mode = #tpu.pipeline_mode<synchronous>, transform_indices = @transform_11, window_bounds = array<i64: 1, 32>}, {pipeline_mode = #tpu.pipeline_mode<synchronous>, transform_indices = @transform_12, window_bounds = array<i64: 1, 32>}, {transform_indices = @transform_13, window_bounds = array<i64: 1, 8, 32>}]} {
    %c0 = arith.constant 0 : index
    %c0_0 = arith.constant 0 : index
    %c0_1 = arith.constant 0 : index
    %0 = vector.load %arg1[%c0, %c0_0, %c0_1] : memref<1x8x32xf32, #tpu.memory_space<vmem>>, vector<1x8x32xf32>
    %1 = vector.shape_cast %0 : vector<1x8x32xf32> to vector<8x32xf32>
    %c0_2 = arith.constant 0 : index
    %c0_3 = arith.constant 0 : index
    %c0_4 = arith.constant 0 : index
    %2 = vector.load %arg2[%c0_2, %c0_3, %c0_4] : memref<1x8x32xf32, #tpu.memory_space<vmem>>, vector<1x8x32xf32>
    %3 = vector.shape_cast %2 : vector<1x8x32xf32> to vector<8x32xf32>
    %cst = arith.constant dense<0.000000e+00> : vector<8xf32>
    %4 = vector.multi_reduction <add>, %1, %cst [1] : vector<8x32xf32> to vector<8xf32>
    %5 = vector.shape_cast %4 : vector<8xf32> to vector<8x1xf32>
    %cst_5 = arith.constant dense<0.000000e+00> : vector<8xf32>
    %6 = vector.multi_reduction <add>, %3, %cst_5 [1] : vector<8x32xf32> to vector<8xf32>
    %7 = vector.shape_cast %6 : vector<8xf32> to vector<8x1xf32>
    %8 = arith.addf %5, %7 : vector<8x1xf32>
    %cst_6 = arith.constant 6.400000e+01 : f32
    %9 = vector.broadcast %cst_6 : f32 to vector<8x1xf32>
    %10 = arith.divf %8, %9 : vector<8x1xf32>
    %11 = vector.broadcast %10 : vector<8x1xf32> to vector<8x32xf32>
    %12 = arith.subf %1, %11 : vector<8x32xf32>
    %13 = arith.mulf %12, %12 : vector<8x32xf32>
    %cst_7 = arith.constant dense<0.000000e+00> : vector<8xf32>
    %14 = vector.multi_reduction <add>, %13, %cst_7 [1] : vector<8x32xf32> to vector<8xf32>
    %15 = vector.shape_cast %14 : vector<8xf32> to vector<8x1xf32>
    %16 = vector.broadcast %10 : vector<8x1xf32> to vector<8x32xf32>
    %17 = arith.subf %3, %16 : vector<8x32xf32>
    %18 = arith.mulf %17, %17 : vector<8x32xf32>
    %cst_8 = arith.constant dense<0.000000e+00> : vector<8xf32>
    %19 = vector.multi_reduction <add>, %18, %cst_8 [1] : vector<8x32xf32> to vector<8xf32>
    %20 = vector.shape_cast %19 : vector<8xf32> to vector<8x1xf32>
    %21 = arith.addf %15, %20 : vector<8x1xf32>
    %cst_9 = arith.constant 6.400000e+01 : f32
    %22 = vector.broadcast %cst_9 : f32 to vector<8x1xf32>
    %23 = arith.divf %21, %22 : vector<8x1xf32>
    %cst_10 = arith.constant 9.99999974E-6 : f32
    %24 = vector.broadcast %cst_10 : f32 to vector<8x1xf32>
    %25 = arith.addf %23, %24 : vector<8x1xf32>
    %26 = math.rsqrt %25 : vector<8x1xf32>
    %27 = vector.broadcast %10 : vector<8x1xf32> to vector<8x32xf32>
    %28 = arith.subf %1, %27 : vector<8x32xf32>
    %29 = vector.broadcast %26 : vector<8x1xf32> to vector<8x32xf32>
    %30 = arith.mulf %28, %29 : vector<8x32xf32>
    %c0_11 = arith.constant 0 : index
    %c0_12 = arith.constant 0 : index
    %31 = vector.load %arg3[%c0_11, %c0_12] : memref<1x32xf32, #tpu.memory_space<vmem>>, vector<1x32xf32>
    %32 = vector.broadcast %31 : vector<1x32xf32> to vector<8x32xf32>
    %33 = arith.mulf %30, %32 : vector<8x32xf32>
    %c0_13 = arith.constant 0 : index
    %c0_14 = arith.constant 0 : index
    %34 = vector.load %arg5[%c0_13, %c0_14] : memref<1x32xf32, #tpu.memory_space<vmem>>, vector<1x32xf32>
    %35 = vector.broadcast %34 : vector<1x32xf32> to vector<8x32xf32>
    %36 = arith.addf %33, %35 : vector<8x32xf32>
    %37 = vector.broadcast %10 : vector<8x1xf32> to vector<8x32xf32>
    %38 = arith.subf %3, %37 : vector<8x32xf32>
    %39 = vector.broadcast %26 : vector<8x1xf32> to vector<8x32xf32>
    %40 = arith.mulf %38, %39 : vector<8x32xf32>
    %c0_15 = arith.constant 0 : index
    %c0_16 = arith.constant 0 : index
    %41 = vector.load %arg4[%c0_15, %c0_16] : memref<1x32xf32, #tpu.memory_space<vmem>>, vector<1x32xf32>
    %42 = vector.broadcast %41 : vector<1x32xf32> to vector<8x32xf32>
    %43 = arith.mulf %40, %42 : vector<8x32xf32>
    %c0_17 = arith.constant 0 : index
    %c0_18 = arith.constant 0 : index
    %44 = vector.load %arg6[%c0_17, %c0_18] : memref<1x32xf32, #tpu.memory_space<vmem>>, vector<1x32xf32>
    %45 = vector.broadcast %44 : vector<1x32xf32> to vector<8x32xf32>
    %46 = arith.addf %43, %45 : vector<8x32xf32>
    %c0_19 = arith.constant 0 : index
    %c0_20 = arith.constant 0 : index
    %47 = vector.load %arg7[%c0_19, %c0_20] : memref<32x64xf32, #tpu.memory_space<vmem>>, vector<32x64xf32>
    %cst_21 = arith.constant dense<0.000000e+00> : vector<8x64xf32>
    %48 = tpu.matmul %36, %47, %cst_21 {dimension_numbers = #tpu.dot_dimension_numbers<[1], [0], [0], [1], [0, 0, 1, 1], [], []>} : vector<8x32xf32>, vector<32x64xf32>, vector<8x64xf32> -> vector<8x64xf32>
    %c0_22 = arith.constant 0 : index
    %c0_23 = arith.constant 0 : index
    %49 = vector.load %arg8[%c0_22, %c0_23] : memref<32x64xf32, #tpu.memory_space<vmem>>, vector<32x64xf32>
    %cst_24 = arith.constant dense<0.000000e+00> : vector<8x64xf32>
    %50 = tpu.matmul %46, %49, %cst_24 {dimension_numbers = #tpu.dot_dimension_numbers<[1], [0], [0], [1], [0, 0, 1, 1], [], []>} : vector<8x32xf32>, vector<32x64xf32>, vector<8x64xf32> -> vector<8x64xf32>
    %51 = arith.addf %48, %50 : vector<8x64xf32>
    %c0_25 = arith.constant 0 : index
    %c0_26 = arith.constant 0 : index
    %52 = vector.load %arg9[%c0_25, %c0_26] : memref<1x64xf32, #tpu.memory_space<vmem>>, vector<1x64xf32>
    %53 = vector.broadcast %52 : vector<1x64xf32> to vector<8x64xf32>
    %54 = arith.addf %51, %53 : vector<8x64xf32>
    %55 = arith.mulf %54, %54 : vector<8x64xf32>
    %56 = arith.mulf %54, %55 : vector<8x64xf32>
    %cst_27 = arith.constant 4.471500e-02 : f32
    %57 = vector.broadcast %cst_27 : f32 to vector<8x64xf32>
    %58 = arith.mulf %57, %56 : vector<8x64xf32>
    %59 = arith.addf %54, %58 : vector<8x64xf32>
    %cst_28 = arith.constant 0.797884583 : f32
    %60 = vector.broadcast %cst_28 : f32 to vector<8x64xf32>
    %61 = arith.mulf %60, %59 : vector<8x64xf32>
    %62 = math.tanh %61 : vector<8x64xf32>
    %cst_29 = arith.constant 1.000000e+00 : f32
    %63 = vector.broadcast %cst_29 : f32 to vector<8x64xf32>
    %64 = arith.addf %63, %62 : vector<8x64xf32>
    %cst_30 = arith.constant 5.000000e-01 : f32
    %65 = vector.broadcast %cst_30 : f32 to vector<8x64xf32>
    %66 = arith.mulf %65, %64 : vector<8x64xf32>
    %67 = arith.mulf %54, %66 : vector<8x64xf32>
    %c0_31 = arith.constant 0 : index
    %c0_32 = arith.constant 0 : index
    %68 = vector.load %arg10[%c0_31, %c0_32] : memref<64x32xf32, #tpu.memory_space<vmem>>, vector<64x32xf32>
    %cst_33 = arith.constant dense<0.000000e+00> : vector<8x32xf32>
    %69 = tpu.matmul %67, %68, %cst_33 {dimension_numbers = #tpu.dot_dimension_numbers<[1], [0], [0], [1], [0, 0, 1, 1], [], []>} : vector<8x64xf32>, vector<64x32xf32>, vector<8x32xf32> -> vector<8x32xf32>
    %c0_34 = arith.constant 0 : index
    %c0_35 = arith.constant 0 : index
    %70 = vector.load %arg11[%c0_34, %c0_35] : memref<1x32xf32, #tpu.memory_space<vmem>>, vector<1x32xf32>
    %71 = vector.broadcast %70 : vector<1x32xf32> to vector<8x32xf32>
    %72 = arith.addf %69, %71 : vector<8x32xf32>
    %c0_36 = arith.constant 0 : index
    %c0_37 = arith.constant 0 : index
    %73 = vector.load %arg12[%c0_36, %c0_37] : memref<1x32xf32, #tpu.memory_space<vmem>>, vector<1x32xf32>
    %c0_38 = arith.constant 0 : index
    %c0_39 = arith.constant 0 : index
    %74 = vector.load %arg13[%c0_38, %c0_39] : memref<1x32xf32, #tpu.memory_space<vmem>>, vector<1x32xf32>
    %cst_40 = arith.constant dense<0.000000e+00> : vector<8xf32>
    %75 = vector.multi_reduction <add>, %72, %cst_40 [1] : vector<8x32xf32> to vector<8xf32>
    %76 = vector.shape_cast %75 : vector<8xf32> to vector<8x1xf32>
    %cst_41 = arith.constant 3.200000e+01 : f32
    %77 = vector.broadcast %cst_41 : f32 to vector<8x1xf32>
    %78 = arith.divf %76, %77 : vector<8x1xf32>
    %79 = vector.broadcast %78 : vector<8x1xf32> to vector<8x32xf32>
    %80 = arith.subf %72, %79 : vector<8x32xf32>
    %81 = arith.mulf %80, %80 : vector<8x32xf32>
    %cst_42 = arith.constant dense<0.000000e+00> : vector<8xf32>
    %82 = vector.multi_reduction <add>, %81, %cst_42 [1] : vector<8x32xf32> to vector<8xf32>
    %83 = vector.shape_cast %82 : vector<8xf32> to vector<8x1xf32>
    %cst_43 = arith.constant 3.200000e+01 : f32
    %84 = vector.broadcast %cst_43 : f32 to vector<8x1xf32>
    %85 = arith.divf %83, %84 : vector<8x1xf32>
    %86 = vector.broadcast %78 : vector<8x1xf32> to vector<8x32xf32>
    %87 = arith.subf %72, %86 : vector<8x32xf32>
    %cst_44 = arith.constant 9.99999974E-6 : f32
    %88 = vector.broadcast %cst_44 : f32 to vector<8x1xf32>
    %89 = arith.addf %85, %88 : vector<8x1xf32>
    %90 = math.rsqrt %89 : vector<8x1xf32>
    %91 = vector.broadcast %90 : vector<8x1xf32> to vector<8x32xf32>
    %92 = arith.mulf %87, %91 : vector<8x32xf32>
    %93 = vector.broadcast %73 : vector<1x32xf32> to vector<8x32xf32>
    %94 = arith.mulf %92, %93 : vector<8x32xf32>
    %95 = vector.broadcast %74 : vector<1x32xf32> to vector<8x32xf32>
    %96 = arith.addf %94, %95 : vector<8x32xf32>
    %c0_45 = arith.constant 0 : index
    %c0_46 = arith.constant 0 : index
    %c0_47 = arith.constant 0 : index
    %97 = vector.load %arg14[%c0_45, %c0_46, %c0_47] : memref<1x8x32xf32, #tpu.memory_space<vmem>>, vector<1x8x32xf32>
    %98 = vector.shape_cast %97 : vector<1x8x32xf32> to vector<8x32xf32>
    %99 = vector.shape_cast %96 : vector<8x32xf32> to vector<1x8x32xf32>
    tpu.vector_store %arg14[%c0_45, %c0_46, %c0_47], %99 {strides = array<i32>} : memref<1x8x32xf32, #tpu.memory_space<vmem>>, vector<1x8x32xf32>,
    return
  }
  func.func @transform_0(%arg0: i32) -> (i32, i32, i32) {
    %c0_i32 = arith.constant 0 : i32
    %c0_i32_0 = arith.constant 0 : i32
    %c0_i32_1 = arith.constant 0 : i32
    return %arg0, %c0_i32, %c0_i32_0 : i32, i32, i32
  }
  func.func @transform_1(%arg0: i32) -> (i32, i32, i32) {
    %c0_i32 = arith.constant 0 : i32
    %c0_i32_0 = arith.constant 0 : i32
    %c0_i32_1 = arith.constant 0 : i32
    return %arg0, %c0_i32, %c0_i32_0 : i32, i32, i32
  }
  func.func @transform_2(%arg0: i32) -> (i32, i32) {
    %c0_i32 = arith.constant 0 : i32
    %c0_i32_0 = arith.constant 0 : i32
    %c0_i32_1 = arith.constant 0 : i32
    return %c0_i32, %c0_i32_0 : i32, i32
  }
  func.func @transform_3(%arg0: i32) -> (i32, i32) {
    %c0_i32 = arith.constant 0 : i32
    %c0_i32_0 = arith.constant 0 : i32
    %c0_i32_1 = arith.constant 0 : i32
    return %c0_i32, %c0_i32_0 : i32, i32
  }
  func.func @transform_4(%arg0: i32) -> (i32, i32) {
    %c0_i32 = arith.constant 0 : i32
    %c0_i32_0 = arith.constant 0 : i32
    %c0_i32_1 = arith.constant 0 : i32
    return %c0_i32, %c0_i32_0 : i32, i32
  }
  func.func @transform_5(%arg0: i32) -> (i32, i32) {
    %c0_i32 = arith.constant 0 : i32
    %c0_i32_0 = arith.constant 0 : i32
    %c0_i32_1 = arith.constant 0 : i32
    return %c0_i32, %c0_i32_0 : i32, i32
  }
  func.func @transform_6(%arg0: i32) -> (i32, i32) {
    %c0_i32 = arith.constant 0 : i32
    %c0_i32_0 = arith.constant 0 : i32
    %c0_i32_1 = arith.constant 0 : i32
    return %c0_i32, %c0_i32_0 : i32, i32
  }
  func.func @transform_7(%arg0: i32) -> (i32, i32) {
    %c0_i32 = arith.constant 0 : i32
    %c0_i32_0 = arith.constant 0 : i32
    %c0_i32_1 = arith.constant 0 : i32
    return %c0_i32, %c0_i32_0 : i32, i32
  }
  func.func @transform_8(%arg0: i32) -> (i32, i32) {
    %c0_i32 = arith.constant 0 : i32
    %c0_i32_0 = arith.constant 0 : i32
    %c0_i32_1 = arith.constant 0 : i32
    return %c0_i32, %c0_i32_0 : i32, i32
  }
  func.func @transform_9(%arg0: i32) -> (i32, i32) {
    %c0_i32 = arith.constant 0 : i32
    %c0_i32_0 = arith.constant 0 : i32
    %c0_i32_1 = arith.constant 0 : i32
    return %c0_i32, %c0_i32_0 : i32, i32
  }
  func.func @transform_10(%arg0: i32) -> (i32, i32) {
    %c0_i32 = arith.constant 0 : i32
    %c0_i32_0 = arith.constant 0 : i32
    %c0_i32_1 = arith.constant 0 : i32
    return %c0_i32, %c0_i32_0 : i32, i32
  }
  func.func @transform_11(%arg0: i32) -> (i32, i32) {
    %c0_i32 = arith.constant 0 : i32
    %c0_i32_0 = arith.constant 0 : i32
    %c0_i32_1 = arith.constant 0 : i32
    return %c0_i32, %c0_i32_0 : i32, i32
  }
  func.func @transform_12(%arg0: i32) -> (i32, i32) {
    %c0_i32 = arith.constant 0 : i32
    %c0_i32_0 = arith.constant 0 : i32
    %c0_i32_1 = arith.constant 0 : i32
    return %c0_i32, %c0_i32_0 : i32, i32
  }
  func.func @transform_13(%arg0: i32) -> (i32, i32, i32) {
    %c0_i32 = arith.constant 0 : i32
    %c0_i32_0 = arith.constant 0 : i32
    %c0_i32_1 = arith.constant 0 : i32
    return %arg0, %c0_i32, %c0_i32_0 : i32, i32, i32
  }
}

</mosaic_0001>

<bundles_post_ra>
// kernel: component_aware_block.6
= control target key start
LH: loop header
LB: loop body
LE: loop exit
PB: predicated region body
PF: predicated region fallthrough
CT: control target
= control target key end

     0   :  { %s1422_s13 = smov 0   ;;  %s1553_s0 = inlined_call_operand.vmem [shape: f32[2,8,32], index: 0, kind: input, shape index: {}]   ;;  %s1554_s1 = inlined_call_operand.vmem [shape: f32[2,16,32], index: 1, kind: input, shape index: {}]   ;;  %s1555_s2 = inlined_call_operand.vmem [shape: f32[32,32], index: 2, kind: input, shape index: {}]   ;;  %s1556_s3 = inlined_call_operand.vmem [shape: f32[1,32], index: 3, kind: input, shape index: {}]   ;;  %s1557_s4 = inlined_call_operand.vmem [shape: f32[32,64], index: 4, kind: input, shape index: {}]   ;;  %s1558_s5 = inlined_call_operand.vmem [shape: f32[1,64], index: 5, kind: input, shape index: {}]   ;;  %s1559_s6 = inlined_call_operand.vmem [shape: f32[32,32], index: 6, kind: input, shape index: {}]   ;;  %s1560_s7 = inlined_call_operand.vmem [shape: f32[1,32], index: 7, kind: input, shape index: {}]   ;;  %s1561_s8 = inlined_call_operand.vmem [shape: f32[1,32], index: 8, kind: input, shape index: {}]   ;;  %s1562_s9 = inlined_call_operand.vmem [shape: f32[1,32], index: 9, kind: input, shape index: {}]   ;;  %s1563_s10 = inlined_call_operand.vmem [shape: f32[2,8,32], index: 10, kind: output, shape index: {}]  }
   0x1 LB: > { %s1154_s14 = sadd.s32 4294967295, %s1359_s13   ;;  %p1158_p0 = scmp.ge.s32.totalorder %s1359_s13, 1  ;;  %s1359_s13 = sphi %s1422_s13, %s20_s13  }
   0x2   : > { %p321_p1 = scmp.lt.s32.totalorder %s1359_s13, 3 }
   0x4   : > { %p322_p2 = pnand %p1158_p0, %p321_p1 }
   0x5   : > { %v382_v0 = vld [vmem:[%s1557_s4] sm:$0xff] (!%p322_p2)  ;;  %v383_v1 = vld [vmem:[%s1557_s4 + $0x8] sm:$0xff] (!%p322_p2)  ;;  %v384_v2 = vld [vmem:[%s1557_s4 + $0x10] sm:$0xff] (!%p322_p2)  ;;  %p362_p3 = scmp.lt.s32.totalorder (!%p322_p2), %s1154_s14, 1  ;;  %v1361_v5 = vmov (!%p322_p2), 0.0|0.0   ;;  %vm1362_vm0 = vmmov (!%p322_p2), 0  }
   0x6   : > { %325 = sbr.rel (%p322_p2) target bundleno = 1724 (0x6bc), region = 60  ;;  %v1283_v3 = vpack.c.bf16 (!%p322_p2), %v383_v1, %v382_v0  ;;  %v385_v4 = vld [vmem:[%s1557_s4 + $0x18] sm:$0xff] (!%p322_p2)  ;;  %1277 = vmatprep.subr.bf16.mxu0 (!%p322_p2), %v1361_v5  ;;  %v378_v6 = vld [vmem:[%s1555_s2] sm:$0xff] (!%p322_p2)  ;;  %v379_v7 = vld [vmem:[%s1555_s2 + $0x8] sm:$0xff] (!%p322_p2)  ;;  %v1363_v12 = vmov (!%p322_p2), 0.0   ;;  %vm397_vm1 = vcmask (!%p322_p2), 261120  }
   0x7   : > { %v1287_v8 = vpack.c.bf16 (!%p322_p2), %v385_v4, %v384_v2  ;;  %v1278_v9 = vpack.c.bf16 (!%p322_p2), %v379_v7, %v378_v6  ;;  %v380_v10 = vld [vmem:[%s1555_s2 + $0x10] sm:$0xff] (!%p322_p2)  ;;  %v381_v11 = vld [vmem:[%s1555_s2 + $0x18] sm:$0xff] (!%p322_p2)  ;;  %1221 = vmatprep.mubr.msk.f32.mxu0 (!%p322_p2), %vm1362_vm0, %v1363_v12  ;;  %v1165_v17 = vld [vmem:[%s1558_s5] ss:$0 sm:$0xff] (!%p322_p2)  ;;  %vm568_vm2 = vcmask (!%p322_p2), 130048   ;;  %s1364_s25 = smov (!%p322_p2), 112  }
   0x8   : > { %1284 = vmatprep.subr.bf16.mxu1 (!%p322_p2), %v1283_v3  ;;  %v1281_v13 = vpack.c.bf16 (!%p322_p2), %v381_v11, %v380_v10  ;;  %v1163_v18 = vld [vmem:[%s1556_s3] ss:$0 sm:$0xff] (!%p322_p2)  ;;  %vm1490_vm3 = vmpackc.low (!%p322_p2), %vm568_vm2, %vm568_vm2  ;;  %s1365_s26 = smov (!%p322_p2), 96   ;;  %s1366_s27 = smov (!%p322_p2), 80   ;;  %v387_v59 = vld [vmem:[%s1559_s6 + $0x8] sm:$0xff] (!%p322_p2) }
   0x9   : > { %1286 = vmatpush3.bf16.msra.mxu1 (!%p322_p2), %v1283_v3  ;;  %1279 = vmatpush3.bf16.msra.mxu0 (!%p322_p2), %v1278_v9  ;;  %v386_v58 = vld [vmem:[%s1559_s6] sm:$0xff] (!%p322_p2)  ;;  %v388_v1 = vld [vmem:[%s1559_s6 + $0x10] sm:$0xff] (!%p322_p2)  ;;  %v389_v2 = vld [vmem:[%s1559_s6 + $0x18] sm:$0xff] (!%p322_p2) }
   0xa   : > { %1288 = vmatprep.subr.bf16.mxu1 (!%p322_p2), %v1287_v8  ;;  %1280 = vmatprep.subr.bf16.mxu0 (!%p322_p2), %v1361_v5  ;;  %v1299_v60 = vpack.c.bf16 (!%p322_p2), %v387_v59, %v386_v58 }
   0xd   : > { %s1567_s14 = smov (!%p362_p3, %s1154_s14), 1  ;;  %1290 = vmatpush3.bf16.msra.mxu1 %v1287_v8  ;;  %1282 = vmatpush3.bf16.msra.mxu0 %v1281_v13  ;;  %v1309_v8 = vpack.c.bf16 %v389_v2, %v388_v1  ;;  %v1168_v13 = vld [vmem:[%s1560_s7] ss:$0 sm:$0xff] }
   0xe   : > { %s1183_s11 = sshll.u32 %s1567_s14, 4  ;;  %s1159_s12 = sshll.u32 %s1567_s14, 3  ;;  %1291 = vmatprep.subr.bf16.mxu0 %v1361_v5  ;;  %1295 = vmatprep.subr.bf16.mxu1 %v1361_v5 }
   0xf   : > { %s370_s17 = scalar_lea.vmem %s1554_s1, %s1183_s11  ;;  %s365_s20 = scalar_lea.vmem %s1553_s0, %s1159_s12 }
  0x10   : > { %v376_v14 = vld [vmem:[%s370_s17] sm:$0xff]  ;;  %v377_v15 = vld [vmem:[%s370_s17 + $0x8] sm:$0xff] }
  0x11   : > { %1232 = vmatprep.mubr.msk.f32.mxu1 %vm397_vm1, %v376_v14  ;;  %v1471_v16 = vld [vmem:[%s365_s20] sm:$0xff] }
  0x12   : > { %1233 = vmatmul.mubr.msk.f32.vlgmr.msra.gmra.mrb[0].mxu1 %vm397_vm1, %v377_v15  ;;  %1222 = vmatmul.mubr.msk.f32.vlgmr.msra.gmra.mrb[0].mxu0 %vm397_vm1, %v1471_v16  ;;  %v567_v14 = vadd.f32 %v1168_v13, %v1471_v16  ;;  %v1179_v16 = vld [vmem:[%s1561_s8] ss:$0 sm:$0xff] }
  0x13   : > { %1239 = vmatprep.mubr.msk.f32.mxu0 %vm1362_vm0, %v1363_v12  ;;  %1246 = vmatprep.mubr.msk.f32.mxu1 %vm1362_vm0, %v1363_v12 }
  0xe5   : > { %v1234_v19 = vpop.f32.mrb[0].mxu1  ;;  %v467_v20 = vpop.f32.mrb[0].mxu0 }
  0xe6   : > { %v557_v21 = vadd.f32 %v1234_v19, %v1165_v17  ;;  %v551_v22 = vpop.f32.mrb[1].mxu1  ;;  %v1223_v23 = vpop.f32.mrb[1].mxu0  ;;  %v468_v25 = vadd.f32 %v1163_v18, %v467_v20 }
  0xe7   : > { %v552_v24 = vadd.f32 %v1165_v17, %v551_v22 }
  0xe8   : > { %v471_v29 = vmul.f32 0.25, %v468_v25 }
  0xe9   : > { %v1292_v27 = vpack.c.bf16 %v557_v21, %v552_v24  ;;  %v1328_v28 = vpack.i.bf16 %v557_v21, %v552_v24 }
  0xeb   : > { %1329 = vrot.lane.b32.xlu0 %v1328_v28, %s1364_s25  ;;  %1294 = vmatpush3.bf16.xpose.msk.msra.mxu0 %vm1490_vm3, %v1292_v27 }
  0xec   : > { %1301 = vmatprep.subr.bf16.mxu0 %v1361_v5 }
  0xef   : > { %812 = vrot.lane.b32.xlu0 %v471_v29, %s1364_s25 }
  0xf2   : > { %1240 = vmatmul.mubr.msk.f32.vlgmr.msra.gmra.mrb[2].mxu0 %vm568_vm2, %v471_v29 }
  0xf3   : > { %1334 = vrot.lane.b32.xlu0 %v1328_v28, %s1365_s26  ;;  %1260 = vmatprep.mubr.msk.f32.mxu0 %vm1362_vm0, %v1363_v12 }
 0x15d   : > { %v1330_v30 = vpop.permute.xlu0 %1329 }
 0x15e   : > { %v1332_v31 = vunpack.i.h.bf16 %v1330_v30  ;;  %v1331_v32 = vunpack.i.l.bf16 %v1330_v30 }
 0x160   : > { %v1302_v33 = vpack.c.bf16 %v1332_v31, %v1331_v32 }
 0x161   : > { %v813_v34 = vpop.permute.xlu0 %812 }
 0x162   : > { %1304 = vmatpush3.bf16.xpose.msk.msra.mxu0 %vm1490_vm3, %v1302_v33 }
 0x165   : > { %v1335_v35 = vpop.permute.xlu0 %1334 }
 0x166   : > { %v1337_v36 = vunpack.i.h.bf16 %v1335_v35  ;;  %v1336_v37 = vunpack.i.l.bf16 %v1335_v35 }
 0x168   : > { %v1296_v38 = vpack.c.bf16 %v1337_v36, %v1336_v37 }
 0x169   : > { %1261 = vmatmul.mubr.msk.f32.vlgmr.msra.gmra.mrb[4].mxu0 %vm568_vm2, %v813_v34 }
 0x16a   : > { %1297 = vmatpush3.bf16.msra.mxu1 %v1296_v38 }
 0x16b   : > { %1298 = vmatprep.subr.bf16.mxu1 %v1361_v5 }
 0x1c5   : > { %v644_v39 = vpop.f32.mrb[2].mxu0 }
 0x1c6   : > { %v1241_v40 = vpop.f32.mrb[3].mxu0  ;;  %v648_v41 = vsel %vm568_vm2, %v644_v39, -inf }
 0x1c7   : > { %649 = vmax.xlane.f32.xlu1 %v648_v41 }
 0x23c   : > { %v890_v42 = vpop.f32.mrb[4].mxu0 }
 0x23d   : > { %v1262_v43 = vpop.f32.mrb[5].mxu0  ;;  %v894_v49 = vsel %vm568_vm2, %v890_v42, -inf }
 0x254   : > { %v650_v44 = vpop.xlane.xlu1 %649 }
 0x255   : > { %v651_v45 = vsub.f32 %v644_v39, %v650_v44 }
 0x257   : > { %v652_v46 = vmul.f32 1.442695, %v651_v45 }
 0x259   : > { %1343 = vpow2.f32 %v652_v46 }
 0x263   : > { %v1344_v47 = vpop.eup %1343 }
 0x264   : > { %v654_v48 = vsel %vm568_vm2, %v1344_v47, 0.0 }
 0x265   : > { %655 = vadd.xlane.f32.xlu1 %v654_v48 }
 0x269   : > { %895 = vmax.xlane.f32.xlu1 %v894_v49 }
 0x27a   : > { %1339 = vrot.lane.b32.xlu1 %v1328_v28, %s1366_s27  ;;  %v1180_v28 = vld [vmem:[%s1562_s9] ss:$0 sm:$0xff]  ;;  %s374_s27 = scalar_lea.vmem %s1563_s10, %s1159_s12 }
 0x2f2   : > { %v656_v50 = vpop.xlane.xlu1 %655 }
 0x2f3   : > { %1345 = vrcp.f32 %v656_v50 }
 0x2f6   : > { %v896_v51 = vpop.xlane.xlu1 %895 }
 0x2f7   : > { %v897_v52 = vsub.f32 %v890_v42, %v896_v51 }
 0x2f9   : > { %v898_v53 = vmul.f32 1.442695, %v897_v52 }
 0x2fa   : > { %v1340_v62 = vpop.permute.xlu1 %1339 }
 0x2fb   : > { %1347 = vpow2.f32 %v898_v53  ;;  %v1342_v63 = vunpack.i.h.bf16 %v1340_v62  ;;  %v1341_v0 = vunpack.i.l.bf16 %v1340_v62 }
 0x2fd   : > { %v1346_v54 = vpop.eup %1345  ;;  %v1306_v4 = vpack.c.bf16 %v1342_v63, %v1341_v0 }
 0x2fe   : > { %v658_v55 = vmul.f32 %v1346_v54, %v1344_v47 }
 0x300   : > { %1247 = vmatmul.mubr.msk.f32.vlgmr.msra.gmra.mrb[2].mxu1 %vm568_vm2, %v658_v55 }
 0x301   : > { %1253 = vmatprep.mubr.msk.f32.mxu1 %vm1362_vm0, %v1363_v12  ;;  %1300 = vmatpush3.bf16.msra.mxu1 %v1299_v60 }
 0x302   : > { %1305 = vmatprep.subr.bf16.mxu1 %v1361_v5 }
 0x305   : > { %v1348_v56 = vpop.eup %1347 }
 0x306   : > { %v900_v57 = vsel %vm568_vm2, %v1348_v56, 0.0 }
 0x307   : > { %901 = vadd.xlane.f32.xlu0 %v900_v57 }
 0x394   : > { %v902_v61 = vpop.xlane.xlu0 %901 }
 0x395   : > { %1349 = vrcp.f32 %v902_v61 }
 0x39f   : > { %v1350_v3 = vpop.eup %1349 }
 0x3a0   : > { %v904_v9 = vmul.f32 %v1350_v3, %v1348_v56 }
 0x3d3   : > { %v734_v6 = vpop.f32.mrb[2].mxu1 }
 0x3d4   : > { %v1248_v7 = vpop.f32.mrb[3].mxu1  ;;  %1254 = vmatmul.mubr.msk.f32.vlgmr.msra.gmra.mrb[4].mxu1 %vm568_vm2, %v734_v6 }
 0x3d5   : > { %1307 = vmatpush3.bf16.msra.mxu1 %v1306_v4  ;;  %1267 = vmatprep.mubr.msk.f32.mxu1 %vm1362_vm0, %v1363_v12 }
 0x3d6   : > { %1308 = vmatprep.subr.bf16.mxu1 %v1361_v5 }
 0x3d8   : > { %1268 = vmatmul.mubr.msk.f32.vlgmr.msra.gmra.mrb[6].mxu1 %vm568_vm2, %v904_v9 }
 0x3d9   : > { %1310 = vmatpush3.bf16.msra.mxu1 %v1309_v8  ;;  %1274 = vmatprep.mubr.msk.f32.mxu1 %vm1362_vm0, %v1363_v12 }
 0x4ab   : > { %v980_v10 = vpop.f32.mrb[6].mxu1 }
 0x4ac   : > { %v1269_v11 = vpop.f32.mrb[7].mxu1  ;;  %1275 = vmatmul.mubr.msk.f32.vlgmr.msra.gmra.mrb[4].mxu1 %vm568_vm2, %v980_v10 }
 0x57f   : > { %v1053_v15 = vpop.f32.mrb[4].mxu1 }
 0x580   : > { %v1311_v17 = vadd.f32 %v1053_v15, %v567_v14  ;;  %v1276_v18 = vpop.f32.mrb[5].mxu1 }
 0x582   : > { %v1060_v5 = vsel %vm397_vm1, %v1311_v17, 0.0 }
 0x583   : > { %1061 = vadd.xlane.f32.xlu1 %v1060_v5 }
 0x610   : > { %v1062_v19 = vpop.xlane.xlu1 %1061 }
 0x611   : > { %v1064_v20 = vmul.f32 0.03125, %v1062_v19 }
 0x613   : > { %v1065_v12 = vsub.f32 %v1311_v17, %v1064_v20 }
 0x615   : > { %v1066_v21 = vmul.f32 %v1065_v12, %v1065_v12 }
 0x617   : > { %v1067_v22 = vsel %vm397_vm1, %v1066_v21, 0.0 }
 0x618   : > { %1068 = vadd.xlane.f32.xlu0 %v1067_v22 }
 0x6a5   : > { %v1069_v23 = vpop.xlane.xlu0 %1068 }
 0x6a6   : > { %v1070_v24 = vmul.f32 0.03125, %v1069_v23 }
 0x6a8   : > { %v1071_v25 = vadd.f32 1e-05, %v1070_v24 }
 0x6aa   : > { %1351 = vrsqrt.f32 %v1071_v25 }
 0x6b4   : > { %v1352_v26 = vpop.eup %1351 }
 0x6b5   : > { %v1073_v27 = vmul.f32 %v1352_v26, %v1065_v12 }
 0x6b7   : > { %v1080_v29 = vmul.f32 %v1179_v16, %v1073_v27 }
 0x6b9   : > { %v1087_v30 = vadd.f32 %v1180_v28, %v1080_v29 }
 0x6bb   : > { %1088 = vst.msk [vmem:[%s374_s27] sm:$0xff] %vm397_vm1, %v1087_v30 }
 0x6bc PF: > { %s20_s13 = sadd.s32 1, %s1359_s13  }
 0x6bd   : > { %p17_p4 = scmp.ge.s32.totalorder %s20_s13, 4  }
 0x6bf   :  { %19 = sbr.rel (!%p17_p4) target bundleno = 1 (0x1), region = 93 }

// kernel: component_aware_block.7
= control target key start
LH: loop header
LB: loop body
LE: loop exit
PB: predicated region body
PF: predicated region fallthrough
CT: control target
= control target key end

     0   :  { %s1349_s13 = smov 0   ;;  %s1472_s0 = inlined_call_operand.vmem [shape: f32[2,8,32], index: 0, kind: input, shape index: {}, may-alias: {0,1}]   ;;  %s1473_s1 = inlined_call_operand.vmem [shape: f32[2,8,32], index: 1, kind: input, shape index: {}, may-alias: {0,1}]   ;;  %s1474_s2 = inlined_call_operand.vmem [shape: f32[32,32], index: 2, kind: input, shape index: {}]   ;;  %s1475_s3 = inlined_call_operand.vmem [shape: f32[1,32], index: 3, kind: input, shape index: {}]   ;;  %s1476_s4 = inlined_call_operand.vmem [shape: f32[32,64], index: 4, kind: input, shape index: {}]   ;;  %s1477_s5 = inlined_call_operand.vmem [shape: f32[1,64], index: 5, kind: input, shape index: {}]   ;;  %s1478_s6 = inlined_call_operand.vmem [shape: f32[32,32], index: 6, kind: input, shape index: {}]   ;;  %s1479_s7 = inlined_call_operand.vmem [shape: f32[1,32], index: 7, kind: input, shape index: {}]   ;;  %s1480_s8 = inlined_call_operand.vmem [shape: f32[1,32], index: 8, kind: input, shape index: {}]   ;;  %s1481_s9 = inlined_call_operand.vmem [shape: f32[1,32], index: 9, kind: input, shape index: {}]   ;;  %s1482_s10 = inlined_call_operand.vmem [shape: f32[2,8,32], index: 10, kind: output, shape index: {}]  }
   0x1 LB: > { %s1130_s14 = sadd.s32 4294967295, %s1286_s13   ;;  %p1134_p0 = scmp.ge.s32.totalorder %s1286_s13, 1  ;;  %s1286_s13 = sphi %s1349_s13, %s20_s13  }
   0x2   : > { %p320_p1 = scmp.lt.s32.totalorder %s1286_s13, 3 }
   0x4   : > { %p321_p2 = pnand %p1134_p0, %p320_p1 }
   0x5   : > { %v378_v0 = vld [vmem:[%s1476_s4] sm:$0xff] (!%p321_p2)  ;;  %v379_v1 = vld [vmem:[%s1476_s4 + $0x8] sm:$0xff] (!%p321_p2)  ;;  %v1288_v3 = vmov (!%p321_p2), 0.0|0.0   ;;  %v380_v6 = vld [vmem:[%s1476_s4 + $0x10] sm:$0xff] (!%p321_p2)  ;;  %p360_p3 = scmp.lt.s32.totalorder (!%p321_p2), %s1130_s14, 1  ;;  %vm1289_vm0 = vmmov (!%p321_p2), 0  }
   0x6   : > { %324 = sbr.rel (%p321_p2) target bundleno = 2030 (0x7ee), region = 60  ;;  %v374_v2 = vld [vmem:[%s1474_s2] sm:$0xff] (!%p321_p2)  ;;  %1241 = vmatprep.subr.bf16.mxu1 (!%p321_p2), %v1288_v3  ;;  %1235 = vmatprep.subr.bf16.mxu0 (!%p321_p2), %v1288_v3  ;;  %v1242_v4 = vpack.c.bf16 (!%p321_p2), %v379_v1, %v378_v0  ;;  %v375_v5 = vld [vmem:[%s1474_s2 + $0x8] sm:$0xff] (!%p321_p2)  ;;  %v381_v7 = vld [vmem:[%s1476_s4 + $0x18] sm:$0xff] (!%p321_p2)  ;;  %v1290_v11 = vmov (!%p321_p2), 0.0   ;;  %vm393_vm1 = vcmask (!%p321_p2), 261120  }
   0x7   : > { %v1236_v8 = vpack.c.bf16 (!%p321_p2), %v375_v5, %v374_v2  ;;  %v376_v9 = vld [vmem:[%s1474_s2 + $0x10] sm:$0xff] (!%p321_p2)  ;;  %v377_v10 = vld [vmem:[%s1474_s2 + $0x18] sm:$0xff] (!%p321_p2)  ;;  %1198 = vmatprep.mubr.msk.f32.mxu1 (!%p321_p2), %vm1289_vm0, %v1290_v11  ;;  %1187 = vmatprep.mubr.msk.f32.mxu0 (!%p321_p2), %vm1289_vm0, %v1290_v11  ;;  %v1245_v12 = vpack.c.bf16 (!%p321_p2), %v381_v7, %v380_v6  ;;  %v1140_v16 = vld [vmem:[%s1477_s5] ss:$0 sm:$0xff] (!%p321_p2)  ;;  %vm556_vm2 = vcmask (!%p321_p2), 130048   ;;  %s1291_s23 = smov (!%p321_p2), 96  }
   0x8   : > { %1243 = vmatpush3.bf16.msra.mxu1 (!%p321_p2), %v1242_v4  ;;  %v1239_v13 = vpack.c.bf16 (!%p321_p2), %v377_v10, %v376_v9  ;;  %v1138_v17 = vld [vmem:[%s1475_s3] ss:$0 sm:$0xff] (!%p321_p2)  ;;  %s1292_s24 = smov (!%p321_p2), 112   ;;  %vm633_vm3 = vcmask (!%p321_p2), 64512   ;;  %v383_v35 = vld [vmem:[%s1478_s6 + $0x8] sm:$0xff] (!%p321_p2)  ;;  %s1293_s29 = smov (!%p321_p2), 80  }
   0x9   : > { %1237 = vmatpush3.bf16.msra.mxu0 (!%p321_p2), %v1236_v8  ;;  %1244 = vmatprep.subr.bf16.mxu1 (!%p321_p2), %v1288_v3  ;;  %v382_v34 = vld [vmem:[%s1478_s6] sm:$0xff] (!%p321_p2)  ;;  %v384_v54 = vld [vmem:[%s1478_s6 + $0x10] sm:$0xff] (!%p321_p2)  ;;  %v385_v55 = vld [vmem:[%s1478_s6 + $0x18] sm:$0xff] (!%p321_p2) }
   0xa   : > { %1238 = vmatprep.subr.bf16.mxu0 (!%p321_p2), %v1288_v3  ;;  %v1248_v36 = vpack.c.bf16 (!%p321_p2), %v383_v35, %v382_v34  ;;  %v1251_v57 = vpack.c.bf16 (!%p321_p2), %v385_v55, %v384_v54  ;;  %v1142_v61 = vld [vmem:[%s1479_s7] ss:$0 sm:$0xff] (!%p321_p2) }
   0xc   : > { %1246 = vmatpush3.bf16.msra.mxu1 (!%p321_p2), %v1245_v12  ;;  %v1151_v12 = vld [vmem:[%s1480_s8] ss:$0 sm:$0xff] (!%p321_p2) }
   0xd   : > { %s1484_s14 = smov (!%p360_p3, %s1130_s14), 1  ;;  %1240 = vmatpush3.bf16.msra.mxu0 %v1239_v13  ;;  %1201 = vmatprep.subr.mxu1 %v1290_v11 }
   0xe   : > { %s1389_s11 = sshll.u32 %s1484_s14, 3  ;;  %1247 = vmatprep.subr.bf16.mxu0 %v1288_v3 }
   0xf   : > { %s367_s16 = scalar_lea.vmem %s1473_s1, %s1389_s11  ;;  %s363_s19 = scalar_lea.vmem %s1472_s0, %s1389_s11 }
  0x10   : > { %v373_v14 = vld [vmem:[%s367_s16] sm:$0xff] }
  0x11   : > { %v1399_v15 = vld [vmem:[%s363_s19] sm:$0xff]  ;;  %1199 = vmatmul.mubr.msk.f32.vlgmr.msra.gmra.mrb[0].mxu1 %vm393_vm1, %v373_v14 }
  0x12   : > { %1188 = vmatmul.mubr.msk.f32.vlgmr.msra.gmra.mrb[0].mxu0 %vm393_vm1, %v1399_v15  ;;  %1203 = vmatprep.mubr.msk.f32.mxu1 %vm1289_vm0, %v1290_v11  ;;  %v555_v62 = vadd.f32 %v1142_v61, %v1399_v15  ;;  %v1152_v14 = vld [vmem:[%s1481_s9] ss:$0 sm:$0xff] }
  0x13   : > { %1215 = vmatprep.mubr.msk.f32.mxu0 %vm1289_vm0, %v1290_v11  ;;  %1249 = vmatpush3.bf16.msra.mxu0 %v1248_v36 }
  0x14   : > { %1223 = vmatprep.subr.mxu0 %v1290_v11 }
  0xe4   : > { %v544_v18 = vpop.f32.mrb[0].mxu1 }
  0xe5   : > { %v545_v19 = vadd.f32 %v1140_v16, %v544_v18  ;;  %v463_v20 = vpop.f32.mrb[0].mxu0  ;;  %v1200_v21 = vpop.f32.mrb[1].mxu1 }
  0xe6   : > { %v464_v22 = vadd.f32 %v1138_v17, %v463_v20  ;;  %v1189_v23 = vpop.f32.mrb[1].mxu0 }
  0xe7   : > { %645 = vrot.lane.b32.xlu1 %v545_v19, %s1291_s23  ;;  %1202 = vmatpush3.xpose.msk.msra.mxu1 %vm556_vm2, %v545_v19 }
  0xe8   : > { %v467_v24 = vmul.f32 0.25, %v464_v22  ;;  %1206 = vmatprep.subr.mxu1 %v1290_v11 }
  0xea   : > { %1204 = vmatmul.mubr.msk.f32.vlgmr.msra.gmra.mrb[2].mxu1 %vm556_vm2, %v467_v24 }
  0xeb   : > { %797 = vrot.lane.b32.xlu1 %v545_v19, %s1292_s24  ;;  %1208 = vmatprep.mubr.msk.f32.mxu1 %vm1289_vm0, %v1290_v11 }
 0x159   : > { %v646_v25 = vpop.permute.xlu1 %645 }
 0x15a   : > { %1207 = vmatpush3.msra.mxu1 %v646_v25 }
 0x15b   : > { %1218 = vmatprep.subr.mxu1 %v1290_v11 }
 0x15d   : > { %v798_v40 = vpop.permute.xlu1 %797 }
 0x1bd   : > { %v629_v26 = vpop.f32.mrb[2].mxu1 }
 0x1be   : > { %v1205_v27 = vpop.f32.mrb[3].mxu1  ;;  %v634_v28 = vsel %vm633_vm3, %v629_v26, -inf }
 0x1bf   : > { %635 = vmax.xlane.f32.xlu0 %v634_v28 }
 0x24c   : > { %v636_v29 = vpop.xlane.xlu0 %635 }
 0x24d   : > { %v637_v30 = vsub.f32 %v629_v26, %v636_v29 }
 0x24f   : > { %v638_v31 = vmul.f32 1.442695, %v637_v30 }
 0x251   : > { %1270 = vpow2.f32 %v638_v31 }
 0x25b   : > { %v1271_v32 = vpop.eup %1270 }
 0x25c   : > { %v640_v33 = vsel %vm633_vm3, %v1271_v32, 0.0 }
 0x25d   : > { %641 = vadd.xlane.f32.xlu0 %v640_v33 }
 0x273   : > { %795 = vrot.lane.b32.xlu0 %v467_v24, %s1292_s24  ;;  %s371_s24 = scalar_lea.vmem %s1482_s10, %s1389_s11 }
 0x2ea   : > { %v642_v37 = vpop.xlane.xlu0 %641 }
 0x2eb   : > { %1272 = vrcp.f32 %v642_v37 }
 0x2ee   : > { %v796_v41 = vpop.permute.xlu0 %795 }
 0x2f5   : > { %v1273_v38 = vpop.eup %1272 }
 0x2f6   : > { %v644_v39 = vmul.f32 %v1273_v38, %v1271_v32 }
 0x2f8   : > { %1209 = vmatmul.mubr.msk.f32.vlgmr.msra.gmra.mrb[4].mxu1 %vm633_vm3, %v644_v39 }
 0x2f9   : > { %1219 = vmatpush3.xpose.msk.msra.mxu1 %vm556_vm2, %v798_v40  ;;  %1220 = vmatprep.mubr.msk.f32.mxu1 %vm1289_vm0, %v1290_v11 }
 0x2fc   : > { %1221 = vmatmul.mubr.msk.f32.vlgmr.msra.gmra.mrb[6].mxu1 %vm556_vm2, %v796_v41 }
 0x3cb   : > { %v717_v42 = vpop.f32.mrb[4].mxu1 }
 0x3cc   : > { %v1210_v43 = vpop.f32.mrb[5].mxu1  ;;  %1216 = vmatmul.mubr.msk.f32.vlgmr.msra.gmra.mrb[2].mxu0 %vm556_vm2, %v717_v42 }
 0x3cd   : > { %1225 = vmatprep.mubr.msk.f32.mxu0 %vm1289_vm0, %v1290_v11 }
 0x3cf   : > { %v869_v44 = vpop.f32.mrb[6].mxu1 }
 0x3d0   : > { %v1222_v45 = vpop.f32.mrb[7].mxu1  ;;  %v873_v46 = vsel %vm633_vm3, %v869_v44, -inf }
 0x3d1   : > { %874 = vmax.xlane.f32.xlu1 %v873_v46 }
 0x3e2   : > { %884 = vrot.lane.b32.xlu1 %v545_v19, %s1293_s29 }
 0x45e   : > { %v875_v47 = vpop.xlane.xlu1 %874 }
 0x45f   : > { %v876_v48 = vsub.f32 %v869_v44, %v875_v47 }
 0x461   : > { %v877_v49 = vmul.f32 1.442695, %v876_v48 }
 0x462   : > { %v885_v50 = vpop.permute.xlu1 %884 }
 0x463   : > { %1274 = vpow2.f32 %v877_v49  ;;  %1224 = vmatpush3.msra.mxu0 %v885_v50 }
 0x464   : > { %1250 = vmatprep.subr.bf16.mxu0 %v1288_v3 }
 0x46d   : > { %v1275_v51 = vpop.eup %1274 }
 0x46e   : > { %v879_v52 = vsel %vm633_vm3, %v1275_v51, 0.0 }
 0x46f   : > { %880 = vadd.xlane.f32.xlu0 %v879_v52 }
 0x4fc   : > { %v881_v53 = vpop.xlane.xlu0 %880 }
 0x4fd   : > { %1276 = vrcp.f32 %v881_v53 }
 0x507   : > { %v1277_v56 = vpop.eup %1276 }
 0x508   : > { %v883_v58 = vmul.f32 %v1277_v56, %v1275_v51 }
 0x50a   : > { %1226 = vmatmul.mubr.msk.f32.vlgmr.msra.gmra.mrb[4].mxu0 %vm633_vm3, %v883_v58 }
 0x50b   : > { %1252 = vmatpush3.bf16.msra.mxu0 %v1251_v57  ;;  %1232 = vmatprep.mubr.msk.f32.mxu0 %vm1289_vm0, %v1290_v11 }
 0x5dd   : > { %v956_v59 = vpop.f32.mrb[4].mxu0 }
 0x5de   : > { %v1227_v60 = vpop.f32.mrb[5].mxu0  ;;  %1233 = vmatmul.mubr.msk.f32.vlgmr.msra.gmra.mrb[2].mxu0 %vm556_vm2, %v956_v59 }
 0x6b1   : > { %v1029_v63 = vpop.f32.mrb[2].mxu0 }
 0x6b2   : > { %v1253_v0 = vadd.f32 %v1029_v63, %v555_v62  ;;  %v1234_v1 = vpop.f32.mrb[3].mxu0 }
 0x6b4   : > { %v1036_v2 = vsel %vm393_vm1, %v1253_v0, 0.0 }
 0x6b5   : > { %1037 = vadd.xlane.f32.xlu0 %v1036_v2 }
 0x742   : > { %v1038_v3 = vpop.xlane.xlu0 %1037 }
 0x743   : > { %v1040_v4 = vmul.f32 0.03125, %v1038_v3 }
 0x745   : > { %v1041_v5 = vsub.f32 %v1253_v0, %v1040_v4 }
 0x747   : > { %v1042_v6 = vmul.f32 %v1041_v5, %v1041_v5 }
 0x749   : > { %v1043_v7 = vsel %vm393_vm1, %v1042_v6, 0.0 }
 0x74a   : > { %1044 = vadd.xlane.f32.xlu1 %v1043_v7 }
 0x7d7   : > { %v1045_v8 = vpop.xlane.xlu1 %1044 }
 0x7d8   : > { %v1046_v9 = vmul.f32 0.03125, %v1045_v8 }
 0x7da   : > { %v1047_v10 = vadd.f32 1e-05, %v1046_v9 }
 0x7dc   : > { %1278 = vrsqrt.f32 %v1047_v10 }
 0x7e6   : > { %v1279_v11 = vpop.eup %1278 }
 0x7e7   : > { %v1049_v13 = vmul.f32 %v1279_v11, %v1041_v5 }
 0x7e9   : > { %v1056_v15 = vmul.f32 %v1151_v12, %v1049_v13 }
 0x7eb   : > { %v1063_v16 = vadd.f32 %v1152_v14, %v1056_v15 }
 0x7ed   : > { %1064 = vst.msk [vmem:[%s371_s24] sm:$0xff] %vm393_vm1, %v1063_v16 }
 0x7ee PF: > { %s20_s13 = sadd.s32 1, %s1286_s13  }
 0x7ef   : > { %p17_p4 = scmp.ge.s32.totalorder %s20_s13, 4  }
 0x7f1   :  { %19 = sbr.rel (!%p17_p4) target bundleno = 1 (0x1), region = 93 }

// kernel: component_aware_block.9
= control target key start
LH: loop header
LB: loop body
LE: loop exit
PB: predicated region body
PF: predicated region fallthrough
CT: control target
= control target key end

     0   :  { %s1910_s13 = smov 0   ;;  %s2092_s0 = inlined_call_operand.vmem [shape: f32[2,32,8], index: 0, kind: input, shape index: {}, may-alias: {0,1}]   ;;  %s2093_s1 = inlined_call_operand.vmem [shape: f32[2,32,8], index: 1, kind: input, shape index: {}, may-alias: {0,1}]   ;;  %s2094_s2 = inlined_call_operand.vmem [shape: f32[8,32], index: 2, kind: input, shape index: {}]   ;;  %s2095_s3 = inlined_call_operand.vmem [shape: f32[1,32], index: 3, kind: input, shape index: {}]   ;;  %s2096_s4 = inlined_call_operand.vmem [shape: f32[8,64], index: 4, kind: input, shape index: {}]   ;;  %s2097_s5 = inlined_call_operand.vmem [shape: f32[1,64], index: 5, kind: input, shape index: {}]   ;;  %s2098_s6 = inlined_call_operand.vmem [shape: f32[32,8], index: 6, kind: input, shape index: {}]   ;;  %s2099_s7 = inlined_call_operand.vmem [shape: f32[1,8], index: 7, kind: input, shape index: {}]   ;;  %s2100_s8 = inlined_call_operand.vmem [shape: f32[1,8], index: 8, kind: input, shape index: {}]   ;;  %s2101_s9 = inlined_call_operand.vmem [shape: f32[1,8], index: 9, kind: input, shape index: {}]   ;;  %s2102_s10 = inlined_call_operand.vmem [shape: f32[2,32,8], index: 10, kind: output, shape index: {}]  }
   0x1 LB: > { %s1500_s14 = sadd.s32 4294967295, %s1850_s13   ;;  %p1504_p0 = scmp.ge.s32.totalorder %s1850_s13, 1  ;;  %s1850_s13 = sphi %s1910_s13, %s20_s13  }
   0x2   : > { %p322_p1 = scmp.lt.s32.totalorder %s1850_s13, 3 }
   0x4   : > { %p323_p2 = pnand %p1504_p0, %p322_p1 }
   0x5   : > { %v389_v0 = vld [vmem:[%s2096_s4] sm:$0xff] (!%p323_p2)  ;;  %p365_p3 = scmp.lt.s32.totalorder (!%p323_p2), %s1500_s14, 1  ;;  %vm401_vm0 = vcmask (!%p323_p2), 64512   ;;  %vm618_vm1 = vcmask (!%p323_p2), 130048   ;;  %s1852_s30 = smov (!%p323_p2), 112   ;;  %vm728_vm3 = vcmask (!%p323_p2), 261120  }
   0x6   : > { %326 = sbr.rel (%p323_p2) target bundleno = 1754 (0x6da), region = 60  ;;  %v388_v1 = vld [vmem:[%s2094_s2] sm:$0xff] (!%p323_p2)  ;;  %1623 = vmatprep.subr.mxu1 (!%p323_p2), %v389_v0  ;;  %vm1962_vm2 = vmpackc.low (!%p323_p2), %vm618_vm1, %vm618_vm1  ;;  %s1853_s11 = smov (!%p323_p2), 96  }
   0x7   : > { %1615 = vmatprep.subr.mxu0 (!%p323_p2), %v388_v1  ;;  %1624 = vmatpush3.msra.mxu1 (!%p323_p2), %v389_v0  ;;  %v1516_v10 = vld [vmem:[%s2097_s5] ss:$0 sm:$0xff] (!%p323_p2)  ;;  %s1854_s12 = smov (!%p323_p2), 80  }
   0x8   : > { %1616 = vmatpush3.msra.mxu0 (!%p323_p2), %v388_v1  ;;  %v1511_v12 = vld [vmem:[%s2095_s3] ss:$0 sm:$0xff] (!%p323_p2) }
   0xd   : > { %s2106_s14 = smov (!%p365_p3, %s1500_s14), 1 }
   0xe   : > { %s1924_s19 = sshll.u32 %s2106_s14, 5 }
   0xf   : > { %s374_s22 = scalar_lea.vmem %s2093_s1, %s1924_s19  ;;  %s369_s25 = scalar_lea.vmem %s2092_s0, %s1924_s19 }
  0x10   : > { %v384_v2 = vld [vmem:[%s374_s22] sm:$0xff]  ;;  %v385_v3 = vld [vmem:[%s374_s22 + $0x8] sm:$0xff]  ;;  %v386_v4 = vld [vmem:[%s374_s22 + $0x10] sm:$0xff] }
  0x11   : > { %1625 = vmatprep.mubr.msk.f32.mxu1 %vm401_vm0, %v384_v2  ;;  %v1935_v5 = vld [vmem:[%s369_s25] sm:$0xff]  ;;  %v1937_v6 = vld [vmem:[%s369_s25 + $0x8] sm:$0xff]  ;;  %v1942_v7 = vld [vmem:[%s369_s25 + $0x10] sm:$0xff] }
  0x12   : > { %1626 = vmatmul.mubr.msk.f32.vlgmr.msra.gmra.mrb[0].mxu1 %vm401_vm0, %v385_v3  ;;  %1617 = vmatprep.mubr.msk.f32.mxu0 %vm401_vm0, %v1935_v5  ;;  %v387_v8 = vld [vmem:[%s374_s22 + $0x18] sm:$0xff] }
  0x13   : > { %1628 = vmatprep.mubr.msk.f32.mxu1 %vm401_vm0, %v386_v4  ;;  %1618 = vmatmul.mubr.msk.f32.vlgmr.msra.gmra.mrb[0].mxu0 %vm401_vm0, %v1937_v6  ;;  %v1949_v9 = vld [vmem:[%s369_s25 + $0x18] sm:$0xff] }
  0x14   : > { %1620 = vmatprep.mubr.msk.f32.mxu0 %vm401_vm0, %v1942_v7 }
  0x16   : > { %1629 = vmatmul.mubr.msk.f32.gmra.mrb[2].mxu1 %vm401_vm0, %v387_v8 }
  0x17   : > { %1621 = vmatmul.mubr.msk.f32.gmra.mrb[2].mxu0 %vm401_vm0, %v1949_v9 }
  0xe5   : > { %v1627_v11 = vpop.f32.mrb[0].mxu1 }
  0xe6   : > { %v594_v13 = vadd.f32 %v1627_v11, %v1516_v10  ;;  %v588_v14 = vpop.f32.mrb[1].mxu1  ;;  %v1619_v15 = vpop.f32.mrb[0].mxu0 }
  0xe7   : > { %v589_v16 = vadd.f32 %v1516_v10, %v588_v14  ;;  %v480_v17 = vpop.f32.mrb[1].mxu0  ;;  %v486_v19 = vadd.f32 %v1619_v15, %v1511_v12 }
  0xe8   : > { %v481_v20 = vadd.f32 %v1511_v12, %v480_v17 }
  0xe9   : > { %v1966_v21 = vpack.i.bf16 %v594_v13, %v589_v16  ;;  %v1707_v22 = vpack.c.bf16 %v594_v13, %v589_v16  ;;  %v1630_v23 = vpop.f32.mrb[2].mxu1  ;;  %v500_v30 = vmul.f32 0.25, %v486_v19 }
  0xea   : > { %v604_v24 = vadd.f32 %v1630_v23, %v1516_v10  ;;  %v598_v25 = vpop.f32.mrb[3].mxu1  ;;  %v499_v26 = vmul.f32 0.25, %v481_v20  ;;  %v1622_v27 = vpop.f32.mrb[2].mxu0 }
  0xeb   : > { %1775 = vrot.lane.b32.xlu0 %v1966_v21, %s1852_s30  ;;  %1709 = vmatprep.subr.msk.bf16.mxu0 %vm1962_vm2, %v1707_v22  ;;  %v599_v28 = vadd.f32 %v1516_v10, %v598_v25  ;;  %v490_v29 = vpop.f32.mrb[3].mxu0  ;;  %v496_v31 = vadd.f32 %v1622_v27, %v1511_v12 }
  0xec   : > { %1712 = vmatpush3.bf16.xpose.msk.msra.mxu0 %vm1962_vm2, %v1707_v22  ;;  %983 = vrot.lane.b32.xlu1 %v499_v26, %s1852_s30  ;;  %v491_v32 = vadd.f32 %v1511_v12, %v490_v29 }
  0xed   : > { %v1973_v33 = vpack.i.bf16 %v604_v24, %v599_v28  ;;  %v1713_v34 = vpack.c.bf16 %v604_v24, %v599_v28  ;;  %1639 = vmatprep.mubr.msk.f32.mxu0 %vm618_vm1, %v499_v26  ;;  %v502_v36 = vmul.f32 0.25, %v496_v31 }
  0xee   : > { %v501_v35 = vmul.f32 0.25, %v491_v32 }
  0xef   : > { %1780 = vrot.lane.b32.xlu0 %v1973_v33, %s1852_s30  ;;  %1715 = vmatprep.subr.msk.bf16.mxu0 %vm1962_vm2, %v1713_v34 }
  0xf0   : > { %985 = vrot.lane.b32.xlu1 %v500_v30, %s1852_s30 }
  0xf3   : > { %987 = vrot.lane.b32.xlu0 %v501_v35, %s1852_s30 }
  0xf4   : > { %1718 = vmatpush3.bf16.xpose.msk.msra.mxu0 %vm1962_vm2, %v1713_v34  ;;  %989 = vrot.lane.b32.xlu1 %v502_v36, %s1852_s30 }
  0xfb   : > { %1640 = vmatmul.mubr.msk.f32.vlgmr.msra.gmra.mrb[4].mxu0 %vm618_vm1, %v500_v30 }
  0xfc   : > { %1642 = vmatprep.mubr.msk.f32.mxu0 %vm618_vm1, %v501_v35 }
  0xff   : > { %1643 = vmatmul.mubr.msk.f32.gmra.mrb[6].mxu0 %vm618_vm1, %v502_v36 }
 0x15d   : > { %v1776_v37 = vpop.permute.xlu0 %1775 }
 0x15e   : > { %v1778_v38 = vunpack.i.h.bf16 %v1776_v37  ;;  %v1777_v39 = vunpack.i.l.bf16 %v1776_v37  ;;  %v984_v40 = vpop.permute.xlu1 %983 }
 0x15f   : > { %1677 = vmatprep.mubr.msk.f32.mxu0 %vm618_vm1, %v984_v40 }
 0x160   : > { %v1731_v41 = vpack.c.bf16 %v1778_v38, %v1777_v39 }
 0x161   : > { %v1781_v42 = vpop.permute.xlu0 %1780 }
 0x162   : > { %1733 = vmatprep.subr.msk.bf16.mxu0 %vm1962_vm2, %v1731_v41  ;;  %v1783_v43 = vunpack.i.h.bf16 %v1781_v42  ;;  %v1782_v44 = vunpack.i.l.bf16 %v1781_v42  ;;  %v986_v46 = vpop.permute.xlu1 %985 }
 0x163   : > { %1736 = vmatpush3.bf16.xpose.msk.msra.mxu0 %vm1962_vm2, %v1731_v41 }
 0x164   : > { %v1737_v45 = vpack.c.bf16 %v1783_v43, %v1782_v44 }
 0x165   : > { %v988_v47 = vpop.permute.xlu0 %987 }
 0x166   : > { %1739 = vmatprep.subr.msk.bf16.mxu0 %vm1962_vm2, %v1737_v45  ;;  %v990_v48 = vpop.permute.xlu1 %989 }
 0x16b   : > { %1742 = vmatpush3.bf16.xpose.msk.msra.mxu0 %vm1962_vm2, %v1737_v45 }
 0x172   : > { %1678 = vmatmul.mubr.msk.f32.vlgmr.msra.gmra.mrb[8].mxu0 %vm618_vm1, %v986_v46 }
 0x173   : > { %1680 = vmatprep.mubr.msk.f32.mxu0 %vm618_vm1, %v988_v47 }
 0x176   : > { %1681 = vmatmul.mubr.msk.f32.gmra.mrb[10].mxu0 %vm618_vm1, %v990_v48 }
 0x1ce   : > { %v1641_v49 = vpop.f32.mrb[4].mxu0 }
 0x1cf   : > { %v709_v50 = vpop.f32.mrb[5].mxu0  ;;  %v732_v51 = vsel %vm728_vm3, %v1641_v49, -inf }
 0x1d0   : > { %733 = vmax.xlane.f32.xlu1 %v732_v51  ;;  %v729_v52 = vsel %vm728_vm3, %v709_v50, -inf }
 0x1d1   : > { %730 = vmax.xlane.f32.xlu0 %v729_v52 }
 0x1d2   : > { %v1644_v53 = vpop.f32.mrb[6].mxu0 }
 0x1d3   : > { %v719_v54 = vpop.f32.mrb[7].mxu0  ;;  %v738_v56 = vsel %vm728_vm3, %v1644_v53, -inf }
 0x1d4   : > { %v735_v55 = vsel %vm728_vm3, %v719_v54, -inf }
 0x1d5   : > { %736 = vmax.xlane.f32.xlu0 %v735_v55 }
 0x1d9   : > { %739 = vmax.xlane.f32.xlu0 %v738_v56 }
 0x245   : > { %v2000_v57 = vpop.f32.mrb[8].mxu0 }
 0x246   : > { %v2002_v58 = vpop.f32.mrb[9].mxu0  ;;  %v1103_v24 = vsel %vm728_vm3, %v2000_v57, -inf }
 0x247   : > { %v1100_v22 = vsel %vm728_vm3, %v2002_v58, -inf }
 0x249   : > { %v2004_v59 = vpop.f32.mrb[10].mxu0 }
 0x24a   : > { %v2006_v60 = vpop.f32.mrb[11].mxu0  ;;  %v1109_v25 = vsel %vm728_vm3, %v2004_v59, -inf }
 0x24b   : > { %v1106_v23 = vsel %vm728_vm3, %v2006_v60, -inf }
 0x25d   : > { %v734_v61 = vpop.xlane.xlu1 %733 }
 0x25e   : > { %v742_v62 = vsub.f32 %v1641_v49, %v734_v61  ;;  %v731_v63 = vpop.xlane.xlu0 %730 }
 0x25f   : > { %v741_v0 = vsub.f32 %v709_v50, %v731_v63 }
 0x260   : > { %v747_v1 = vmul.f32 1.442695, %v742_v62 }
 0x261   : > { %v745_v2 = vmul.f32 1.442695, %v741_v0 }
 0x262   : > { %1804 = vpow2.f32 %v747_v1  ;;  %v737_v3 = vpop.xlane.xlu0 %736 }
 0x263   : > { %1806 = vpow2.f32 %v745_v2  ;;  %v743_v4 = vsub.f32 %v719_v54, %v737_v3 }
 0x265   : > { %v749_v8 = vmul.f32 1.442695, %v743_v4  ;;  %v391_v4 = vld [vmem:[%s2098_s6 + $0x8] sm:$0xff] }
 0x266   : > { %v740_v10 = vpop.xlane.xlu0 %739 }
 0x267   : > { %1808 = vpow2.f32 %v749_v8  ;;  %v744_v11 = vsub.f32 %v1644_v53, %v740_v10 }
 0x269   : > { %v751_v12 = vmul.f32 1.442695, %v744_v11 }
 0x26b   : > { %1810 = vpow2.f32 %v751_v12 }
 0x26c   : > { %v1805_v13 = vpop.eup %1804 }
 0x26d   : > { %v1807_v14 = vpop.eup %1806  ;;  %v756_v15 = vsel %vm728_vm3, %v1805_v13, 0.0 }
 0x26e   : > { %757 = vadd.xlane.f32.xlu0 %v756_v15  ;;  %v753_v16 = vsel %vm728_vm3, %v1807_v14, 0.0 }
 0x26f   : > { %754 = vadd.xlane.f32.xlu1 %v753_v16 }
 0x271   : > { %v1809_v17 = vpop.eup %1808 }
 0x272   : > { %v759_v18 = vsel %vm728_vm3, %v1809_v17, 0.0 }
 0x273   : > { %760 = vadd.xlane.f32.xlu1 %v759_v18 }
 0x275   : > { %v1811_v19 = vpop.eup %1810 }
 0x276   : > { %v762_v20 = vsel %vm728_vm3, %v1811_v19, 0.0 }
 0x277   : > { %763 = vadd.xlane.f32.xlu0 %v762_v20 }
 0x284   : > { %1785 = vrot.lane.b32.xlu1 %v1966_v21, %s1853_s11 }
 0x28d   : > { %1790 = vrot.lane.b32.xlu0 %v1973_v33, %s1853_s11  ;;  %s379_s11 = scalar_lea.vmem %s2102_s10, %s1924_s19 }
 0x2a8   : > { %1101 = vmax.xlane.f32.xlu1 %v1100_v22 }
 0x2ac   : > { %1107 = vmax.xlane.f32.xlu1 %v1106_v23  ;;  %1104 = vmax.xlane.f32.xlu0 %v1103_v24  ;;  %v393_v23 = vld [vmem:[%s2098_s6 + $0x18] sm:$0xff] }
 0x2b0   : > { %1110 = vmax.xlane.f32.xlu0 %v1109_v25 }
 0x2fb   : > { %v758_v27 = vpop.xlane.xlu0 %757 }
 0x2fc   : > { %v755_v26 = vpop.xlane.xlu1 %754 }
 0x2fd   : > { %1812 = vrcp.f32 %v755_v26 }
 0x2fe   : > { %1814 = vrcp.f32 %v758_v27 }
 0x300   : > { %v761_v28 = vpop.xlane.xlu1 %760 }
 0x301   : > { %1816 = vrcp.f32 %v761_v28 }
 0x304   : > { %v1786_v29 = vpop.permute.xlu1 %1785  ;;  %v764_v30 = vpop.xlane.xlu0 %763 }
 0x305   : > { %v1788_v31 = vunpack.i.h.bf16 %v1786_v29  ;;  %v1787_v32 = vunpack.i.l.bf16 %v1786_v29  ;;  %1818 = vrcp.f32 %v764_v30 }
 0x307   : > { %v1813_v34 = vpop.eup %1812  ;;  %v1719_v35 = vpack.c.bf16 %v1788_v31, %v1787_v32 }
 0x308   : > { %v1791_v36 = vpop.permute.xlu0 %1790  ;;  %v769_v37 = vmul.f32 %v1813_v34, %v1807_v14  ;;  %v1815_v41 = vpop.eup %1814 }
 0x309   : > { %v1793_v38 = vunpack.i.h.bf16 %v1791_v36  ;;  %v1792_v39 = vunpack.i.l.bf16 %v1791_v36  ;;  %1720 = vmatprep.subr.bf16.mxu1 %v1719_v35  ;;  %v770_v43 = vmul.f32 %v1815_v41, %v1805_v13  ;;  %v1521_v41 = vld [vmem:[%s2099_s7] ss:$0 sm:$0xff] }
 0x30a   : > { %1722 = vmatpush3.bf16.msra.mxu1 %v1719_v35  ;;  %1653 = vmatprep.mubr.msk.f32.mxu1 %vm728_vm3, %v769_v37 }
 0x30b   : > { %v1723_v40 = vpack.c.bf16 %v1793_v38, %v1792_v39  ;;  %v1817_v42 = vpop.eup %1816 }
 0x30c   : > { %v771_v45 = vmul.f32 %v1817_v42, %v1809_v17  ;;  %v615_v42 = vadd.f32 %v1521_v41, %v1937_v6 }
 0x30d   : > { %1724 = vmatprep.subr.bf16.mxu1 %v1723_v40 }
 0x30e   : > { %1726 = vmatpush3.bf16.msra.mxu1 %v1723_v40 }
 0x30f   : > { %v1819_v44 = vpop.eup %1818 }
 0x310   : > { %v772_v46 = vmul.f32 %v1819_v44, %v1811_v19 }
 0x311   : > { %1654 = vmatmul.mubr.msk.f32.vlgmr.msra.gmra.mrb[4].mxu1 %vm728_vm3, %v770_v43  ;;  %v614_v43 = vadd.f32 %v1521_v41, %v1935_v5 }
 0x312   : > { %1656 = vmatprep.mubr.msk.f32.mxu1 %vm728_vm3, %v771_v45 }
 0x315   : > { %1657 = vmatmul.mubr.msk.f32.gmra.mrb[6].mxu1 %vm728_vm3, %v772_v46 }
 0x335   : > { %v1102_v47 = vpop.xlane.xlu1 %1101 }
 0x336   : > { %v1112_v48 = vsub.f32 %v2002_v58, %v1102_v47  ;;  %v617_v47 = vadd.f32 %v1521_v41, %v1949_v9 }
 0x338   : > { %v1116_v49 = vmul.f32 1.442695, %v1112_v48 }
 0x339   : > { %v1108_v50 = vpop.xlane.xlu1 %1107  ;;  %v1105_v51 = vpop.xlane.xlu0 %1104 }
 0x33a   : > { %1820 = vpow2.f32 %v1116_v49  ;;  %v1114_v52 = vsub.f32 %v2006_v60, %v1108_v50  ;;  %v1113_v53 = vsub.f32 %v2000_v57, %v1105_v51  ;;  %v616_v49 = vadd.f32 %v1521_v41, %v1942_v7 }
 0x33c   : > { %v1120_v54 = vmul.f32 1.442695, %v1114_v52  ;;  %v1118_v55 = vmul.f32 1.442695, %v1113_v53 }
 0x33d   : > { %v1111_v56 = vpop.xlane.xlu0 %1110 }
 0x33e   : > { %1822 = vpow2.f32 %v1120_v54  ;;  %v1115_v61 = vsub.f32 %v2004_v59, %v1111_v56  ;;  %v390_v59 = vld [vmem:[%s2098_s6] sm:$0xff] }
 0x33f   : > { %1824 = vpow2.f32 %v1118_v55  ;;  %v1727_v8 = vpack.c.bf16 %v391_v4, %v390_v59 }
 0x340   : > { %v1122_v62 = vmul.f32 1.442695, %v1115_v61 }
 0x341   : > { %1728 = vmatprep.subr.bf16.mxu1 %v1727_v8 }
 0x342   : > { %1826 = vpow2.f32 %v1122_v62  ;;  %1730 = vmatpush3.bf16.msra.mxu1 %v1727_v8 }
 0x344   : > { %v1821_v63 = vpop.eup %1820 }
 0x345   : > { %v1124_v58 = vsel %vm728_vm3, %v1821_v63, 0.0 }
 0x346   : > { %1125 = vadd.xlane.f32.xlu1 %v1124_v58 }
 0x348   : > { %v1823_v0 = vpop.eup %1822 }
 0x349   : > { %v1825_v1 = vpop.eup %1824  ;;  %v1130_v2 = vsel %vm728_vm3, %v1823_v0, 0.0 }
 0x34a   : > { %1131 = vadd.xlane.f32.xlu1 %v1130_v2  ;;  %v1127_v57 = vsel %vm728_vm3, %v1825_v1, 0.0 }
 0x34b   : > { %1128 = vadd.xlane.f32.xlu0 %v1127_v57 }
 0x34c   : > { %v1827_v60 = vpop.eup %1826 }
 0x34d   : > { %v1133_v3 = vsel %vm728_vm3, %v1827_v60, 0.0 }
 0x34f   : > { %1134 = vadd.xlane.f32.xlu0 %v1133_v3 }
 0x35b   : > { %1795 = vrot.lane.b32.xlu1 %v1966_v21, %s1854_s12 }
 0x365   : > { %1800 = vrot.lane.b32.xlu0 %v1973_v33, %s1854_s12  ;;  %v392_v33 = vld [vmem:[%s2098_s6 + $0x10] sm:$0xff] }
 0x366   : > { %v1751_v28 = vpack.c.bf16 %v393_v23, %v392_v33 }
 0x3d3   : > { %v1126_v10 = vpop.xlane.xlu1 %1125 }
 0x3d4   : > { %1828 = vrcp.f32 %v1126_v10 }
 0x3d7   : > { %v1132_v11 = vpop.xlane.xlu1 %1131 }
 0x3d8   : > { %v1129_v12 = vpop.xlane.xlu0 %1128 }
 0x3d9   : > { %1830 = vrcp.f32 %v1129_v12 }
 0x3da   : > { %1832 = vrcp.f32 %v1132_v11 }
 0x3db   : > { %v1796_v13 = vpop.permute.xlu1 %1795 }
 0x3dc   : > { %v1798_v14 = vunpack.i.h.bf16 %v1796_v13  ;;  %v1797_v15 = vunpack.i.l.bf16 %v1796_v13  ;;  %v1135_v21 = vpop.xlane.xlu0 %1134 }
 0x3dd   : > { %1834 = vrcp.f32 %v1135_v21 }
 0x3de   : > { %v1743_v16 = vpack.c.bf16 %v1798_v14, %v1797_v15  ;;  %v1829_v24 = vpop.eup %1828 }
 0x3df   : > { %v1140_v30 = vmul.f32 %v1829_v24, %v1821_v63 }
 0x3e0   : > { %v1801_v17 = vpop.permute.xlu0 %1800  ;;  %1744 = vmatprep.subr.bf16.mxu1 %v1743_v16 }
 0x3e1   : > { %v1803_v18 = vunpack.i.h.bf16 %v1801_v17  ;;  %v1802_v19 = vunpack.i.l.bf16 %v1801_v17 }
 0x3e3   : > { %v1747_v25 = vpack.c.bf16 %v1803_v18, %v1802_v19  ;;  %v1831_v29 = vpop.eup %1830 }
 0x3e4   : > { %v1655_v20 = vpop.f32.mrb[4].mxu1  ;;  %v1833_v31 = vpop.eup %1832  ;;  %v1141_v32 = vmul.f32 %v1831_v29, %v1825_v1  ;;  %v1555_v29 = vld [vmem:[%s2101_s9] ss:$0 sm:$0xff] }
 0x3e5   : > { %v863_v22 = vpop.f32.mrb[5].mxu1  ;;  %v1142_v35 = vmul.f32 %v1833_v31, %v1823_v0 }
 0x3e6   : > { %1663 = vmatprep.mubr.msk.f32.mxu1 %vm618_vm1, %v863_v22 }
 0x3e7   : > { %1664 = vmatmul.mubr.msk.f32.vlgmr.msra.gmra.mrb[8].mxu1 %vm618_vm1, %v1655_v20  ;;  %v1835_v34 = vpop.eup %1834 }
 0x3e8   : > { %1746 = vmatpush3.bf16.msra.mxu1 %v1743_v16  ;;  %v1658_v26 = vpop.f32.mrb[6].mxu1  ;;  %v1143_v36 = vmul.f32 %v1835_v34, %v1827_v60 }
 0x3e9   : > { %1748 = vmatprep.subr.bf16.mxu1 %v1747_v25  ;;  %v873_v27 = vpop.f32.mrb[7].mxu1 }
 0x3ea   : > { %1666 = vmatprep.mubr.msk.f32.mxu1 %vm618_vm1, %v873_v27 }
 0x3eb   : > { %1667 = vmatmul.mubr.msk.f32.gmra.mrb[10].mxu1 %vm618_vm1, %v1658_v26  ;;  %v1554_v26 = vld [vmem:[%s2100_s8] ss:$0 sm:$0xff] }
 0x3ec   : > { %1750 = vmatpush3.bf16.msra.mxu1 %v1747_v25  ;;  %1691 = vmatprep.mubr.msk.f32.mxu1 %vm728_vm3, %v1140_v30 }
 0x3ed   : > { %1752 = vmatprep.subr.bf16.mxu1 %v1751_v28 }
 0x3ef   : > { %1692 = vmatmul.mubr.msk.f32.vlgmr.msra.gmra.mrb[12].mxu1 %vm728_vm3, %v1141_v32 }
 0x3f0   : > { %1694 = vmatprep.mubr.msk.f32.mxu1 %vm728_vm3, %v1142_v35  ;;  %1754 = vmatpush3.bf16.msra.mxu1 %v1751_v28 }
 0x3f3   : > { %1695 = vmatmul.mubr.msk.f32.gmra.mrb[14].mxu1 %vm728_vm3, %v1143_v36 }
 0x4c2   : > { %v1693_v37 = vpop.f32.mrb[12].mxu1 }
 0x4c3   : > { %v1234_v38 = vpop.f32.mrb[13].mxu1 }
 0x4c4   : > { %1701 = vmatprep.mubr.msk.f32.mxu1 %vm618_vm1, %v1234_v38 }
 0x4c5   : > { %1702 = vmatmul.mubr.msk.f32.vlgmr.msra.gmra.mrb[8].mxu1 %vm618_vm1, %v1693_v37 }
 0x4c6   : > { %v1696_v39 = vpop.f32.mrb[14].mxu1 }
 0x4c7   : > { %v1244_v40 = vpop.f32.mrb[15].mxu1 }
 0x4c8   : > { %1704 = vmatprep.mubr.msk.f32.mxu1 %vm618_vm1, %v1244_v40 }
 0x4c9   : > { %1705 = vmatmul.mubr.msk.f32.gmra.mrb[10].mxu1 %vm618_vm1, %v1696_v39 }
 0x598   : > { %v1703_v44 = vpop.f32.mrb[8].mxu1 }
 0x599   : > { %v1755_v45 = vadd.f32 %v1703_v44, %v615_v42  ;;  %v1331_v46 = vpop.f32.mrb[9].mxu1 }
 0x59a   : > { %v1756_v48 = vadd.f32 %v1331_v46, %v614_v43 }
 0x59b   : > { %v1359_v50 = vsel %vm401_vm0, %v1755_v45, 0.0 }
 0x59c   : > { %1360 = vadd.xlane.f32.xlu0 %v1359_v50  ;;  %v1706_v51 = vpop.f32.mrb[10].mxu1  ;;  %v1356_v52 = vsel %vm401_vm0, %v1756_v48, 0.0 }
 0x59d   : > { %v1757_v53 = vadd.f32 %v1706_v51, %v617_v47  ;;  %1357 = vadd.xlane.f32.xlu1 %v1356_v52  ;;  %v1341_v54 = vpop.f32.mrb[11].mxu1 }
 0x59e   : > { %v1758_v6 = vadd.f32 %v1341_v54, %v616_v49 }
 0x59f   : > { %v1365_v5 = vsel %vm401_vm0, %v1757_v53, 0.0 }
 0x5a0   : > { %1366 = vadd.xlane.f32.xlu0 %v1365_v5  ;;  %v1362_v55 = vsel %vm401_vm0, %v1758_v6, 0.0 }
 0x5a1   : > { %1363 = vadd.xlane.f32.xlu1 %v1362_v55 }
 0x629   : > { %v1361_v9 = vpop.xlane.xlu0 %1360 }
 0x62a   : > { %v1370_v56 = vmul.f32 0.125, %v1361_v9  ;;  %v1358_v61 = vpop.xlane.xlu1 %1357 }
 0x62b   : > { %v1369_v7 = vmul.f32 0.125, %v1358_v61 }
 0x62c   : > { %v1374_v62 = vsub.f32 %v1755_v45, %v1370_v56 }
 0x62d   : > { %v1373_v63 = vsub.f32 %v1756_v48, %v1369_v7  ;;  %v1367_v58 = vpop.xlane.xlu0 %1366 }
 0x62e   : > { %v1372_v0 = vmul.f32 0.125, %v1367_v58  ;;  %v1364_v1 = vpop.xlane.xlu1 %1363  ;;  %v1378_v2 = vmul.f32 %v1374_v62, %v1374_v62 }
 0x62f   : > { %v1371_v57 = vmul.f32 0.125, %v1364_v1  ;;  %v1377_v60 = vmul.f32 %v1373_v63, %v1373_v63 }
 0x630   : > { %v1376_v3 = vsub.f32 %v1757_v53, %v1372_v0  ;;  %v1384_v59 = vsel %vm401_vm0, %v1378_v2, 0.0 }
 0x631   : > { %v1375_v4 = vsub.f32 %v1758_v6, %v1371_v57  ;;  %1385 = vadd.xlane.f32.xlu0 %v1384_v59  ;;  %v1381_v8 = vsel %vm401_vm0, %v1377_v60, 0.0 }
 0x632   : > { %1382 = vadd.xlane.f32.xlu1 %v1381_v8  ;;  %v1380_v10 = vmul.f32 %v1376_v3, %v1376_v3 }
 0x633   : > { %v1379_v11 = vmul.f32 %v1375_v4, %v1375_v4 }
 0x634   : > { %v1390_v12 = vsel %vm401_vm0, %v1380_v10, 0.0 }
 0x635   : > { %1391 = vadd.xlane.f32.xlu0 %v1390_v12  ;;  %v1387_v13 = vsel %vm401_vm0, %v1379_v11, 0.0 }
 0x636   : > { %1388 = vadd.xlane.f32.xlu1 %v1387_v13 }
 0x6be   : > { %v1386_v14 = vpop.xlane.xlu0 %1385 }
 0x6bf   : > { %v1394_v15 = vmul.f32 0.125, %v1386_v14  ;;  %v1383_v21 = vpop.xlane.xlu1 %1382 }
 0x6c0   : > { %v1393_v16 = vmul.f32 0.125, %v1383_v21 }
 0x6c1   : > { %v1398_v17 = vadd.f32 1e-05, %v1394_v15 }
 0x6c2   : > { %v1397_v18 = vadd.f32 1e-05, %v1393_v16  ;;  %v1392_v19 = vpop.xlane.xlu0 %1391 }
 0x6c3   : > { %1836 = vrsqrt.f32 %v1398_v17  ;;  %v1396_v20 = vmul.f32 0.125, %v1392_v19  ;;  %v1389_v22 = vpop.xlane.xlu1 %1388 }
 0x6c4   : > { %1838 = vrsqrt.f32 %v1397_v18  ;;  %v1395_v33 = vmul.f32 0.125, %v1389_v22 }
 0x6c5   : > { %v1400_v23 = vadd.f32 1e-05, %v1396_v20 }
 0x6c6   : > { %v1399_v24 = vadd.f32 1e-05, %v1395_v33 }
 0x6c7   : > { %1840 = vrsqrt.f32 %v1400_v23 }
 0x6c8   : > { %1842 = vrsqrt.f32 %v1399_v24 }
 0x6cd   : > { %v1837_v25 = vpop.eup %1836 }
 0x6ce   : > { %v1839_v27 = vpop.eup %1838  ;;  %v1406_v28 = vmul.f32 %v1837_v25, %v1374_v62 }
 0x6cf   : > { %v1405_v30 = vmul.f32 %v1839_v27, %v1373_v63 }
 0x6d0   : > { %v1416_v31 = vmul.f32 %v1554_v26, %v1406_v28 }
 0x6d1   : > { %v1841_v32 = vpop.eup %1840  ;;  %v1415_v34 = vmul.f32 %v1554_v26, %v1405_v30 }
 0x6d2   : > { %v1843_v35 = vpop.eup %1842  ;;  %v1426_v36 = vadd.f32 %v1555_v29, %v1416_v31  ;;  %v1408_v37 = vmul.f32 %v1841_v32, %v1376_v3 }
 0x6d3   : > { %v1425_v38 = vadd.f32 %v1555_v29, %v1415_v34  ;;  %v1407_v39 = vmul.f32 %v1843_v35, %v1375_v4 }
 0x6d4   : > { %1430 = vst.msk [vmem:[%s379_s11 + $0x8] sm:$0xff] %vm401_vm0, %v1426_v36  ;;  %v1418_v40 = vmul.f32 %v1554_v26, %v1408_v37 }
 0x6d5   : > { %1429 = vst.msk [vmem:[%s379_s11] sm:$0xff] %vm401_vm0, %v1425_v38  ;;  %v1417_v41 = vmul.f32 %v1554_v26, %v1407_v39 }
 0x6d6   : > { %v1428_v42 = vadd.f32 %v1555_v29, %v1418_v40 }
 0x6d7   : > { %v1427_v43 = vadd.f32 %v1555_v29, %v1417_v41 }
 0x6d8   : > { %1432 = vst.msk [vmem:[%s379_s11 + $0x18] sm:$0xff] %vm401_vm0, %v1428_v42 }
 0x6d9   : > { %1431 = vst.msk [vmem:[%s379_s11 + $0x10] sm:$0xff] %vm401_vm0, %v1427_v43 }
 0x6da PF: > { %s20_s13 = sadd.s32 1, %s1850_s13  }
 0x6db   : > { %p17_p4 = scmp.ge.s32.totalorder %s20_s13, 4  }
 0x6dd   :  { %19 = sbr.rel (!%p17_p4) target bundleno = 1 (0x1), region = 93 }

// kernel: component_aware_block.10
= control target key start
LH: loop header
LB: loop body
LE: loop exit
PB: predicated region body
PF: predicated region fallthrough
CT: control target
= control target key end

     0   :  { %s686_s24 = smov 0   ;;  %s762_s0 = inlined_call_operand.vmem [shape: f32[2,8,32], index: 0, kind: input, shape index: {}]   ;;  %s763_s1 = inlined_call_operand.vmem [shape: f32[32,64], index: 1, kind: input, shape index: {}]   ;;  %s764_s2 = inlined_call_operand.vmem [shape: f32[1,64], index: 2, kind: input, shape index: {}]   ;;  %s765_s3 = inlined_call_operand.vmem [shape: f32[64,32], index: 3, kind: input, shape index: {}]   ;;  %s766_s4 = inlined_call_operand.vmem [shape: f32[1,32], index: 4, kind: input, shape index: {}]   ;;  %s767_s5 = inlined_call_operand.vmem [shape: f32[1,32], index: 5, kind: input, shape index: {}]   ;;  %s768_s6 = inlined_call_operand.vmem [shape: f32[1,32], index: 6, kind: input, shape index: {}]   ;;  %s769_s7 = inlined_call_operand.vmem [shape: f32[2,8,32], index: 7, kind: output, shape index: {}]  }
   0x1 LB: > { %s543_s25 = sadd.s32 4294967295, %s641_s24   ;;  %p547_p0 = scmp.ge.s32.totalorder %s641_s24, 1  ;;  %s641_s24 = sphi %s686_s24, %s17_s24  }
   0x2   : > { %p236_p1 = scmp.lt.s32.totalorder %s641_s24, 3 }
   0x4   : > { %p237_p2 = pnand %p547_p0, %p236_p1 }
   0x5   : > { %v275_v0 = vld [vmem:[%s763_s1] sm:$0xff] (!%p237_p2)  ;;  %v276_v1 = vld [vmem:[%s763_s1 + $0x8] sm:$0xff] (!%p237_p2)  ;;  %v277_v2 = vld [vmem:[%s763_s1 + $0x10] sm:$0xff] (!%p237_p2)  ;;  %v643_v3 = vmov (!%p237_p2), 0.0|0.0   ;;  %vm644_vm0 = vmmov (!%p237_p2), 0   ;;  %v645_v6 = vmov (!%p237_p2), 0.0  }
   0x6   : > { %240 = sbr.rel (%p237_p2) target bundleno = 788 (0x314), region = 48  ;;  %602 = vmatprep.subr.bf16.mxu0 (!%p237_p2), %v643_v3  ;;  %v603_v4 = vpack.c.bf16 (!%p237_p2), %v276_v1, %v275_v0  ;;  %v278_v5 = vld [vmem:[%s763_s1 + $0x18] sm:$0xff] (!%p237_p2)  ;;  %580 = vmatprep.mubr.msk.f32.mxu0 (!%p237_p2), %vm644_vm0, %v645_v6  ;;  %p266_p3 = scmp.lt.s32.totalorder (!%p237_p2), %s543_s25, 1  ;;  %vm286_vm1 = vcmask (!%p237_p2), 261120   ;;  %v369_v9 = vld [vmem:[%s765_s3] sm:$0xff] (!%p237_p2)  ;;  %v370_v10 = vld [vmem:[%s765_s3 + $0x8] sm:$0xff] (!%p237_p2) }
   0x7   : > { %608 = vmatprep.subr.bf16.mxu1 (!%p237_p2), %v643_v3  ;;  %599 = vmatprep.mubr.msk.f32.mxu1 (!%p237_p2), %vm644_vm0, %v645_v6  ;;  %v606_v7 = vpack.c.bf16 (!%p237_p2), %v278_v5, %v277_v2  ;;  %v609_v11 = vpack.c.bf16 (!%p237_p2), %v370_v10, %v369_v9  ;;  %v371_v12 = vld [vmem:[%s765_s3 + $0x10] sm:$0xff] (!%p237_p2)  ;;  %v372_v13 = vld [vmem:[%s765_s3 + $0x18] sm:$0xff] (!%p237_p2)  ;;  %v373_v15 = vld [vmem:[%s765_s3 + $0x20] sm:$0xff] (!%p237_p2)  ;;  %vm384_vm2 = vcmask (!%p237_p2), 523264  }
   0x8   : > { %604 = vmatpush3.bf16.msra.mxu0 (!%p237_p2), %v603_v4  ;;  %v612_v14 = vpack.c.bf16 (!%p237_p2), %v372_v13, %v371_v12  ;;  %v374_v16 = vld [vmem:[%s765_s3 + $0x28] sm:$0xff] (!%p237_p2)  ;;  %v375_v18 = vld [vmem:[%s765_s3 + $0x30] sm:$0xff] (!%p237_p2)  ;;  %v376_v19 = vld [vmem:[%s765_s3 + $0x38] sm:$0xff] (!%p237_p2) }
   0x9   : > { %605 = vmatprep.subr.bf16.mxu0 (!%p237_p2), %v643_v3  ;;  %610 = vmatpush3.bf16.msra.mxu1 (!%p237_p2), %v609_v11  ;;  %v615_v17 = vpack.c.bf16 (!%p237_p2), %v374_v16, %v373_v15  ;;  %v618_v20 = vpack.c.bf16 (!%p237_p2), %v376_v19, %v375_v18  ;;  %v550_v21 = vld [vmem:[%s764_s2] ss:$0 sm:$0xff] (!%p237_p2) }
   0xa   : > { %611 = vmatprep.subr.bf16.mxu1 (!%p237_p2), %v643_v3  ;;  %v552_v34 = vld [vmem:[%s766_s4] ss:$0 sm:$0xff] (!%p237_p2) }
   0xb   : > { %v554_v49 = vld [vmem:[%s767_s5] ss:$0 sm:$0xff] (!%p237_p2) }
   0xc   : > { %607 = vmatpush3.bf16.msra.mxu0 (!%p237_p2), %v606_v7  ;;  %v555_v51 = vld [vmem:[%s768_s6] ss:$0 sm:$0xff] (!%p237_p2) }
   0xd   : > { %s771_s25 = smov (!%p266_p3, %s543_s25), 1  ;;  %613 = vmatpush3.bf16.msra.mxu1 %v612_v14 }
   0xe   : > { %s548_s11 = sshll.u32 %s771_s25, 3  ;;  %614 = vmatprep.subr.bf16.mxu1 %v643_v3 }
   0xf   : > { %s269_s14 = scalar_lea.vmem %s762_s0, %s548_s11  ;;  %s273_s21 = scalar_lea.vmem %s769_s7, %s548_s11 }
  0x10   : > { %v274_v8 = vld [vmem:[%s269_s14] sm:$0xff] }
  0x11   : > { %581 = vmatmul.mubr.msk.f32.vlgmr.msra.gmra.mrb[0].mxu0 %vm286_vm1, %v274_v8  ;;  %616 = vmatpush3.bf16.msra.mxu1 %v615_v17 }
  0x12   : > { %617 = vmatprep.subr.bf16.mxu1 %v643_v3 }
  0x15   : > { %619 = vmatpush3.bf16.msra.mxu1 %v618_v20 }
  0xe4   : > { %v356_v22 = vpop.f32.mrb[0].mxu0 }
  0xe5   : > { %v357_v23 = vadd.f32 %v550_v21, %v356_v22  ;;  %v582_v24 = vpop.f32.mrb[1].mxu0 }
  0xe7   : > { %v360_v25 = vmul.f32 %v357_v23, %v357_v23 }
  0xe9   : > { %v361_v26 = vmul.f32 %v360_v25, %v357_v23 }
  0xeb   : > { %v362_v27 = vmul.f32 0.044715, %v361_v26 }
  0xed   : > { %v363_v28 = vadd.f32 %v362_v27, %v357_v23 }
  0xef   : > { %v364_v29 = vmul.f32 0.7978846, %v363_v28 }
  0xf1   : > { %631 = vtanh.f32 %v364_v29 }
  0xfb   : > { %v632_v30 = vpop.eup %631 }
  0xfc   : > { %v366_v31 = vadd.f32 1.0, %v632_v30 }
  0xfe   : > { %v367_v32 = vmul.f32 0.5, %v366_v31 }
 0x100   : > { %v368_v33 = vmul.f32 %v367_v32, %v357_v23 }
 0x102   : > { %600 = vmatmul.mubr.msk.f32.vlgmr.msra.gmra.mrb[0].mxu1 %vm384_vm2, %v368_v33 }
 0x1d5   : > { %v454_v35 = vpop.f32.mrb[0].mxu1 }
 0x1d6   : > { %v455_v36 = vadd.f32 %v552_v34, %v454_v35  ;;  %v601_v37 = vpop.f32.mrb[1].mxu1 }
 0x1d8   : > { %v458_v38 = vadd.f32 %v455_v36, %v274_v8 }
 0x1da   : > { %v461_v39 = vsel %vm286_vm1, %v458_v38, 0.0 }
 0x1db   : > { %462 = vadd.xlane.f32.xlu0 %v461_v39 }
 0x268   : > { %v463_v40 = vpop.xlane.xlu0 %462 }
 0x269   : > { %v465_v41 = vmul.f32 0.03125, %v463_v40 }
 0x26b   : > { %v466_v42 = vsub.f32 %v458_v38, %v465_v41 }
 0x26d   : > { %v467_v43 = vmul.f32 %v466_v42, %v466_v42 }
 0x26f   : > { %v468_v44 = vsel %vm286_vm1, %v467_v43, 0.0 }
 0x270   : > { %469 = vadd.xlane.f32.xlu0 %v468_v44 }
 0x2fd   : > { %v470_v45 = vpop.xlane.xlu0 %469 }
 0x2fe   : > { %v471_v46 = vmul.f32 0.03125, %v470_v45 }
 0x300   : > { %v472_v47 = vadd.f32 1e-05, %v471_v46 }
 0x302   : > { %633 = vrsqrt.f32 %v472_v47 }
 0x30c   : > { %v634_v48 = vpop.eup %633 }
 0x30d   : > { %v474_v50 = vmul.f32 %v634_v48, %v466_v42 }
 0x30f   : > { %v481_v52 = vmul.f32 %v554_v49, %v474_v50 }
 0x311   : > { %v488_v53 = vadd.f32 %v555_v51, %v481_v52 }
 0x313   : > { %489 = vst.msk [vmem:[%s273_s21] sm:$0xff] %vm286_vm1, %v488_v53 }
 0x314 PF: > { %s17_s24 = sadd.s32 1, %s641_s24  }
 0x315   : > { %p14_p4 = scmp.ge.s32.totalorder %s17_s24, 4  }
 0x317   :  { %16 = sbr.rel (!%p14_p4) target bundleno = 1 (0x1), region = 78 }

// kernel: component_aware_block.11
= control target key start
LH: loop header
LB: loop body
LE: loop exit
PB: predicated region body
PF: predicated region fallthrough
CT: control target
= control target key end

     0   :  { %s1368_s0 = inlined_call_operand.vmem [shape: f32[2,8,32], index: 0, kind: input, shape index: {}]   ;;  %s1369_s1 = inlined_call_operand.vmem [shape: f32[2,8,32], index: 1, kind: input, shape index: {}]   ;;  %s1370_s2 = inlined_call_operand.vmem [shape: f32[1,32], index: 2, kind: input, shape index: {}]   ;;  %s1371_s3 = inlined_call_operand.vmem [shape: f32[1,32], index: 3, kind: input, shape index: {}]   ;;  %s1372_s4 = inlined_call_operand.vmem [shape: f32[1,32], index: 4, kind: input, shape index: {}]   ;;  %s1373_s5 = inlined_call_operand.vmem [shape: f32[1,32], index: 5, kind: input, shape index: {}]   ;;  %s1374_s6 = inlined_call_operand.vmem [shape: f32[32,64], index: 6, kind: input, shape index: {}]   ;;  %s1375_s7 = inlined_call_operand.vmem [shape: f32[32,64], index: 7, kind: input, shape index: {}]   ;;  %s1376_s8 = inlined_call_operand.vmem [shape: f32[1,64], index: 8, kind: input, shape index: {}]   ;;  %s1377_s9 = inlined_call_operand.vmem [shape: f32[64,32], index: 9, kind: input, shape index: {}]   ;;  %s1378_s10 = inlined_call_operand.vmem [shape: f32[1,32], index: 10, kind: input, shape index: {}]   ;;  %s1379_s11 = inlined_call_operand.vmem [shape: f32[1,32], index: 11, kind: input, shape index: {}]   ;;  %s1380_s12 = inlined_call_operand.vmem [shape: f32[1,32], index: 12, kind: input, shape index: {}]   ;;  %s1381_s13 = inlined_call_operand.hbm [shape: f32[2,8,32], index: 13, kind: output, shape index: {}]  }
   0x1   :  { %1382 = sst [smem:[#allocation5_spill]] %s1368_s0 }
   0x2   :  { %1383 = sst [smem:[#allocation6_spill]] %s1369_s1 }
   0x3   :  { %1384 = sst [smem:[#allocation7_spill]] %s1370_s2 }
   0x4   :  { %1385 = sst [smem:[#allocation8_spill]] %s1371_s3 }
   0x5   :  { %18 = vsyncpa [#allocation3], 0 }
   0x6   :  { %20 = vsyncpa [#allocation3 + $0x1], 0  ;;  %s1181_s25 = smov 0   ;;  %s1183_s26 = smov 0  }
   0x7   :  { %s1185_s27 = smov 0   ;;  %s1187_s28 = smov 0  }
   0x8 LB: > { %s1202_s29 = sadd.s32 4294967295, %s1105_s28   ;;  %s889_s30 = sadd.s32 4294967294, %s1105_s28   ;;  %s1105_s28 = sphi %s1187_s28, %s1395_s28   ;;  %s1101_s27 = sphi %s1185_s27, %s1394_s27   ;;  %s1097_s26 = sphi %s1183_s26, %s1393_s26   ;;  %s1093_s25 = sphi %s1181_s25, %s1392_s25  }
   0x9   : > { %s1206_s14 = sadd.s32 1, %s1105_s28   ;;  %s316_s15 = sadd.s32 1, %s1101_s27 }
   0xa   : > { %s313_s16 = ssub.s32 %s1105_s28, %s1206_s14  ;;  %p326_p0 = scmp.ne.s32.totalorder %s1101_s27, %s1097_s26 }
   0xb   : > { %p314_p1 = scmp.eq.s32.totalorder %s313_s16, 0  ;;  %p327_p2 = scmp.eq.s32.totalorder %s1202_s29, 1 }
   0xc   : > { %p332_p3 = scmp.ne.s32.totalorder %s1097_s26, %s1093_s25  ;;  %p333_p4 = scmp.eq.s32.totalorder %s889_s30, 1 }
   0xd   : > { %s1217_s17 = scalar_select %p314_p1, %s1101_s27, %s316_s15  }
   0xe   : > { %p1219_p5 = por %p327_p2, %p326_p0  ;;  %p1223_p6 = por %p333_p4, %p332_p3 }
   0xf   : > { %p892_p7 = scmp.ge.s32.totalorder %s1105_s28, 1  ;;  %p398_p8 = scmp.lt.s32.totalorder %s1105_s28, 3 }
  0x11   : > { %p399_p9 = pnand %p892_p7, %p398_p8 }
  0x12   : > { %p445_p10 = scmp.lt.s32.totalorder (!%p399_p9), %s1202_s29, 1  ;;  %vm455_vm0 = vcmask (!%p399_p9), 261120   ;;  %s1388_s0 = sld [smem:[#allocation5_spill]] (!%p399_p9)  ;;  %v517_v14 = vld [vmem:[%s1375_s7] sm:$0xff] (!%p399_p9)  ;;  %v518_v15 = vld [vmem:[%s1375_s7 + $0x8] sm:$0xff] (!%p399_p9)  ;;  %v1107_v17 = vmov (!%p399_p9), 0.0|0.0  }
  0x13   : > { %402 = sbr.rel (%p399_p9) target bundleno = 1148 (0x47c), region = 72  ;;  %s1389_s1 = sld [smem:[#allocation6_spill]] (!%p399_p9)  ;;  %v972_v16 = vpack.c.bf16 (!%p399_p9), %v518_v15, %v517_v14  ;;  %971 = vmatprep.subr.bf16.mxu1 (!%p399_p9), %v1107_v17  ;;  %983 = vmatprep.subr.bf16.mxu0 (!%p399_p9), %v1107_v17  ;;  %v519_v18 = vld [vmem:[%s1375_s7 + $0x10] sm:$0xff] (!%p399_p9)  ;;  %v520_v19 = vld [vmem:[%s1375_s7 + $0x18] sm:$0xff] (!%p399_p9)  ;;  %vm1108_vm1 = vmmov (!%p399_p9), 0   ;;  %v1109_v21 = vmov (!%p399_p9), 0.0  }
  0x14   : > { %v975_v20 = vpack.c.bf16 (!%p399_p9), %v520_v19, %v519_v18  ;;  %938 = vmatprep.mubr.msk.f32.mxu1 (!%p399_p9), %vm1108_vm1, %v1109_v21  ;;  %968 = vmatprep.mubr.msk.f32.mxu0 (!%p399_p9), %vm1108_vm1, %v1109_v21  ;;  %s1390_s3 = sld [smem:[#allocation8_spill]] (!%p399_p9)  ;;  %v513_v30 = vld [vmem:[%s1374_s6] sm:$0xff] (!%p399_p9)  ;;  %v514_v31 = vld [vmem:[%s1374_s6 + $0x8] sm:$0xff] (!%p399_p9)  ;;  %v515_v37 = vld [vmem:[%s1374_s6 + $0x10] sm:$0xff] (!%p399_p9)  ;;  %s1391_s2 = sld [smem:[#allocation7_spill]] (!%p399_p9)  ;;  %vm699_vm2 = vcmask (!%p399_p9), 523264  }
  0x15   : > { %973 = vmatpush3.bf16.msra.mxu1 (!%p399_p9), %v972_v16  ;;  %v899_v32 = vld [vmem:[%s1373_s5] ss:$0 sm:$0xff] (!%p399_p9)  ;;  %v978_v34 = vpack.c.bf16 (!%p399_p9), %v514_v31, %v513_v30  ;;  %v516_v38 = vld [vmem:[%s1374_s6 + $0x18] sm:$0xff] (!%p399_p9)  ;;  %v685_v45 = vld [vmem:[%s1377_s9 + $0x8] sm:$0xff] (!%p399_p9)  ;;  %s908_s22 = sshll.u32 (!%p399_p9), %s1202_s29, 7 }
  0x16   : > { %974 = vmatprep.subr.bf16.mxu1 (!%p399_p9), %v1107_v17  ;;  %v981_v40 = vpack.c.bf16 (!%p399_p9), %v516_v38, %v515_v37  ;;  %v897_v42 = vld [vmem:[%s1372_s4] ss:$0 sm:$0xff] (!%p399_p9)  ;;  %v686_v47 = vld [vmem:[%s1377_s9 + $0x10] sm:$0xff] (!%p399_p9)  ;;  %v687_v48 = vld [vmem:[%s1377_s9 + $0x18] sm:$0xff] (!%p399_p9) }
  0x17   : > { %v684_v44 = vld [vmem:[%s1377_s9] sm:$0xff] (!%p399_p9)  ;;  %v987_v49 = vpack.c.bf16 (!%p399_p9), %v687_v48, %v686_v47  ;;  %v689_v51 = vld [vmem:[%s1377_s9 + $0x28] sm:$0xff] (!%p399_p9)  ;;  %v690_v53 = vld [vmem:[%s1377_s9 + $0x30] sm:$0xff] (!%p399_p9) }
  0x18   : > { %v984_v46 = vpack.c.bf16 (!%p399_p9), %v685_v45, %v684_v44  ;;  %v688_v50 = vld [vmem:[%s1377_s9 + $0x20] sm:$0xff] (!%p399_p9)  ;;  %v691_v54 = vld [vmem:[%s1377_s9 + $0x38] sm:$0xff] (!%p399_p9) }
  0x19   : > { %976 = vmatpush3.bf16.msra.mxu1 (!%p399_p9), %v975_v20  ;;  %v990_v52 = vpack.c.bf16 (!%p399_p9), %v689_v51, %v688_v50  ;;  %v993_v55 = vpack.c.bf16 (!%p399_p9), %v691_v54, %v690_v53  ;;  %v902_v59 = vld [vmem:[%s1376_s8] ss:$0 sm:$0xff] (!%p399_p9) }
  0x1a   : > { %s446_s20 = scalar_select %p445_p10, %s1202_s29, 1  ;;  %977 = vmatprep.subr.bf16.mxu1 %v1107_v17  ;;  %v898_v28 = vld [vmem:[%s1390_s3] ss:$0 sm:$0xff]  ;;  %985 = vmatpush3.bf16.msra.mxu0 %v984_v46 }
  0x1b   : > { %v896_v39 = vld [vmem:[%s1391_s2] ss:$0 sm:$0xff]  ;;  %986 = vmatprep.subr.bf16.mxu0 %v1107_v17  ;;  %s1325_s3 = scalar_lea.hbm %s1381_s13, %s908_s22  ;;  %s1110_s29 = smov [#allocation2]  }
  0x1c   : > { %s894_s21 = sshll.u32 %s446_s20, 3 }
  0x1d   : > { %s448_s24 = scalar_lea.vmem %s1388_s0, %s894_s21  ;;  %s452_s16 = scalar_lea.vmem %s1389_s1, %s894_s21 }
  0x1e   : > { %v453_v0 = vld [vmem:[%s448_s24] sm:$0xff]  ;;  %988 = vmatpush3.bf16.msra.mxu0 %v987_v49  ;;  %s442_s0 = sand.u32 1, %s1097_s26  }
  0x1f   : > { %v454_v1 = vld [vmem:[%s452_s16] sm:$0xff]  ;;  %v456_v2 = vsel %vm455_vm0, %v453_v0, 0.0  ;;  %989 = vmatprep.subr.bf16.mxu0 %v1107_v17  ;;  %s893_s1 = sshll.u32 %s442_s0, 3  ;;  %s805_s15 = scalar_lea.sflag [#allocation3], %s442_s0 }
  0x20   : > { %457 = vadd.xlane.f32.xlu0 %v456_v2  ;;  %v459_v3 = vsel %vm455_vm0, %v454_v1, 0.0  ;;  %s444_s23 = scalar_lea.vmem [#allocation2], %s893_s1  ;;  %s1047_s1 = sshll.u32 %s1110_s29, 4  ;;  %s1048_s1 = int_to_ptr.vmem [resolvable:$false] %s1047_s1 }
  0x21   : > { %s818_s24 = sshll.u32 %s444_s23, 4  ;;  %s1049_s20 = scalar_lea.vmem %s1048_s1, 256  ;;  %s1327_s24 = int_to_ptr.vmem [resolvable:$true] %s818_s24 }
  0x22   : > { %991 = vmatpush3.bf16.msra.mxu0 %v990_v52  ;;  %s1043_s16 = scalar_lea.vmem %s1327_s24, 128  ;;  %p1050_p0 = scmp.lt.s32.totalorder %s1327_s24, %s1048_s1 }
  0x23   : > { %992 = vmatprep.subr.bf16.mxu0 %v1107_v17  ;;  %p1044_p11 = scmp.ne.s32.totalorder %s1327_s24, %s1043_s16  ;;  %p1051_p1 = scmp.lt.s32.totalorder %s1049_s20, %s1043_s16 }
  0x24   : > { %460 = vadd.xlane.f32.xlu0 %v459_v3 }
  0x25   : > { %p1045_p12 = pnand %p1044_p11, %p1219_p5  ;;  %p1052_p2 = por %p1051_p1, %p1050_p0 }
  0x26   : > { %994 = vmatpush3.bf16.msra.mxu0 %v993_v55 }
  0x27   : > { %p1046_p13 = pneg %p1045_p12 }
  0x29   : > { %p1053_p3 = pnand %p1052_p2, %p1046_p13 }
  0xad   : > { %v458_v4 = vpop.xlane.xlu0 %457 }
  0xb1   : > { %v461_v5 = vpop.xlane.xlu0 %460 }
  0xb2   : > { %v462_v6 = vadd.f32 %v461_v5, %v458_v4 }
  0xb4   : > { %v464_v7 = vmul.f32 0.015625, %v462_v6 }
  0xb6   : > { %v465_v8 = vsub.f32 %v453_v0, %v464_v7  ;;  %v470_v9 = vsub.f32 %v454_v1, %v464_v7 }
  0xb8   : > { %v466_v10 = vmul.f32 %v465_v8, %v465_v8  ;;  %v471_v12 = vmul.f32 %v470_v9, %v470_v9 }
  0xba   : > { %v467_v11 = vsel %vm455_vm0, %v466_v10, 0.0  ;;  %v472_v13 = vsel %vm455_vm0, %v471_v12, 0.0 }
  0xbb   : > { %468 = vadd.xlane.f32.xlu1 %v467_v11 }
  0xbf   : > { %473 = vadd.xlane.f32.xlu1 %v472_v13 }
 0x148   : > { %v469_v22 = vpop.xlane.xlu1 %468 }
 0x14c   : > { %v474_v23 = vpop.xlane.xlu1 %473 }
 0x14d   : > { %v475_v24 = vadd.f32 %v474_v23, %v469_v22  ;;  %v905_v22 = vld [vmem:[%s1379_s11] ss:$0 sm:$0xff] }
 0x14f   : > { %v476_v25 = vmul.f32 0.015625, %v475_v24  ;;  %v906_v24 = vld [vmem:[%s1380_s12] ss:$0 sm:$0xff] }
 0x151   : > { %v477_v26 = vadd.f32 1e-05, %v476_v25 }
 0x153   : > { %1037 = vrsqrt.f32 %v477_v26 }
 0x15d   : > { %v1038_v27 = vpop.eup %1037 }
 0x15e   : > { %v496_v29 = vmul.f32 %v1038_v27, %v470_v9  ;;  %v479_v35 = vmul.f32 %v1038_v27, %v465_v8  ;;  %v903_v8 = vld [vmem:[%s1378_s10] ss:$0 sm:$0xff] }
 0x160   : > { %v504_v33 = vmul.f32 %v898_v28, %v496_v29  ;;  %v487_v41 = vmul.f32 %v896_v39, %v479_v35 }
 0x162   : > { %v512_v36 = vadd.f32 %v899_v32, %v504_v33  ;;  %v495_v43 = vadd.f32 %v897_v42, %v487_v41 }
 0x164   : > { %939 = vmatmul.mubr.msk.f32.vlgmr.msra.gmra.mrb[0].mxu1 %vm455_vm0, %v512_v36 }
 0x165   : > { %979 = vmatpush3.bf16.msra.mxu1 %v978_v34  ;;  %949 = vmatprep.mubr.msk.f32.mxu1 %vm1108_vm1, %v1109_v21 }
 0x166   : > { %980 = vmatprep.subr.bf16.mxu1 %v1107_v17 }
 0x169   : > { %982 = vmatpush3.bf16.msra.mxu1 %v981_v40 }
 0x16c   : > { %950 = vmatmul.mubr.msk.f32.vlgmr.msra.gmra.mrb[2].mxu1 %vm455_vm0, %v495_v43 }
 0x237   : > { %v590_v56 = vpop.f32.mrb[0].mxu1 }
 0x238   : > { %v940_v57 = vpop.f32.mrb[1].mxu1 }
 0x23f   : > { %v663_v58 = vpop.f32.mrb[2].mxu1 }
 0x240   : > { %v664_v60 = vadd.f32 %v663_v58, %v590_v56  ;;  %v951_v61 = vpop.f32.mrb[3].mxu1 }
 0x242   : > { %v674_v62 = vadd.f32 %v902_v59, %v664_v60 }
 0x244   : > { %v675_v63 = vmul.f32 %v674_v62, %v674_v62 }
 0x246   : > { %v676_v0 = vmul.f32 %v675_v63, %v674_v62 }
 0x248   : > { %v677_v1 = vmul.f32 0.044715, %v676_v0 }
 0x24a   : > { %v678_v2 = vadd.f32 %v677_v1, %v674_v62 }
 0x24c   : > { %v679_v3 = vmul.f32 0.7978846, %v678_v2 }
 0x24e   : > { %1039 = vtanh.f32 %v679_v3 }
 0x258   : > { %v1040_v4 = vpop.eup %1039 }
 0x259   : > { %v681_v5 = vadd.f32 1.0, %v1040_v4 }
 0x25b   : > { %v682_v6 = vmul.f32 0.5, %v681_v5 }
 0x25d   : > { %v683_v7 = vmul.f32 %v682_v6, %v674_v62 }
 0x25f   : > { %969 = vmatmul.mubr.msk.f32.vlgmr.msra.gmra.mrb[0].mxu0 %vm699_vm2, %v683_v7 }
 0x332   : > { %v769_v9 = vpop.f32.mrb[0].mxu0 }
 0x333   : > { %v770_v10 = vadd.f32 %v903_v8, %v769_v9  ;;  %v970_v11 = vpop.f32.mrb[1].mxu0 }
 0x335   : > { %v775_v12 = vsel %vm455_vm0, %v770_v10, 0.0 }
 0x336   : > { %776 = vadd.xlane.f32.xlu0 %v775_v12 }
 0x3c3   : > { %v777_v13 = vpop.xlane.xlu0 %776 }
 0x3c4   : > { %v779_v14 = vmul.f32 0.03125, %v777_v13 }
 0x3c6   : > { %v780_v15 = vsub.f32 %v770_v10, %v779_v14 }
 0x3c8   : > { %v781_v16 = vmul.f32 %v780_v15, %v780_v15 }
 0x3ca   : > { %v782_v17 = vsel %vm455_vm0, %v781_v16, 0.0 }
 0x3cb   : > { %783 = vadd.xlane.f32.xlu1 %v782_v17 }
 0x458   : > { %v784_v18 = vpop.xlane.xlu1 %783 }
 0x459   : > { %v785_v19 = vmul.f32 0.03125, %v784_v18 }
 0x45b   : > { %v786_v20 = vadd.f32 1e-05, %v785_v19 }
 0x45d   : > { %1041 = vrsqrt.f32 %v786_v20 }
 0x467   : > { %v1042_v21 = vpop.eup %1041 }
 0x468   : > { %v788_v23 = vmul.f32 %v1042_v21, %v780_v15 }
 0x46a   : > { %v795_v25 = vmul.f32 %v905_v22, %v788_v23 }
 0x46c   : > { %v802_v26 = vadd.f32 %v906_v24, %v795_v25 }
 0x46e   : > { %803 = vst.msk [vmem:[%s444_s23] sm:$0xff] %vm455_vm0, %v802_v26 }
 0x46f   : > { %1056 = shalt.err (!%p1053_p3)
}
 0x470   : > { %s1057_s2 = scalar_lea.hbm %s1325_s3, 128  ;;  %s1061_s22 = scalar_lea.hbm %s1381_s13, 256 }
 0x471   : > { %p1058_p4 = scmp.ne.s32.totalorder %s1325_s3, %s1057_s2  ;;  %p1062_p9 = scmp.lt.u32.totalorder %s1325_s3, %s1381_s13 }
 0x472   : > { %p1063_p10 = scmp.lt.u32.totalorder %s1061_s22, %s1057_s2  ;;  %p1065_p12 = scmp.lt.u32.totalorder %s1057_s2, %s1325_s3 }
 0x473   : > { %p1059_p7 = pnand %p1058_p4, %p1219_p5 }
 0x474   : > { %p1064_p11 = por %p1063_p10, %p1062_p9 }
 0x475   : > { %p1060_p8 = pneg %p1059_p7 }
 0x476   : > { %p1066_p13 = por %p1065_p12, %p1064_p11 }
 0x478   : > { %p1067_p0 = pnand %p1066_p13, %p1060_p8 }
 0x47a   : > { %1070 = shalt.err (!%p1067_p0)
}
 0x47b   : > { %995 = dma.vmem_to_hbm [thread:$0]  (%p1219_p5), %s1327_s24, 128, %s1325_s3, %s805_s15  }
 0x47c PF: > { %p1001_p1 = scmp.ge.s32.totalorder %s1105_s28, 2  ;;  %s830_s16 = sand.u32 1, %s1093_s25  }
 0x47d   : > { %s831_s29 = scalar_lea.sflag [#allocation3], %s830_s16 }
 0x47e   : > { %p998_p2 = pnand %p1001_p1, %p1223_p6 }
 0x480   : > { %1088 = dma.done.wait (!%p998_p2), %s831_s29, 128  }
 0x481   : > { %1090 = vsyncadd (!%p998_p2), %s831_s29, 4294967168  ;;  %p23_p3 = scmp.ge.s32.totalorder %s1206_s14, 4   ;;  %s1392_s25 = smov %s1097_s26 }
 0x482   : > { %s1393_s26 = smov %s1101_s27  ;;  %s1394_s27 = smov %s1217_s17 }
 0x483   : > { %s1395_s28 = smov %s1206_s14  ;;  %25 = sbr.rel (!%p23_p3) target bundleno = 8 (0x8), region = 110 }
 0x48a   :  { %836 = vsyncpa [#allocation3], 1 }
 0x48b   :  { %838 = vsyncpa [#allocation3 + $0x1], 1 }

</bundles_post_ra>
